<compile_context>
chip_gen: v7x
topology: tpu7x:2x2x1
jax: 0.10.0
libtpu: 0.0.40
codegen_flags: <defaults>
</compile_context>

<pallas_src>
import functools

import jax
import jax.numpy as jnp
from jax.experimental import pallas as pl
from jax.experimental.pallas import tpu as pltpu

f32 = jnp.float32
bf16 = jnp.bfloat16


# ----------------------------- Pallas kernel --------------------------------
def attn_decoder_kernel(
    # batch-tiled inputs
    action_ref, feature_ref, cand_ref, prev_h1_ref, c0_ref, ctx_ref, ctx_mask_ref,
    # resident parameters (bf16 matrices, f32 biases)
    w_emb_ref, b_emb_ref,              # action embedding: Linear(A, E) + Tanh
    w_feat_in_ref,                     # feat_att_layer.linear_in:      (H, F)
    w_ih_emb_ref, w_ih_feat_ref,       # LSTMCell W_ih split:   (E, 4H), (F, 4H)
    w_hh_ref, b_lstm_ref,              # LSTMCell:              (H, 4H), (1, 4H)
    w_attn_in_ref,                     # attention_layer.linear_in:     (H, H)
    w_attn_out_ctx_ref, w_attn_out_h_ref,  # attention_layer.linear_out split: 2x (H, H)
    w_cand_in_ref,                     # candidate_att_layer.linear_in: (H, F)
    # outputs
    h1_ref, c1_ref, alpha_ref, logit_ref, htilde_ref,
):
    H = prev_h1_ref.shape[-1]
    L = ctx_ref.shape[1]
    C = cand_ref.shape[1]
    NEG_BIG = jnp.asarray(-1e30, f32)   # finite mask value: no inf-inf -> NaN

    prev_h1 = prev_h1_ref[...]                               # (b, H) f32
    prev_h1_bf = prev_h1.astype(bf16)

    # ---- action embedding: tanh(action @ W_emb + b_emb); drop() is identity
    act_emb = jnp.tanh(
        jnp.dot(action_ref[...].astype(bf16), w_emb_ref[...],
                preferred_element_type=f32)
        + b_emb_ref[...])                                    # (b, E) f32

    # ---- feat_att_layer (SoftDotAttention, output_tilde=False)
    # Scores / weighted sum as bf16 VPU multiply + f32-accumulated XLU reduce:
    # no whole-block f32 copy of feature, MXU stays free for the weight matmuls.
    feat_bf = feature_ref[...]                               # (b, V, F) bf16
    target_f = jnp.dot(prev_h1_bf, w_feat_in_ref[...],
                       preferred_element_type=f32)           # (b, F) f32
    attn_f = jnp.sum(feat_bf * target_f.astype(bf16)[:, None, :],
                     axis=-1, dtype=f32)                     # (b, V)
    attn_f = jax.nn.softmax(attn_f, axis=-1)                 # f32
    attn_feat = jnp.sum(feat_bf * attn_f.astype(bf16)[:, :, None],
                        axis=1, dtype=f32)                   # (b, F)

    # ---- LSTMCell on cat(action_embeds, attn_feat) -> two dots, no concat
    gates = (jnp.dot(act_emb.astype(bf16), w_ih_emb_ref[...],
                     preferred_element_type=f32)
             + jnp.dot(attn_feat.astype(bf16), w_ih_feat_ref[...],
                       preferred_element_type=f32)
             + jnp.dot(prev_h1_bf, w_hh_ref[...],
                       preferred_element_type=f32)
             + b_lstm_ref[...])                              # (b, 4H) f32
    # NOTE: slices are lane-aligned at production H (512); f32 gate math on VPU.
    i_g = jax.nn.sigmoid(gates[:, 0 * H:1 * H])
    f_g = jax.nn.sigmoid(gates[:, 1 * H:2 * H])
    g_g = jnp.tanh(gates[:, 2 * H:3 * H])
    o_g = jax.nn.sigmoid(gates[:, 3 * H:4 * H])
    c1 = f_g * c0_ref[...] + i_g * g_g
    h1 = o_g * jnp.tanh(c1)
    h1_bf = h1.astype(bf16)

    # ---- attention_layer over ctx (SoftDotAttention, output_tilde=True)
    ctx_bf = ctx_ref[...]                                    # (b, L, H) bf16
    target_c = jnp.dot(h1_bf, w_attn_in_ref[...],
                       preferred_element_type=f32)           # (b, H) f32
    attn_c = jnp.sum(ctx_bf * target_c.astype(bf16)[:, None, :],
                     axis=-1, dtype=f32)                     # (b, L)
    attn_c = jnp.where(ctx_mask_ref[...] > 0.5, NEG_BIG, attn_c)
    alpha = jax.nn.softmax(attn_c, axis=-1)                  # f32
    weighted_ctx = jnp.sum(ctx_bf * alpha.astype(bf16)[:, :, None],
                           axis=1, dtype=f32)                # (b, H)
    # linear_out on cat(weighted_ctx, h1) -> split weight, no concat
    h_tilde = jnp.tanh(
        jnp.dot(weighted_ctx.astype(bf16), w_attn_out_ctx_ref[...],
                preferred_element_type=f32)
        + jnp.dot(h1_bf, w_attn_out_h_ref[...],
                  preferred_element_type=f32))               # (b, H)

    # ---- candidate_att_layer (output_prob=False -> raw logits, no softmax)
    cand_bf = cand_ref[...]                                  # (b, C, F) bf16
    target_cand = jnp.dot(h_tilde.astype(bf16), w_cand_in_ref[...],
                          preferred_element_type=f32)        # (b, F)
    logit = jnp.sum(cand_bf * target_cand.astype(bf16)[:, None, :],
                    axis=-1, dtype=f32)                      # (b, C)

    h1_ref[...] = h1
    c1_ref[...] = c1
    htilde_ref[...] = h_tilde

    # lane-dense stores: last dim of alpha / logit outputs is padded to >=128;
    # pad with zeros in-kernel and slice back in the wrapper.
    b = alpha.shape[0]
    Lp = alpha_ref.shape[-1]
    if Lp > L:
        alpha = jnp.concatenate([alpha, jnp.zeros((b, Lp - L), f32)], axis=-1)
    alpha_ref[...] = alpha
    Cp = logit_ref.shape[-1]
    if Cp > C:
        logit = jnp.concatenate([logit, jnp.zeros((b, Cp - C), f32)], axis=-1)
    logit_ref[...] = logit


# ------------------------------ wrapper helpers -------------------------------
def _round_up(x, m):
    return ((x + m - 1) // m) * m


def _batch_spec(shape, block_b):
    """Tile the leading (batch) dim; all trailing dims are one full block."""
    rest = len(shape) - 1
    return pl.BlockSpec((block_b,) + tuple(shape[1:]),
                        lambda i, _r=rest: (i,) + (0,) * _r)


def _resident_spec(shape):
    """Full-array, constant-index block: resident across the grid; single-buffered
    (the DMA happens once, so a second buffer only wastes VMEM)."""
    nd = len(shape)
    return pl.BlockSpec(tuple(shape), lambda i, _n=nd: (0,) * _n,
                        pipeline_mode=pl.Buffered(1))


def _pad_b(x, bp):
    b = x.shape[0]
    if b == bp:
        return x
    return jnp.pad(x, [(0, bp - b)] + [(0, 0)] * (x.ndim - 1))


def _tpu_vmem_capacity():
    try:
        return int(pltpu.get_tpu_info().vmem_capacity_bytes)
    except Exception:
        return 64 << 20     # conservative if unknown (v7x-sized)


def _vmem_limit_bytes():
    # <=75% of per-core VMEM, capped at 100 MiB (v5e/v6e: 128 MiB phys; v7x: 64 MiB).
    return int(min(_tpu_vmem_capacity() * 3 // 4, 100 << 20))


def _choose_block_b(batch):
    """Per-generation batch tile: large enough to feed the MXU (M >= 32) and
    amortize grid-step overhead, small enough that 2x(batch tile) + single-buffered
    weights fit the scoped VMEM budget. Splits big batches into >=2 blocks so the
    'parallel' axis shards across both v7x TensorCores."""
    target = 32 if _tpu_vmem_capacity() <= (64 << 20) else 64
    b8 = _round_up(max(batch, 1), 8)
    n_blocks = max(1, -(-b8 // target))               # ceil
    block_b = _round_up(-(-batch // n_blocks), 8)     # ceil(batch/n), 8-aligned
    return block_b


# ------------------------- one-time parameter prep ---------------------------
def prepare_params(params):
    """Cast weights to bf16 and split the concat-style matrices ONCE, outside the
    per-step jit, so each decode step pays no weight conversion/slice HBM passes."""
    E = params['w_emb'].shape[1]
    H = params['w_hh'].shape[0]
    w_ih = jnp.asarray(params['w_ih'], bf16)            # (E+F, 4H)
    w_attn_out = jnp.asarray(params['w_attn_out'], bf16)  # (2H, H)
    return {
        'w_emb':          jnp.asarray(params['w_emb'], bf16),
        'b_emb':          jnp.asarray(params['b_emb'], f32),
        'w_feat_in':      jnp.asarray(params['w_feat_in'], bf16),
        'w_ih_emb':       w_ih[:E],
        'w_ih_feat':      w_ih[E:],
        'w_hh':           jnp.asarray(params['w_hh'], bf16),
        'b_lstm':         jnp.asarray(params['b_lstm'], f32),
        'w_attn_in':      jnp.asarray(params['w_attn_in'], bf16),
        'w_attn_out_ctx': w_attn_out[:H],
        'w_attn_out_h':   w_attn_out[H:],
        'w_cand_in':      jnp.asarray(params['w_cand_in'], bf16),
    }


_WEIGHT_ORDER = ('w_emb', 'b_emb', 'w_feat_in', 'w_ih_emb', 'w_ih_feat',
                 'w_hh', 'b_lstm', 'w_attn_in', 'w_attn_out_ctx',
                 'w_attn_out_h', 'w_cand_in')


# --------------------------------- wrapper ------------------------------------
@functools.partial(jax.jit, static_argnames=("block_b",))
def _attn_decoder_step_jit(action, feature, cand_feat, prev_h1, c_0, ctx, ctx_mask,
                           weights, *, block_b):
    B, H = prev_h1.shape
    L = ctx.shape[1]
    C = cand_feat.shape[1]
    Bp = _round_up(B, block_b)
    Lp = _round_up(L, 128)      # lane-dense alpha store
    Cp = _round_up(C, 128)      # lane-dense logit store

    # Big activations should already be bf16 in HBM upstream; these casts are
    # no-ops in that case.
    batched = (
        action.astype(f32),
        feature.astype(bf16),
        cand_feat.astype(bf16),
        prev_h1.astype(f32),
        c_0.astype(f32),
        ctx.astype(bf16),
        ctx_mask.astype(f32),
    )
    batched = tuple(_pad_b(x, Bp) for x in batched)
    wts = tuple(weights[k] for k in _WEIGHT_ORDER)

    in_specs = ([_batch_spec(x.shape, block_b) for x in batched]
                + [_resident_spec(w.shape) for w in wts])

    out_shape = (
        jax.ShapeDtypeStruct((Bp, H), f32),    # h_1
        jax.ShapeDtypeStruct((Bp, H), f32),    # c_1
        jax.ShapeDtypeStruct((Bp, Lp), f32),   # alpha (lane-padded)
        jax.ShapeDtypeStruct((Bp, Cp), f32),   # logit (lane-padded)
        jax.ShapeDtypeStruct((Bp, H), f32),    # h_tilde
    )
    out_specs = tuple(_batch_spec(s.shape, block_b) for s in out_shape)

    h1, c1, alpha, logit, h_tilde = pl.pallas_call(
        attn_decoder_kernel,
        out_shape=out_shape,
        grid=(Bp // block_b,),
        in_specs=in_specs,
        out_specs=out_specs,
        input_output_aliases={3: 0, 4: 1},     # prev_h1 -> h_1, c_0 -> c_1
        compiler_params=pltpu.CompilerParams(
            dimension_semantics=("parallel",),  # megacore on v7x, harmless elsewhere
            vmem_limit_bytes=_vmem_limit_bytes(),
        ),
    )(*batched, *wts)

    return h1[:B], c1[:B], alpha[:B, :L], logit[:B, :C], h_tilde[:B]


def attn_decoder_step(action, feature, cand_feat, prev_h1, c_0, ctx, ctx_mask,
                      weights, *, block_b=None):
    if block_b is None:
        block_b = _choose_block_b(prev_h1.shape[0])
    return _attn_decoder_step_jit(action, feature, cand_feat, prev_h1, c_0, ctx,
                                  ctx_mask, weights, block_b=block_b)


# ------------------------------ reference ------------------------------------
def reference_step(action, feature, cand_feat, prev_h1, c_0, ctx, ctx_mask, p):
    H = prev_h1.shape[-1]
    act_emb = jnp.tanh(action @ p['w_emb'] + p['b_emb'])
    tgt_f = prev_h1 @ p['w_feat_in']
    a_f = jax.nn.softmax(jnp.einsum('bvf,bf->bv', feature, tgt_f), axis=-1)
    attn_feat = jnp.einsum('bv,bvf->bf', a_f, feature)
    x = jnp.concatenate([act_emb, attn_feat], -1)
    gates = x @ p['w_ih'] + prev_h1 @ p['w_hh'] + p['b_lstm']
    i, f, g, o = (jax.nn.sigmoid(gates[:, :H]), jax.nn.sigmoid(gates[:, H:2*H]),
                  jnp.tanh(gates[:, 2*H:3*H]), jax.nn.sigmoid(gates[:, 3*H:]))
    c1 = f * c_0 + i * g
    h1 = o * jnp.tanh(c1)
    tgt_c = h1 @ p['w_attn_in']
    sc = jnp.einsum('bld,bd->bl', ctx, tgt_c)
    sc = jnp.where(ctx_mask > 0.5, -1e30, sc)
    alpha = jax.nn.softmax(sc, axis=-1)
    wctx = jnp.einsum('bl,bld->bd', alpha, ctx)
    h_tilde = jnp.tanh(jnp.concatenate([wctx, h1], -1) @ p['w_attn_out'])
    logit = jnp.einsum('bcf,bf->bc', cand_feat, h_tilde @ p['w_cand_in'])
    return h1, c1, alpha, logit, h_tilde


# -------------------------------- main ----------------------------------------
if __name__ == "__main__":
    # small shapes consistent with the module
    B = 4            # batch
    A = 4            # angle_feat_size
    E = 16           # embedding_size
    H = 32           # hidden_size
    F = 64 + A       # feature_size (scaled-down analogue of 2048 + 4)
    V = 36           # panoramic views
    C = 8            # candidates
    L = 8            # instruction length

    key = jax.random.PRNGKey(0)
    ks = jax.random.split(key, 16)

    action = jax.random.normal(ks[0], (B, A), f32)
    feature = jax.random.normal(ks[1], (B, V, F), f32)
    cand_feat = jax.random.normal(ks[2], (B, C, F), f32)
    prev_h1 = jax.random.normal(ks[3], (B, H), f32) * 0.1
    c_0 = jax.random.normal(ks[4], (B, H), f32) * 0.1
    ctx = jax.random.normal(ks[5], (B, L, H), f32)
    lengths = jnp.array([8, 6, 7, 5])
    ctx_mask = (jnp.arange(L)[None, :] >= lengths[:, None]).astype(f32)   # 1 = masked

    s = 0.05
    params = {
        'w_emb':      jax.random.normal(ks[6],  (A, E), f32) * s,
        'b_emb':      jax.random.normal(ks[7],  (1, E), f32) * s,
        'w_feat_in':  jax.random.normal(ks[8],  (H, F), f32) * s,
        'w_ih':       jax.random.normal(ks[9],  (E + F, 4 * H), f32) * s,
        'w_hh':       jax.random.normal(ks[10], (H, 4 * H), f32) * s,
        'b_lstm':     jax.random.normal(ks[11], (1, 4 * H), f32) * s,   # b_ih + b_hh fused
        'w_attn_in':  jax.random.normal(ks[12], (H, H), f32) * s,
        'w_attn_out': jax.random.normal(ks[13], (2 * H, H), f32) * s,
        'w_cand_in':  jax.random.normal(ks[14], (H, F), f32) * s,
    }

    # One-time "data prep": weights cast/split once; big activations kept bf16 in HBM.
    weights = prepare_params(params)
    feature_bf = feature.astype(bf16)
    cand_bf = cand_feat.astype(bf16)
    ctx_bf = ctx.astype(bf16)

    outs = attn_decoder_step(action, feature_bf, cand_bf, prev_h1, c_0, ctx_bf,
                             ctx_mask, weights)
    outs = jax.block_until_ready(outs)

    # Reference on the same bf16-rounded weights / large inputs the kernel sees.
    # NOTE: the kernel runs bf16 operands with f32 accumulation, so the tolerance
    # bounds bf16-vs-f32 drift at these shapes, not exact f32 equality.
    def q(x):
        return x.astype(bf16).astype(f32)
    params_q = {k: (q(v) if k.startswith('w_') else v) for k, v in params.items()}
    refs = reference_step(action, q(feature), q(cand_feat), prev_h1, c_0,
                          q(ctx), ctx_mask, params_q)

    for o, r in zip(outs, refs):
        assert o.shape == r.shape
        assert jnp.max(jnp.abs(o - r)) < 3e-2, "mismatch vs reference"

    print("KERNEL_OK")
</pallas_src>

<mosaic_0001>
module attributes {stable_mosaic.version = 11 : i64} {
  func.func @attn_decoder_kernel(%arg0: i32, %arg1: memref<8x4xf32, #tpu.memory_space<vmem>>, %arg2: memref<8x36x68xbf16, #tpu.memory_space<vmem>>, %arg3: memref<8x8x68xbf16, #tpu.memory_space<vmem>>, %arg4: memref<8x32xf32, #tpu.memory_space<vmem>>, %arg5: memref<8x32xf32, #tpu.memory_space<vmem>>, %arg6: memref<8x8x32xbf16, #tpu.memory_space<vmem>>, %arg7: memref<8x8xf32, #tpu.memory_space<vmem>>, %arg8: memref<4x16xbf16, #tpu.memory_space<vmem>>, %arg9: memref<1x16xf32, #tpu.memory_space<vmem>>, %arg10: memref<32x68xbf16, #tpu.memory_space<vmem>>, %arg11: memref<16x128xbf16, #tpu.memory_space<vmem>>, %arg12: memref<68x128xbf16, #tpu.memory_space<vmem>>, %arg13: memref<32x128xbf16, #tpu.memory_space<vmem>>, %arg14: memref<1x128xf32, #tpu.memory_space<vmem>>, %arg15: memref<32x32xbf16, #tpu.memory_space<vmem>>, %arg16: memref<32x32xbf16, #tpu.memory_space<vmem>>, %arg17: memref<32x32xbf16, #tpu.memory_space<vmem>>, %arg18: memref<32x68xbf16, #tpu.memory_space<vmem>>, %arg19: memref<8x32xf32, #tpu.memory_space<vmem>>, %arg20: memref<8x32xf32, #tpu.memory_space<vmem>>, %arg21: memref<8x128xf32, #tpu.memory_space<vmem>>, %arg22: memref<8x128xf32, #tpu.memory_space<vmem>>, %arg23: memref<8x32xf32, #tpu.memory_space<vmem>>) attributes {dimension_semantics = [#tpu.dimension_semantics<parallel>], iteration_bounds = array<i64: 1>, scalar_prefetch = 0 : i64, scratch_operands = 0 : i64, tpu.core_type = #tpu.core_type<tc>, window_params = [{transform_indices = @transform_0, window_bounds = array<i64: 8, 4>}, {transform_indices = @transform_1, window_bounds = array<i64: 8, 36, 68>}, {transform_indices = @transform_2, window_bounds = array<i64: 8, 8, 68>}, {transform_indices = @transform_3, window_bounds = array<i64: 8, 32>}, {transform_indices = @transform_4, window_bounds = array<i64: 8, 32>}, {transform_indices = @transform_5, window_bounds = array<i64: 8, 8, 32>}, {transform_indices = @transform_6, window_bounds = array<i64: 8, 8>}, {pipeline_mode = #tpu.pipeline_mode<synchronous>, transform_indices = @transform_7, window_bounds = array<i64: 4, 16>}, {pipeline_mode = #tpu.pipeline_mode<synchronous>, transform_indices = @transform_8, window_bounds = array<i64: 1, 16>}, {pipeline_mode = #tpu.pipeline_mode<synchronous>, transform_indices = @transform_9, window_bounds = array<i64: 32, 68>}, {pipeline_mode = #tpu.pipeline_mode<synchronous>, transform_indices = @transform_10, window_bounds = array<i64: 16, 128>}, {pipeline_mode = #tpu.pipeline_mode<synchronous>, transform_indices = @transform_11, window_bounds = array<i64: 68, 128>}, {pipeline_mode = #tpu.pipeline_mode<synchronous>, transform_indices = @transform_12, window_bounds = array<i64: 32, 128>}, {pipeline_mode = #tpu.pipeline_mode<synchronous>, transform_indices = @transform_13, window_bounds = array<i64: 1, 128>}, {pipeline_mode = #tpu.pipeline_mode<synchronous>, transform_indices = @transform_14, window_bounds = array<i64: 32, 32>}, {pipeline_mode = #tpu.pipeline_mode<synchronous>, transform_indices = @transform_15, window_bounds = array<i64: 32, 32>}, {pipeline_mode = #tpu.pipeline_mode<synchronous>, transform_indices = @transform_16, window_bounds = array<i64: 32, 32>}, {pipeline_mode = #tpu.pipeline_mode<synchronous>, transform_indices = @transform_17, window_bounds = array<i64: 32, 68>}, {transform_indices = @transform_18, window_bounds = array<i64: 8, 32>}, {transform_indices = @transform_19, window_bounds = array<i64: 8, 32>}, {transform_indices = @transform_20, window_bounds = array<i64: 8, 128>}, {transform_indices = @transform_21, window_bounds = array<i64: 8, 128>}, {transform_indices = @transform_22, window_bounds = array<i64: 8, 32>}]} {
    %c0 = arith.constant 0 : index
    %c0_0 = arith.constant 0 : index
    %0 = vector.load %arg4[%c0, %c0_0] : memref<8x32xf32, #tpu.memory_space<vmem>>, vector<8x32xf32>
    %1 = arith.truncf %0 : vector<8x32xf32> to vector<8x32xbf16>
    %c0_1 = arith.constant 0 : index
    %c0_2 = arith.constant 0 : index
    %2 = vector.load %arg1[%c0_1, %c0_2] : memref<8x4xf32, #tpu.memory_space<vmem>>, vector<8x4xf32>
    %3 = arith.truncf %2 : vector<8x4xf32> to vector<8x4xbf16>
    %c0_3 = arith.constant 0 : index
    %c0_4 = arith.constant 0 : index
    %4 = vector.load %arg8[%c0_3, %c0_4] : memref<4x16xbf16, #tpu.memory_space<vmem>>, vector<4x16xbf16>
    %cst = arith.constant dense<0.000000e+00> : vector<8x16xf32>
    %5 = tpu.matmul %3, %4, %cst {dimension_numbers = #tpu.dot_dimension_numbers<[1], [0], [0], [1], [0, 0, 1, 1], [], []>} : vector<8x4xbf16>, vector<4x16xbf16>, vector<8x16xf32> -> vector<8x16xf32>
    %c0_5 = arith.constant 0 : index
    %c0_6 = arith.constant 0 : index
    %6 = vector.load %arg9[%c0_5, %c0_6] : memref<1x16xf32, #tpu.memory_space<vmem>>, vector<1x16xf32>
    %7 = vector.broadcast %6 : vector<1x16xf32> to vector<8x16xf32>
    %8 = arith.addf %5, %7 : vector<8x16xf32>
    %9 = math.tanh %8 : vector<8x16xf32>
    %c0_7 = arith.constant 0 : index
    %c0_8 = arith.constant 0 : index
    %c0_9 = arith.constant 0 : index
    %10 = vector.load %arg2[%c0_7, %c0_8, %c0_9] : memref<8x36x68xbf16, #tpu.memory_space<vmem>>, vector<8x36x68xbf16>
    %c0_10 = arith.constant 0 : index
    %c0_11 = arith.constant 0 : index
    %11 = vector.load %arg10[%c0_10, %c0_11] : memref<32x68xbf16, #tpu.memory_space<vmem>>, vector<32x68xbf16>
    %cst_12 = arith.constant dense<0.000000e+00> : vector<8x68xf32>
    %12 = tpu.matmul %1, %11, %cst_12 {dimension_numbers = #tpu.dot_dimension_numbers<[1], [0], [0], [1], [0, 0, 1, 1], [], []>} : vector<8x32xbf16>, vector<32x68xbf16>, vector<8x68xf32> -> vector<8x68xf32>
    %13 = arith.truncf %12 : vector<8x68xf32> to vector<8x68xbf16>
    %14 = vector.shape_cast %13 : vector<8x68xbf16> to vector<8x1x68xbf16>
    %15 = vector.broadcast %14 : vector<8x1x68xbf16> to vector<8x36x68xbf16>
    %16 = arith.mulf %10, %15 : vector<8x36x68xbf16>
    %17 = arith.extf %16 : vector<8x36x68xbf16> to vector<8x36x68xf32>
    %cst_13 = arith.constant dense<0.000000e+00> : vector<8x36xf32>
    %18 = vector.multi_reduction <add>, %17, %cst_13 [2] : vector<8x36x68xf32> to vector<8x36xf32>
    %cst_14 = arith.constant dense<0xFF800000> : vector<8xf32>
    %19 = vector.multi_reduction <maximumf>, %18, %cst_14 [1] : vector<8x36xf32> to vector<8xf32>
    %cst_15 = arith.constant 0xFF800000 : f32
    %20 = vector.broadcast %cst_15 : f32 to vector<8xf32>
    %21 = arith.maximumf %20, %19 : vector<8xf32>
    %22 = vector.shape_cast %21 : vector<8xf32> to vector<8x1xf32>
    %23 = vector.broadcast %22 : vector<8x1xf32> to vector<8x36xf32>
    %24 = arith.subf %18, %23 : vector<8x36xf32>
    %25 = math.exp %24 : vector<8x36xf32>
    %cst_16 = arith.constant dense<0.000000e+00> : vector<8xf32>
    %26 = vector.multi_reduction <add>, %25, %cst_16 [1] : vector<8x36xf32> to vector<8xf32>
    %27 = vector.shape_cast %26 : vector<8xf32> to vector<8x1xf32>
    %28 = vector.broadcast %27 : vector<8x1xf32> to vector<8x36xf32>
    %29 = arith.divf %25, %28 : vector<8x36xf32>
    %30 = arith.truncf %29 : vector<8x36xf32> to vector<8x36xbf16>
    %31 = vector.shape_cast %30 : vector<8x36xbf16> to vector<8x36x1xbf16>
    %32 = vector.broadcast %31 : vector<8x36x1xbf16> to vector<8x36x68xbf16>
    %33 = arith.mulf %10, %32 : vector<8x36x68xbf16>
    %34 = arith.extf %33 : vector<8x36x68xbf16> to vector<8x36x68xf32>
    %cst_17 = arith.constant dense<0.000000e+00> : vector<8x68xf32>
    %35 = vector.multi_reduction <add>, %34, %cst_17 [1] : vector<8x36x68xf32> to vector<8x68xf32>
    %36 = arith.truncf %9 : vector<8x16xf32> to vector<8x16xbf16>
    %c0_18 = arith.constant 0 : index
    %c0_19 = arith.constant 0 : index
    %37 = vector.load %arg11[%c0_18, %c0_19] : memref<16x128xbf16, #tpu.memory_space<vmem>>, vector<16x128xbf16>
    %cst_20 = arith.constant dense<0.000000e+00> : vector<8x128xf32>
    %38 = tpu.matmul %36, %37, %cst_20 {dimension_numbers = #tpu.dot_dimension_numbers<[1], [0], [0], [1], [0, 0, 1, 1], [], []>} : vector<8x16xbf16>, vector<16x128xbf16>, vector<8x128xf32> -> vector<8x128xf32>
    %39 = arith.truncf %35 : vector<8x68xf32> to vector<8x68xbf16>
    %c0_21 = arith.constant 0 : index
    %c0_22 = arith.constant 0 : index
    %40 = vector.load %arg12[%c0_21, %c0_22] : memref<68x128xbf16, #tpu.memory_space<vmem>>, vector<68x128xbf16>
    %cst_23 = arith.constant dense<0.000000e+00> : vector<8x128xf32>
    %41 = tpu.matmul %39, %40, %cst_23 {dimension_numbers = #tpu.dot_dimension_numbers<[1], [0], [0], [1], [0, 0, 1, 1], [], []>} : vector<8x68xbf16>, vector<68x128xbf16>, vector<8x128xf32> -> vector<8x128xf32>
    %42 = arith.addf %38, %41 : vector<8x128xf32>
    %c0_24 = arith.constant 0 : index
    %c0_25 = arith.constant 0 : index
    %43 = vector.load %arg13[%c0_24, %c0_25] : memref<32x128xbf16, #tpu.memory_space<vmem>>, vector<32x128xbf16>
    %cst_26 = arith.constant dense<0.000000e+00> : vector<8x128xf32>
    %44 = tpu.matmul %1, %43, %cst_26 {dimension_numbers = #tpu.dot_dimension_numbers<[1], [0], [0], [1], [0, 0, 1, 1], [], []>} : vector<8x32xbf16>, vector<32x128xbf16>, vector<8x128xf32> -> vector<8x128xf32>
    %45 = arith.addf %42, %44 : vector<8x128xf32>
    %c0_27 = arith.constant 0 : index
    %c0_28 = arith.constant 0 : index
    %46 = vector.load %arg14[%c0_27, %c0_28] : memref<1x128xf32, #tpu.memory_space<vmem>>, vector<1x128xf32>
    %47 = vector.broadcast %46 : vector<1x128xf32> to vector<8x128xf32>
    %48 = arith.addf %45, %47 : vector<8x128xf32>
    %49 = vector.extract_strided_slice %48 {offsets = [0, 0], sizes = [8, 32], strides = [1, 1]} : vector<8x128xf32> to vector<8x32xf32>
    %50 = arith.negf %49 : vector<8x32xf32>
    %51 = math.exp %50 : vector<8x32xf32>
    %cst_29 = arith.constant 1.000000e+00 : f32
    %52 = vector.broadcast %cst_29 : f32 to vector<8x32xf32>
    %53 = arith.addf %52, %51 : vector<8x32xf32>
    %54 = arith.divf %52, %53 : vector<8x32xf32>
    %55 = vector.extract_strided_slice %48 {offsets = [0, 32], sizes = [8, 32], strides = [1, 1]} : vector<8x128xf32> to vector<8x32xf32>
    %56 = arith.negf %55 : vector<8x32xf32>
    %57 = math.exp %56 : vector<8x32xf32>
    %cst_30 = arith.constant 1.000000e+00 : f32
    %58 = vector.broadcast %cst_30 : f32 to vector<8x32xf32>
    %59 = arith.addf %58, %57 : vector<8x32xf32>
    %60 = arith.divf %58, %59 : vector<8x32xf32>
    %61 = vector.extract_strided_slice %48 {offsets = [0, 64], sizes = [8, 32], strides = [1, 1]} : vector<8x128xf32> to vector<8x32xf32>
    %62 = math.tanh %61 : vector<8x32xf32>
    %63 = vector.extract_strided_slice %48 {offsets = [0, 96], sizes = [8, 32], strides = [1, 1]} : vector<8x128xf32> to vector<8x32xf32>
    %64 = arith.negf %63 : vector<8x32xf32>
    %65 = math.exp %64 : vector<8x32xf32>
    %cst_31 = arith.constant 1.000000e+00 : f32
    %66 = vector.broadcast %cst_31 : f32 to vector<8x32xf32>
    %67 = arith.addf %66, %65 : vector<8x32xf32>
    %68 = arith.divf %66, %67 : vector<8x32xf32>
    %c0_32 = arith.constant 0 : index
    %c0_33 = arith.constant 0 : index
    %69 = vector.load %arg5[%c0_32, %c0_33] : memref<8x32xf32, #tpu.memory_space<vmem>>, vector<8x32xf32>
    %70 = arith.mulf %60, %69 : vector<8x32xf32>
    %71 = arith.mulf %54, %62 : vector<8x32xf32>
    %72 = arith.addf %70, %71 : vector<8x32xf32>
    %73 = math.tanh %72 : vector<8x32xf32>
    %74 = arith.mulf %68, %73 : vector<8x32xf32>
    %75 = arith.truncf %74 : vector<8x32xf32> to vector<8x32xbf16>
    %c0_34 = arith.constant 0 : index
    %c0_35 = arith.constant 0 : index
    %c0_36 = arith.constant 0 : index
    %76 = vector.load %arg6[%c0_34, %c0_35, %c0_36] : memref<8x8x32xbf16, #tpu.memory_space<vmem>>, vector<8x8x32xbf16>
    %c0_37 = arith.constant 0 : index
    %c0_38 = arith.constant 0 : index
    %77 = vector.load %arg15[%c0_37, %c0_38] : memref<32x32xbf16, #tpu.memory_space<vmem>>, vector<32x32xbf16>
    %cst_39 = arith.constant dense<0.000000e+00> : vector<8x32xf32>
    %78 = tpu.matmul %75, %77, %cst_39 {dimension_numbers = #tpu.dot_dimension_numbers<[1], [0], [0], [1], [0, 0, 1, 1], [], []>} : vector<8x32xbf16>, vector<32x32xbf16>, vector<8x32xf32> -> vector<8x32xf32>
    %79 = arith.truncf %78 : vector<8x32xf32> to vector<8x32xbf16>
    %80 = vector.shape_cast %79 : vector<8x32xbf16> to vector<8x1x32xbf16>
    %81 = vector.broadcast %80 : vector<8x1x32xbf16> to vector<8x8x32xbf16>
    %82 = arith.mulf %76, %81 : vector<8x8x32xbf16>
    %83 = arith.extf %82 : vector<8x8x32xbf16> to vector<8x8x32xf32>
    %cst_40 = arith.constant dense<0.000000e+00> : vector<8x8xf32>
    %84 = vector.multi_reduction <add>, %83, %cst_40 [2] : vector<8x8x32xf32> to vector<8x8xf32>
    %c0_41 = arith.constant 0 : index
    %c0_42 = arith.constant 0 : index
    %85 = vector.load %arg7[%c0_41, %c0_42] : memref<8x8xf32, #tpu.memory_space<vmem>>, vector<8x8xf32>
    %cst_43 = arith.constant 5.000000e-01 : f32
    %86 = vector.broadcast %cst_43 : f32 to vector<8x8xf32>
    %87 = arith.cmpf ogt, %85, %86 : vector<8x8xf32>
    %cst_44 = arith.constant -1.000000e+30 : f32
    %88 = vector.broadcast %cst_44 : f32 to vector<8x8xf32>
    %89 = arith.select %87, %88, %84 : vector<8x8xi1>, vector<8x8xf32>
    %cst_45 = arith.constant dense<0xFF800000> : vector<8xf32>
    %90 = vector.multi_reduction <maximumf>, %89, %cst_45 [1] : vector<8x8xf32> to vector<8xf32>
    %cst_46 = arith.constant 0xFF800000 : f32
    %91 = vector.broadcast %cst_46 : f32 to vector<8xf32>
    %92 = arith.maximumf %91, %90 : vector<8xf32>
    %93 = vector.shape_cast %92 : vector<8xf32> to vector<8x1xf32>
    %94 = vector.broadcast %93 : vector<8x1xf32> to vector<8x8xf32>
    %95 = arith.subf %89, %94 : vector<8x8xf32>
    %96 = math.exp %95 : vector<8x8xf32>
    %cst_47 = arith.constant dense<0.000000e+00> : vector<8xf32>
    %97 = vector.multi_reduction <add>, %96, %cst_47 [1] : vector<8x8xf32> to vector<8xf32>
    %98 = vector.shape_cast %97 : vector<8xf32> to vector<8x1xf32>
    %99 = vector.broadcast %98 : vector<8x1xf32> to vector<8x8xf32>
    %100 = arith.divf %96, %99 : vector<8x8xf32>
    %101 = arith.truncf %100 : vector<8x8xf32> to vector<8x8xbf16>
    %102 = vector.shape_cast %101 : vector<8x8xbf16> to vector<8x8x1xbf16>
    %103 = vector.broadcast %102 : vector<8x8x1xbf16> to vector<8x8x32xbf16>
    %104 = arith.mulf %76, %103 : vector<8x8x32xbf16>
    %105 = arith.extf %104 : vector<8x8x32xbf16> to vector<8x8x32xf32>
    %cst_48 = arith.constant dense<0.000000e+00> : vector<8x32xf32>
    %106 = vector.multi_reduction <add>, %105, %cst_48 [1] : vector<8x8x32xf32> to vector<8x32xf32>
    %107 = arith.truncf %106 : vector<8x32xf32> to vector<8x32xbf16>
    %c0_49 = arith.constant 0 : index
    %c0_50 = arith.constant 0 : index
    %108 = vector.load %arg16[%c0_49, %c0_50] : memref<32x32xbf16, #tpu.memory_space<vmem>>, vector<32x32xbf16>
    %cst_51 = arith.constant dense<0.000000e+00> : vector<8x32xf32>
    %109 = tpu.matmul %107, %108, %cst_51 {dimension_numbers = #tpu.dot_dimension_numbers<[1], [0], [0], [1], [0, 0, 1, 1], [], []>} : vector<8x32xbf16>, vector<32x32xbf16>, vector<8x32xf32> -> vector<8x32xf32>
    %c0_52 = arith.constant 0 : index
    %c0_53 = arith.constant 0 : index
    %110 = vector.load %arg17[%c0_52, %c0_53] : memref<32x32xbf16, #tpu.memory_space<vmem>>, vector<32x32xbf16>
    %cst_54 = arith.constant dense<0.000000e+00> : vector<8x32xf32>
    %111 = tpu.matmul %75, %110, %cst_54 {dimension_numbers = #tpu.dot_dimension_numbers<[1], [0], [0], [1], [0, 0, 1, 1], [], []>} : vector<8x32xbf16>, vector<32x32xbf16>, vector<8x32xf32> -> vector<8x32xf32>
    %112 = arith.addf %109, %111 : vector<8x32xf32>
    %113 = math.tanh %112 : vector<8x32xf32>
    %c0_55 = arith.constant 0 : index
    %c0_56 = arith.constant 0 : index
    %c0_57 = arith.constant 0 : index
    %114 = vector.load %arg3[%c0_55, %c0_56, %c0_57] : memref<8x8x68xbf16, #tpu.memory_space<vmem>>, vector<8x8x68xbf16>
    %115 = arith.truncf %113 : vector<8x32xf32> to vector<8x32xbf16>
    %c0_58 = arith.constant 0 : index
    %c0_59 = arith.constant 0 : index
    %116 = vector.load %arg18[%c0_58, %c0_59] : memref<32x68xbf16, #tpu.memory_space<vmem>>, vector<32x68xbf16>
    %cst_60 = arith.constant dense<0.000000e+00> : vector<8x68xf32>
    %117 = tpu.matmul %115, %116, %cst_60 {dimension_numbers = #tpu.dot_dimension_numbers<[1], [0], [0], [1], [0, 0, 1, 1], [], []>} : vector<8x32xbf16>, vector<32x68xbf16>, vector<8x68xf32> -> vector<8x68xf32>
    %118 = arith.truncf %117 : vector<8x68xf32> to vector<8x68xbf16>
    %119 = vector.shape_cast %118 : vector<8x68xbf16> to vector<8x1x68xbf16>
    %120 = vector.broadcast %119 : vector<8x1x68xbf16> to vector<8x8x68xbf16>
    %121 = arith.mulf %114, %120 : vector<8x8x68xbf16>
    %122 = arith.extf %121 : vector<8x8x68xbf16> to vector<8x8x68xf32>
    %cst_61 = arith.constant dense<0.000000e+00> : vector<8x8xf32>
    %123 = vector.multi_reduction <add>, %122, %cst_61 [2] : vector<8x8x68xf32> to vector<8x8xf32>
    %c0_62 = arith.constant 0 : index
    %c0_63 = arith.constant 0 : index
    %124 = vector.load %arg19[%c0_62, %c0_63] : memref<8x32xf32, #tpu.memory_space<vmem>>, vector<8x32xf32>
    tpu.vector_store %arg19[%c0_62, %c0_63], %74 {strides = array<i32>} : memref<8x32xf32, #tpu.memory_space<vmem>>, vector<8x32xf32>,
    %c0_64 = arith.constant 0 : index
    %c0_65 = arith.constant 0 : index
    %125 = vector.load %arg20[%c0_64, %c0_65] : memref<8x32xf32, #tpu.memory_space<vmem>>, vector<8x32xf32>
    tpu.vector_store %arg20[%c0_64, %c0_65], %72 {strides = array<i32>} : memref<8x32xf32, #tpu.memory_space<vmem>>, vector<8x32xf32>,
    %c0_66 = arith.constant 0 : index
    %c0_67 = arith.constant 0 : index
    %126 = vector.load %arg23[%c0_66, %c0_67] : memref<8x32xf32, #tpu.memory_space<vmem>>, vector<8x32xf32>
    tpu.vector_store %arg23[%c0_66, %c0_67], %113 {strides = array<i32>} : memref<8x32xf32, #tpu.memory_space<vmem>>, vector<8x32xf32>,
    %cst_68 = arith.constant 0.000000e+00 : f32
    %127 = vector.broadcast %cst_68 : f32 to vector<8x120xf32>
    %128 = tpu.concatenate %100, %127 in 1 : vector<8x8xf32>, vector<8x120xf32> -> vector<8x128xf32>
    %c0_69 = arith.constant 0 : index
    %c0_70 = arith.constant 0 : index
    %129 = vector.load %arg21[%c0_69, %c0_70] : memref<8x128xf32, #tpu.memory_space<vmem>>, vector<8x128xf32>
    tpu.vector_store %arg21[%c0_69, %c0_70], %128 {strides = array<i32>} : memref<8x128xf32, #tpu.memory_space<vmem>>, vector<8x128xf32>,
    %cst_71 = arith.constant 0.000000e+00 : f32
    %130 = vector.broadcast %cst_71 : f32 to vector<8x120xf32>
    %131 = tpu.concatenate %123, %130 in 1 : vector<8x8xf32>, vector<8x120xf32> -> vector<8x128xf32>
    %c0_72 = arith.constant 0 : index
    %c0_73 = arith.constant 0 : index
    %132 = vector.load %arg22[%c0_72, %c0_73] : memref<8x128xf32, #tpu.memory_space<vmem>>, vector<8x128xf32>
    tpu.vector_store %arg22[%c0_72, %c0_73], %131 {strides = array<i32>} : memref<8x128xf32, #tpu.memory_space<vmem>>, vector<8x128xf32>,
    return
  }
  func.func @transform_0(%arg0: i32) -> (i32, i32) {
    %c0_i32 = arith.constant 0 : i32
    %c0_i32_0 = arith.constant 0 : i32
    return %arg0, %c0_i32 : i32, i32
  }
  func.func @transform_1(%arg0: i32) -> (i32, i32, i32) {
    %c0_i32 = arith.constant 0 : i32
    %c0_i32_0 = arith.constant 0 : i32
    %c0_i32_1 = arith.constant 0 : i32
    return %arg0, %c0_i32, %c0_i32_0 : i32, i32, i32
  }
  func.func @transform_2(%arg0: i32) -> (i32, i32, i32) {
    %c0_i32 = arith.constant 0 : i32
    %c0_i32_0 = arith.constant 0 : i32
    %c0_i32_1 = arith.constant 0 : i32
    return %arg0, %c0_i32, %c0_i32_0 : i32, i32, i32
  }
  func.func @transform_3(%arg0: i32) -> (i32, i32) {
    %c0_i32 = arith.constant 0 : i32
    %c0_i32_0 = arith.constant 0 : i32
    return %arg0, %c0_i32 : i32, i32
  }
  func.func @transform_4(%arg0: i32) -> (i32, i32) {
    %c0_i32 = arith.constant 0 : i32
    %c0_i32_0 = arith.constant 0 : i32
    return %arg0, %c0_i32 : i32, i32
  }
  func.func @transform_5(%arg0: i32) -> (i32, i32, i32) {
    %c0_i32 = arith.constant 0 : i32
    %c0_i32_0 = arith.constant 0 : i32
    %c0_i32_1 = arith.constant 0 : i32
    return %arg0, %c0_i32, %c0_i32_0 : i32, i32, i32
  }
  func.func @transform_6(%arg0: i32) -> (i32, i32) {
    %c0_i32 = arith.constant 0 : i32
    %c0_i32_0 = arith.constant 0 : i32
    return %arg0, %c0_i32 : i32, i32
  }
  func.func @transform_7(%arg0: i32) -> (i32, i32) {
    %c0_i32 = arith.constant 0 : i32
    %c0_i32_0 = arith.constant 0 : i32
    %c0_i32_1 = arith.constant 0 : i32
    return %c0_i32, %c0_i32_0 : i32, i32
  }
  func.func @transform_8(%arg0: i32) -> (i32, i32) {
    %c0_i32 = arith.constant 0 : i32
    %c0_i32_0 = arith.constant 0 : i32
    %c0_i32_1 = arith.constant 0 : i32
    return %c0_i32, %c0_i32_0 : i32, i32
  }
  func.func @transform_9(%arg0: i32) -> (i32, i32) {
    %c0_i32 = arith.constant 0 : i32
    %c0_i32_0 = arith.constant 0 : i32
    %c0_i32_1 = arith.constant 0 : i32
    return %c0_i32, %c0_i32_0 : i32, i32
  }
  func.func @transform_10(%arg0: i32) -> (i32, i32) {
    %c0_i32 = arith.constant 0 : i32
    %c0_i32_0 = arith.constant 0 : i32
    %c0_i32_1 = arith.constant 0 : i32
    return %c0_i32, %c0_i32_0 : i32, i32
  }
  func.func @transform_11(%arg0: i32) -> (i32, i32) {
    %c0_i32 = arith.constant 0 : i32
    %c0_i32_0 = arith.constant 0 : i32
    %c0_i32_1 = arith.constant 0 : i32
    return %c0_i32, %c0_i32_0 : i32, i32
  }
  func.func @transform_12(%arg0: i32) -> (i32, i32) {
    %c0_i32 = arith.constant 0 : i32
    %c0_i32_0 = arith.constant 0 : i32
    %c0_i32_1 = arith.constant 0 : i32
    return %c0_i32, %c0_i32_0 : i32, i32
  }
  func.func @transform_13(%arg0: i32) -> (i32, i32) {
    %c0_i32 = arith.constant 0 : i32
    %c0_i32_0 = arith.constant 0 : i32
    %c0_i32_1 = arith.constant 0 : i32
    return %c0_i32, %c0_i32_0 : i32, i32
  }
  func.func @transform_14(%arg0: i32) -> (i32, i32) {
    %c0_i32 = arith.constant 0 : i32
    %c0_i32_0 = arith.constant 0 : i32
    %c0_i32_1 = arith.constant 0 : i32
    return %c0_i32, %c0_i32_0 : i32, i32
  }
  func.func @transform_15(%arg0: i32) -> (i32, i32) {
    %c0_i32 = arith.constant 0 : i32
    %c0_i32_0 = arith.constant 0 : i32
    %c0_i32_1 = arith.constant 0 : i32
    return %c0_i32, %c0_i32_0 : i32, i32
  }
  func.func @transform_16(%arg0: i32) -> (i32, i32) {
    %c0_i32 = arith.constant 0 : i32
    %c0_i32_0 = arith.constant 0 : i32
    %c0_i32_1 = arith.constant 0 : i32
    return %c0_i32, %c0_i32_0 : i32, i32
  }
  func.func @transform_17(%arg0: i32) -> (i32, i32) {
    %c0_i32 = arith.constant 0 : i32
    %c0_i32_0 = arith.constant 0 : i32
    %c0_i32_1 = arith.constant 0 : i32
    return %c0_i32, %c0_i32_0 : i32, i32
  }
  func.func @transform_18(%arg0: i32) -> (i32, i32) {
    %c0_i32 = arith.constant 0 : i32
    %c0_i32_0 = arith.constant 0 : i32
    return %arg0, %c0_i32 : i32, i32
  }
  func.func @transform_19(%arg0: i32) -> (i32, i32) {
    %c0_i32 = arith.constant 0 : i32
    %c0_i32_0 = arith.constant 0 : i32
    return %arg0, %c0_i32 : i32, i32
  }
  func.func @transform_20(%arg0: i32) -> (i32, i32) {
    %c0_i32 = arith.constant 0 : i32
    %c0_i32_0 = arith.constant 0 : i32
    return %arg0, %c0_i32 : i32, i32
  }
  func.func @transform_21(%arg0: i32) -> (i32, i32) {
    %c0_i32 = arith.constant 0 : i32
    %c0_i32_0 = arith.constant 0 : i32
    return %arg0, %c0_i32 : i32, i32
  }
  func.func @transform_22(%arg0: i32) -> (i32, i32) {
    %c0_i32 = arith.constant 0 : i32
    %c0_i32_0 = arith.constant 0 : i32
    return %arg0, %c0_i32 : i32, i32
  }
}

</mosaic_0001>

<bundles_post_ra>
// kernel: _attn_decoder_step_jit.1
= control target key start
LH: loop header
LB: loop body
LE: loop exit
PB: predicated region body
PF: predicated region fallthrough
CT: control target
= control target key end

     0   :  { %v5280_v0 = vmov 0.0   ;;  %vm3635_vm0 = vmmov 0   ;;  %vm182_vm1 = vcmask 261120   ;;  %v3636_v5 = vmov 1966171168   ;;  %s5254_s9 = inlined_call_operand.vmem [shape: bf16[32,68], index: 9, kind: input, shape index: {}]   ;;  %s5255_s3 = inlined_call_operand.vmem [shape: f32[8,32], index: 3, kind: input, shape index: {}, may-alias: {3,18}]   ;;  %s5256_s1 = inlined_call_operand.vmem [shape: bf16[8,36,68], index: 1, kind: input, shape index: {}]   ;;  %s5257_s7 = inlined_call_operand.vmem [shape: bf16[4,16], index: 7, kind: input, shape index: {}]   ;;  %s5258_s11 = inlined_call_operand.vmem [shape: bf16[68,128], index: 11, kind: input, shape index: {}]   ;;  %s5259_s0 = inlined_call_operand.vmem [shape: f32[8,4], index: 0, kind: input, shape index: {}]   ;;  %s5260_s8 = inlined_call_operand.vmem [shape: f32[1,16], index: 8, kind: input, shape index: {}]   ;;  %s5261_s10 = inlined_call_operand.vmem [shape: bf16[16,128], index: 10, kind: input, shape index: {}]   ;;  %s5262_s12 = inlined_call_operand.vmem [shape: bf16[32,128], index: 12, kind: input, shape index: {}]   ;;  %s5263_s4 = inlined_call_operand.vmem [shape: f32[8,32], index: 4, kind: input, shape index: {}, may-alias: {4,19}]   ;;  %s5264_s13 = inlined_call_operand.vmem [shape: f32[1,128], index: 13, kind: input, shape index: {}]   ;;  %s5265_s14 = inlined_call_operand.vmem [shape: bf16[32,32], index: 14, kind: input, shape index: {}]   ;;  %s5266_s16 = inlined_call_operand.vmem [shape: bf16[32,32], index: 16, kind: input, shape index: {}]   ;;  %s5267_s5 = inlined_call_operand.vmem [shape: bf16[8,8,32], index: 5, kind: input, shape index: {}]   ;;  %s5268_s6 = inlined_call_operand.vmem [shape: f32[8,8], index: 6, kind: input, shape index: {}]   ;;  %s5269_s20 = inlined_call_operand.vmem [shape: f32[8,128], index: 20, kind: output, shape index: {2}]   ;;  %s5270_s15 = inlined_call_operand.vmem [shape: bf16[32,32], index: 15, kind: input, shape index: {}]   ;;  %s5271_s17 = inlined_call_operand.vmem [shape: bf16[32,68], index: 17, kind: input, shape index: {}]   ;;  %s5272_s22 = inlined_call_operand.vmem [shape: f32[8,32], index: 22, kind: output, shape index: {4}]   ;;  %s5273_s2 = inlined_call_operand.vmem [shape: bf16[8,8,68], index: 2, kind: input, shape index: {}]   ;;  %s5274_s19 = inlined_call_operand.vmem [shape: f32[8,32], index: 19, kind: output, shape index: {1}, may-alias: {4,19}]   ;;  %s5275_s18 = inlined_call_operand.vmem [shape: f32[8,32], index: 18, kind: output, shape index: {0}, may-alias: {3,18}]   ;;  %s5276_s21 = inlined_call_operand.vmem [shape: f32[8,128], index: 21, kind: output, shape index: {3}]  }
   0x1   :  { %5328 = sst [smem:[#allocation35_spill]] %s5254_s9  ;;  %3381 = vmatprep.subr.bf16.mxu1 %v5280_v0  ;;  %3385 = vmatprep.mubr.msk.bf16.mxu1 %vm3635_vm0, %v5280_v0  ;;  %v229_v6 = vunpack.c.l.s4 %v3636_v5  ;;  %v231_v7 = vlaneseq  ;;  %vm481_vm2 = vcmask 551936   ;;  %vm468_vm3 = vcmask 556032  }
   0x2   :  { %5329 = sst [smem:[#allocation36_spill]] %s5255_s3  ;;  %s5335_s29 = sld [smem:[#allocation35_spill]]  ;;  %3375 = vmatprep.subr.bf16.mxu0 %v5280_v0  ;;  %3377 = vmatprep.mubr.msk.bf16.mxu0 %vm3635_vm0, %v5280_v0  ;;  %vm641_vm4 = vcmask 130112   ;;  %vm648_vm5 = vcmask 195712   ;;  %vm655_vm6 = vcmask 261312   ;;  %vm662_vm7 = vcmask 326912  }
   0x3   :  { %5330 = sst [smem:[#allocation37_spill]] %s5256_s1  ;;  %s5336_s23 = sld [smem:[#allocation36_spill]]  ;;  %v230_v8 = vunpack.c.0.s8 %v229_v6  ;;  %v3782_v9 = vshrl.u32 %v231_v7, 7  ;;  %vm832_vm8 = vcmask 1041409   ;;  %vm834_vm9 = vcmask 1042434  }
   0x4   :  { %5331 = sst [smem:[#allocation38_spill]] %s5257_s7  ;;  %vm836_vm10 = vcmask 1043459   ;;  %vm838_vm11 = vcmask 1044484   ;;  %vm840_vm12 = vcmask 1045509   ;;  %vm842_vm13 = vcmask 1046534  }
   0x5   :  { %5332 = sst [smem:[#allocation39_spill]] %s5258_s11  ;;  %v3785_v10 = vsub.s32 %v230_v8, %v3782_v9  ;;  %v3790_v19 = vsub.s32 0, %v3782_v9  ;;  %vm844_vm14 = vcmask 1047559   ;;  %vm847_vm15 = vcmask 293888  }
   0x6   :  { %5333 = sst [smem:[#allocation40_spill]] %s5259_s0  ;;  %s5385_s0 = sld [smem:[#allocation38_spill]] }
   0x7   :  { %5334 = sst [smem:[#allocation41_spill]] %s5260_s8  ;;  %5338 = vst [vmem:[#allocation3_spill] sm:$0xff] %v3785_v10  ;;  %s5339_s8 = sld [smem:[#allocation37_spill]] }
   0x8   :  { %v3464_v1 = vld [vmem:[%s5335_s29] sm:$0xff]   ;;  %v3465_v2 = vld [vmem:[%s5335_s29 + $0x8] sm:$0xff]   ;;  %s5386_s24 = sld [smem:[#allocation40_spill]]  ;;  %s5421_s1 = sld [smem:[#allocation39_spill]] }
   0x9   :  { %3382 = vmatpush3.bf16.msra.mxu1 %v3464_v1  ;;  %v65_v3 = vld [vmem:[%s5336_s23] sm:$0xff]  ;;  %s5422_s28 = sld [smem:[#allocation41_spill]] }
   0xa   :  { %3383 = vmatprep.subr.bf16.mxu1 %v5280_v0  ;;  %v3774_v4 = vpack.c.bf16 %v65_v3, %v65_v3 }
   0xc   :  { %5337 = vst [vmem:[#allocation2_spill] sm:$0xff] %v3774_v4 }
   0xd   :  { %3384 = vmatpush3.bf16.msra.mxu1 %v3465_v2  ;;  %v130_v31 = vld [vmem:[%s5339_s8 + $0x10] sm:$0x3]  ;;  %v126_v32 = vld [vmem:[%s5339_s8] sm:$0xf]  ;;  %v127_v33 = vld [vmem:[%s5339_s8 + $0x4] sm:$0xf] }
   0xe   :  { %3403 = vmatprep.subr.bf16.mxu1 %v5280_v0  ;;  %v131_v38 = vld [vmem:[%s5339_s8 + $0x14] sm:$0xf]  ;;  %v128_v43 = vld [vmem:[%s5339_s8 + $0x8] sm:$0xf]  ;;  %v132_v44 = vld [vmem:[%s5339_s8 + $0x18] sm:$0xf] }
   0xf   :  { %v129_v57 = vld [vmem:[%s5339_s8 + $0xc] sm:$0xf]  ;;  %v133_v58 = vld [vmem:[%s5339_s8 + $0x1c] sm:$0xf]  ;;  %v136_v8 = vld [vmem:[%s5339_s8 + $0x28] sm:$0xf] }
  0x10   :  { %3386 = vmatmul.mubr.msk.bf16.vlgmr.msra.gmra.mrb[0].mxu1 %vm182_vm1, %v3774_v4  ;;  %v137_v6 = vld [vmem:[%s5339_s8 + $0x2c] sm:$0xf] }
  0x11   :  { %3405 = vmatprep.mubr.msk.bf16.mxu1 %vm3635_vm0, %v5280_v0 }
  0xe3   :  { %v220_v11 = vpop.f32.mrb[0].mxu1 }
  0xe4   :  { %v226_v12 = vpack.c.bf16 %v220_v11, %v220_v11  ;;  %v3387_v13 = vpop.f32.mrb[1].mxu1 }
  0xe5   :  { %v223_v14 = vpop.f32.mrb[2].mxu1 }
  0xe6   :  { %v234_v15 = vrot.slane %v226_v12, %v3785_v10  ;;  %v3388_v16 = vpop.f32.mrb[3].mxu1 }
  0xe8   :  { %v235_v17 = vcombine.high %v234_v15, %v234_v15  ;;  %v242_v18 = vrot.slane %v234_v15, %v3785_v10 }
  0xea   :  { %v3793_v20 = vrot.slane %v235_v17, %v3785_v10  ;;  %v253_v21 = vunpack.i.h.s16 %v242_v18  ;;  %v3302_v22 = vpack.i.b16 %v242_v18, %v242_v18  ;;  %v3811_v36 = vcombine.high %v242_v18, %v242_v18 }
  0xec   :  { %v261_v23 = vpack.i.b16 %v253_v21, %v253_v21  ;;  %v3303_v24 = vpack.i.b16 %v3793_v20, %v3793_v20  ;;  %v271_v25 = vrot.slane %v3302_v22, %v3790_v19  ;;  %v255_v45 = vunpack.i.h.s16 %v3793_v20  ;;  %v134_v21 = vld [vmem:[%s5339_s8 + $0x20] sm:$0xf]  ;;  %v138_v22 = vld [vmem:[%s5339_s8 + $0x30] sm:$0xf] }
  0xed   :  { %v3304_v49 = vpack.i.b16 %v3811_v36, %v3811_v36 }
  0xee   :  { %v275_v26 = vrot.slane %v261_v23, %v3790_v19  ;;  %v301_v27 = vpack.i.b16 %v271_v25, %v271_v25  ;;  %v279_v28 = vrot.slane %v3303_v24, %v3790_v19  ;;  %v263_v59 = vpack.i.b16 %v255_v45, %v255_v45  ;;  %v147_v45 = vld [vmem:[%s5339_s8 + $0x54] sm:$0xf] }
  0xef   :  { %v287_v60 = vrot.slane %v3304_v49, %v3790_v19  ;;  %v257_v23 = vunpack.i.h.s16 %v3811_v36 }
  0xf0   :  { %v306_v29 = vrot.slane %v301_v27, %v3790_v19  ;;  %v308_v30 = vpack.i.b16 %v275_v26, %v275_v26  ;;  %v315_v37 = vpack.i.b16 %v279_v28, %v279_v28  ;;  %v283_v11 = vrot.slane %v263_v59, %v3790_v19 }
  0xf1   :  { %v329_v12 = vpack.i.b16 %v287_v60, %v287_v60 }
  0xf2   :  { %v313_v34 = vrot.slane %v308_v30, %v3790_v19  ;;  %v3306_v35 = vcombine.low %v306_v29, %v306_v29  ;;  %v320_v50 = vrot.slane %v315_v37, %v3790_v19  ;;  %v322_v24 = vpack.i.b16 %v283_v11, %v283_v11 }
  0xf3   :  { %v334_v25 = vrot.slane %v329_v12, %v3790_v19 }
  0xf4   :  { %v3816_v39 = vcombine.low %v313_v34, %v313_v34  ;;  %v392_v40 = vmul.bf16 %v3306_v35, %v130_v31  ;;  %v388_v41 = vmul.bf16 %v3306_v35, %v126_v32  ;;  %v389_v42 = vmul.bf16 %v3306_v35, %v127_v33  ;;  %v139_v32 = vld [vmem:[%s5339_s8 + $0x34] sm:$0xf]  ;;  %v135_v33 = vld [vmem:[%s5339_s8 + $0x24] sm:$0x3] }
  0xf5   :  { %v390_v52 = vmul.bf16 %v3306_v35, %v128_v43  ;;  %v391_v62 = vmul.bf16 %v3306_v35, %v129_v57  ;;  %v3839_v63 = vcombine.low %v320_v50, %v320_v50  ;;  %v265_v34 = vpack.i.b16 %v257_v23, %v257_v23 }
  0xf6   :  { %v432_v46 = vunpack.c.l.bf16 %v392_v40  ;;  %v428_v47 = vunpack.c.l.bf16 %v388_v41  ;;  %v393_v48 = vmul.bf16 %v3816_v39, %v131_v38  ;;  %v429_v51 = vunpack.c.l.bf16 %v389_v42 }
  0xf7   :  { %v394_v56 = vmul.bf16 %v3816_v39, %v132_v44  ;;  %v430_v61 = vunpack.c.l.bf16 %v390_v52  ;;  %v395_v5 = vmul.bf16 %v3816_v39, %v133_v58  ;;  %v431_v14 = vunpack.c.l.bf16 %v391_v62  ;;  %v146_v44 = vld [vmem:[%s5339_s8 + $0x50] sm:$0xf] }
  0xf8   :  { %v482_v53 = vsel %vm481_vm2, %v432_v46, 0.0  ;;  %v469_v54 = vsel %vm468_vm3, %v428_v47, 0.0  ;;  %v433_v55 = vunpack.c.l.bf16 %v393_v48  ;;  %v472_v2 = vsel %vm468_vm3, %v429_v51, 0.0 }
  0xf9   :  { %483 = vadd.xlane.f32.xlu1 %v482_v53  ;;  %470 = vadd.xlane.f32.xlu0 %v469_v54  ;;  %v434_v3 = vunpack.c.l.bf16 %v394_v56  ;;  %v475_v13 = vsel %vm468_vm3, %v430_v61, 0.0  ;;  %v435_v16 = vunpack.c.l.bf16 %v395_v5  ;;  %v399_v17 = vmul.bf16 %v3839_v63, %v137_v6  ;;  %v140_v53 = vld [vmem:[%s5339_s8 + $0x38] sm:$0x3]  ;;  %v142_v54 = vld [vmem:[%s5339_s8 + $0x40] sm:$0xf] }
  0xfa   :  { %v485_v1 = vsel %vm468_vm3, %v433_v55, 0.0  ;;  %v398_v18 = vmul.bf16 %v3839_v63, %v136_v8  ;;  %v478_v26 = vsel %vm468_vm3, %v431_v14, 0.0  ;;  %v396_v27 = vmul.bf16 %v3816_v39, %v134_v21  ;;  %v144_v14 = vld [vmem:[%s5339_s8 + $0x48] sm:$0xf] }
  0xfb   :  { %v488_v15 = vsel %vm468_vm3, %v434_v3, 0.0  ;;  %v491_v28 = vsel %vm468_vm3, %v435_v16, 0.0  ;;  %v439_v29 = vunpack.c.l.bf16 %v399_v17  ;;  %v400_v31 = vmul.bf16 %v3839_v63, %v138_v22 }
  0xfc   :  { %v438_v30 = vunpack.c.l.bf16 %v398_v18  ;;  %v436_v35 = vunpack.c.l.bf16 %v396_v27  ;;  %v401_v36 = vmul.bf16 %v3839_v63, %v139_v32  ;;  %v3874_v37 = vcombine.low %v334_v25, %v334_v25 }
  0xfd   :  { %486 = vadd.xlane.f32.xlu1 %v485_v1  ;;  %473 = vadd.xlane.f32.xlu0 %v472_v2  ;;  %v327_v38 = vrot.slane %v322_v24, %v3790_v19  ;;  %v503_v40 = vsel %vm468_vm3, %v439_v29, 0.0  ;;  %v440_v42 = vunpack.c.l.bf16 %v400_v31  ;;  %v397_v43 = vmul.bf16 %v3816_v39, %v135_v33  ;;  %v148_v1 = vld [vmem:[%s5339_s8 + $0x58] sm:$0xf]  ;;  %v150_v24 = vld [vmem:[%s5339_s8 + $0x60] sm:$0x3] }
  0xfe   :  { %v500_v41 = vsel %vm468_vm3, %v438_v30, 0.0  ;;  %v291_v46 = vrot.slane %v265_v34, %v3790_v19  ;;  %v441_v47 = vunpack.c.l.bf16 %v401_v36  ;;  %v408_v48 = vmul.bf16 %v3874_v37, %v146_v44  ;;  %v145_v36 = vld [vmem:[%s5339_s8 + $0x4c] sm:$0x3] }
  0xff   :  { %v409_v49 = vmul.bf16 %v3874_v37, %v147_v45  ;;  %v494_v50 = vsel %vm468_vm3, %v436_v35, 0.0  ;;  %v506_v39 = vsel %vm468_vm3, %v440_v42, 0.0  ;;  %v437_v51 = vunpack.c.l.bf16 %v397_v43  ;;  %v141_v35 = vld [vmem:[%s5339_s8 + $0x3c] sm:$0xf] }
 0x100   :  { %v3891_v52 = vcombine.low %v327_v38, %v327_v38  ;;  %v251_v55 = vcombine.high %v3793_v20, %v3793_v20  ;;  %v336_v56 = vpack.i.b16 %v291_v46, %v291_v46  ;;  %v509_v57 = vsel %vm468_vm3, %v441_v47, 0.0  ;;  %v143_v20 = vld [vmem:[%s5339_s8 + $0x44] sm:$0xf]  ;;  %v152_v46 = vld [vmem:[%s5339_s8 + $0x68] sm:$0xf] }
 0x101   :  { %489 = vadd.xlane.f32.xlu1 %v488_v15  ;;  %476 = vadd.xlane.f32.xlu0 %v475_v13  ;;  %v448_v58 = vunpack.c.l.bf16 %v408_v48  ;;  %v497_v59 = vsel %vm481_vm2, %v437_v51, 0.0  ;;  %v449_v60 = vunpack.c.l.bf16 %v409_v49  ;;  %v402_v61 = vmul.bf16 %v3839_v63, %v140_v53  ;;  %v149_v13 = vld [vmem:[%s5339_s8 + $0x5c] sm:$0xf]  ;;  %v153_v47 = vld [vmem:[%s5339_s8 + $0x6c] sm:$0xf] }
 0x102   :  { %v404_v62 = vmul.bf16 %v3891_v52, %v142_v54  ;;  %v3305_v2 = vpack.i.b16 %v251_v55, %v251_v55  ;;  %v410_v5 = vmul.bf16 %v3874_v37, %v148_v1  ;;  %v341_v6 = vrot.slane %v336_v56, %v3790_v19  ;;  %v157_v56 = vld [vmem:[%s5339_s8 + $0x7c] sm:$0xf] }
 0x103   :  { %v530_v3 = vsel %vm468_vm3, %v448_v58, 0.0  ;;  %v533_v63 = vsel %vm468_vm3, %v449_v60, 0.0  ;;  %v442_v8 = vunpack.c.l.bf16 %v402_v61  ;;  %v405_v12 = vmul.bf16 %v3891_v52, %v143_v20  ;;  %v154_v20 = vld [vmem:[%s5339_s8 + $0x70] sm:$0xf] }
 0x104   :  { %v444_v11 = vunpack.c.l.bf16 %v404_v62  ;;  %v295_v15 = vrot.slane %v3305_v2, %v3790_v19  ;;  %v450_v16 = vunpack.c.l.bf16 %v410_v5  ;;  %v411_v17 = vmul.bf16 %v3874_v37, %v149_v13  ;;  %v158_v2 = vld [vmem:[%s5339_s8 + $0x80] sm:$0xf]  ;;  %v155_v13 = vld [vmem:[%s5339_s8 + $0x74] sm:$0x3] }
 0x105   :  { %492 = vadd.xlane.f32.xlu1 %v491_v28  ;;  %479 = vadd.xlane.f32.xlu0 %v478_v26  ;;  %v406_v18 = vmul.bf16 %v3891_v52, %v144_v14  ;;  %v512_v21 = vsel %vm481_vm2, %v442_v8, 0.0  ;;  %v445_v23 = vunpack.c.l.bf16 %v405_v12  ;;  %v3930_v25 = vcombine.low %v341_v6, %v341_v6  ;;  %v151_v26 = vld [vmem:[%s5339_s8 + $0x64] sm:$0xf] }
 0x106   :  { %v518_v22 = vsel %vm468_vm3, %v444_v11, 0.0  ;;  %v259_v27 = vunpack.i.h.s16 %v251_v55  ;;  %v343_v28 = vpack.i.b16 %v295_v15, %v295_v15  ;;  %v451_v29 = vunpack.c.l.bf16 %v411_v17  ;;  %v156_v55 = vld [vmem:[%s5339_s8 + $0x78] sm:$0xf]  ;;  %v159_v12 = vld [vmem:[%s5339_s8 + $0x84] sm:$0xf] }
 0x107   :  { %v412_v30 = vmul.bf16 %v3874_v37, %v150_v24  ;;  %v536_v31 = vsel %vm468_vm3, %v450_v16, 0.0  ;;  %v521_v32 = vsel %vm468_vm3, %v445_v23, 0.0  ;;  %v446_v33 = vunpack.c.l.bf16 %v406_v18  ;;  %v160_v23 = vld [vmem:[%s5339_s8 + $0x88] sm:$0x3] }
 0x108   :  { %v413_v34 = vmul.bf16 %v3930_v25, %v151_v26  ;;  %v267_v38 = vpack.i.b16 %v259_v27, %v259_v27  ;;  %v539_v37 = vsel %vm468_vm3, %v451_v29, 0.0  ;;  %v403_v44 = vmul.bf16 %v3891_v52, %v141_v35  ;;  %v161_v26 = vld [vmem:[%s5339_s8 + $0x8c] sm:$0xf] }
 0x109   :  { %504 = vadd.xlane.f32.xlu1 %v503_v40  ;;  %501 = vadd.xlane.f32.xlu0 %v500_v41  ;;  %v452_v40 = vunpack.c.l.bf16 %v412_v30  ;;  %v348_v41 = vrot.slane %v343_v28, %v3790_v19  ;;  %v524_v42 = vsel %vm468_vm3, %v446_v33, 0.0  ;;  %v407_v45 = vmul.bf16 %v3891_v52, %v145_v36  ;;  %v163_v33 = vld [vmem:[%s5339_s8 + $0x94] sm:$0xf] }
 0x10a   :  { %v453_v43 = vunpack.c.l.bf16 %v413_v34  ;;  %v299_v48 = vrot.slane %v267_v38, %v3790_v19  ;;  %v443_v52 = vunpack.c.l.bf16 %v403_v44  ;;  %v416_v6 = vmul.bf16 %v3930_v25, %v154_v20 }
 0x10b   :  { %v542_v49 = vsel %vm481_vm2, %v452_v40, 0.0  ;;  %v447_v53 = vunpack.c.l.bf16 %v407_v45  ;;  %v3312_v54 = vcombine.low %v348_v41, %v348_v41  ;;  %v417_v17 = vmul.bf16 %v3930_v25, %v155_v13  ;;  %v165_v41 = vld [vmem:[%s5339_s8 + $0x9c] sm:$0x3] }
 0x10c   :  { %v545_v51 = vsel %vm468_vm3, %v453_v43, 0.0  ;;  %v515_v60 = vsel %vm468_vm3, %v443_v52, 0.0  ;;  %v456_v15 = vunpack.c.l.bf16 %v416_v6 }
 0x10d   :  { %495 = vadd.xlane.f32.xlu1 %v494_v50  ;;  %507 = vadd.xlane.f32.xlu0 %v506_v39  ;;  %v414_v50 = vmul.bf16 %v3930_v25, %v152_v46  ;;  %v415_v39 = vmul.bf16 %v3930_v25, %v153_v47  ;;  %v527_v61 = vsel %vm481_vm2, %v447_v53, 0.0  ;;  %v418_v62 = vmul.bf16 %v3312_v54, %v156_v55 }
 0x10e   :  { %v419_v1 = vmul.bf16 %v3312_v54, %v157_v56  ;;  %v420_v11 = vmul.bf16 %v3312_v54, %v158_v2  ;;  %v421_v16 = vmul.bf16 %v3312_v54, %v159_v12  ;;  %v457_v27 = vunpack.c.l.bf16 %v417_v17 }
 0x10f   :  { %v454_v58 = vunpack.c.l.bf16 %v414_v50  ;;  %v422_v28 = vmul.bf16 %v3312_v54, %v160_v23  ;;  %v554_v29 = vsel %vm468_vm3, %v456_v15, 0.0 }
 0x110   :  { %v459_v8 = vunpack.c.l.bf16 %v419_v1  ;;  %v461_v30 = vunpack.c.l.bf16 %v421_v16  ;;  %v557_v34 = vsel %vm481_vm2, %v457_v27, 0.0 }
 0x111   :  { %510 = vadd.xlane.f32.xlu1 %v509_v57  ;;  %498 = vadd.xlane.f32.xlu0 %v497_v59  ;;  %v350_v57 = vpack.i.b16 %v299_v48, %v299_v48  ;;  %v455_v59 = vunpack.c.l.bf16 %v415_v39  ;;  %v462_v35 = vunpack.c.l.bf16 %v422_v28 }
 0x112   :  { %v569_v36 = vsel %vm468_vm3, %v461_v30, 0.0 }
 0x113   :  { %v551_v5 = vsel %vm468_vm3, %v455_v59, 0.0  ;;  %v355_v14 = vrot.slane %v350_v57, %v3790_v19  ;;  %v572_v43 = vsel %vm481_vm2, %v462_v35, 0.0 }
 0x115   :  { %531 = vadd.xlane.f32.xlu1 %v530_v3  ;;  %534 = vadd.xlane.f32.xlu0 %v533_v63  ;;  %v548_v3 = vsel %vm468_vm3, %v454_v58, 0.0  ;;  %v458_v63 = vunpack.c.l.bf16 %v418_v62  ;;  %v3313_v24 = vcombine.low %v355_v14, %v355_v14 }
 0x117   :  { %v560_v18 = vsel %vm468_vm3, %v458_v63, 0.0  ;;  %v425_v40 = vmul.bf16 %v3313_v24, %v163_v33  ;;  %v427_v44 = vmul.bf16 %v3313_v24, %v165_v41 }
 0x119   :  { %513 = vadd.xlane.f32.xlu1 %v512_v21  ;;  %519 = vadd.xlane.f32.xlu0 %v518_v22  ;;  %v563_v21 = vsel %vm468_vm3, %v459_v8, 0.0  ;;  %v460_v22 = vunpack.c.l.bf16 %v420_v11  ;;  %v465_v47 = vunpack.c.l.bf16 %v425_v40  ;;  %v467_v39 = vunpack.c.l.bf16 %v427_v44 }
 0x11b   :  { %v566_v25 = vsel %vm468_vm3, %v460_v22, 0.0  ;;  %v581_v50 = vsel %vm468_vm3, %v465_v47, 0.0  ;;  %v587_v52 = vsel %vm481_vm2, %v467_v39, 0.0 }
 0x11d   :  { %537 = vadd.xlane.f32.xlu1 %v536_v31  ;;  %522 = vadd.xlane.f32.xlu0 %v521_v32  ;;  %v423_v31 = vmul.bf16 %v3313_v24, %v161_v26  ;;  %v162_v32 = vld [vmem:[%s5339_s8 + $0x90] sm:$0xf] }
 0x11f   :  { %v463_v38 = vunpack.c.l.bf16 %v423_v31 }
 0x121   :  { %540 = vadd.xlane.f32.xlu1 %v539_v37  ;;  %525 = vadd.xlane.f32.xlu0 %v524_v42  ;;  %v424_v37 = vmul.bf16 %v3313_v24, %v162_v32  ;;  %v164_v42 = vld [vmem:[%s5339_s8 + $0x98] sm:$0xf]  ;;  %v575_v45 = vsel %vm468_vm3, %v463_v38, 0.0 }
 0x122   :  { %v426_v48 = vmul.bf16 %v3313_v24, %v164_v42 }
 0x123   :  { %v464_v46 = vunpack.c.l.bf16 %v424_v37 }
 0x125   :  { %543 = vadd.xlane.f32.xlu1 %v542_v49  ;;  %546 = vadd.xlane.f32.xlu0 %v545_v51  ;;  %v578_v49 = vsel %vm468_vm3, %v464_v46, 0.0  ;;  %v466_v51 = vunpack.c.l.bf16 %v426_v48 }
 0x127   :  { %v584_v53 = vsel %vm468_vm3, %v466_v51, 0.0 }
 0x129   :  { %516 = vadd.xlane.f32.xlu1 %v515_v60  ;;  %528 = vadd.xlane.f32.xlu0 %v527_v61 }
 0x12d   :  { %549 = vadd.xlane.f32.xlu1 %v548_v3  ;;  %552 = vadd.xlane.f32.xlu0 %v551_v5 }
 0x131   :  { %561 = vadd.xlane.f32.xlu1 %v560_v18  ;;  %564 = vadd.xlane.f32.xlu0 %v563_v21  ;;  %v631_v18 = vand.u32 127, %v231_v7 }
 0x133   :  { %v636_v23 = vadd.s32 4294967288, %v631_v18  ;;  %v643_v24 = vadd.s32 4294967280, %v631_v18  ;;  %v650_v26 = vadd.s32 4294967272, %v631_v18  ;;  %v4080_v7 = vsub.s32 %v631_v18, %v3782_v9 }
 0x135   :  { %567 = vadd.xlane.f32.xlu1 %v566_v25  ;;  %555 = vadd.xlane.f32.xlu0 %v554_v29  ;;  %v657_v25 = vadd.s32 4294967264, %v631_v18  ;;  %v4074_v29 = vsub.s32 %v636_v23, %v3782_v9  ;;  %v4077_v30 = vsub.s32 %v643_v24, %v3782_v9  ;;  %5343 = vst [vmem:[#allocation7_spill] sm:$0xff] %v4080_v7 }
 0x136   :  { %v4083_v31 = vsub.s32 %v650_v26, %v3782_v9 }
 0x137   :  { %5342 = vst [vmem:[#allocation6_spill] sm:$0xff] %v4074_v29 }
 0x139   :  { %570 = vadd.xlane.f32.xlu1 %v569_v36  ;;  %558 = vadd.xlane.f32.xlu0 %v557_v34  ;;  %v4090_v34 = vsub.s32 %v657_v25, %v3782_v9 }
 0x13d   :  { %573 = vadd.xlane.f32.xlu1 %v572_v43  ;;  %576 = vadd.xlane.f32.xlu0 %v575_v45 }
 0x141   :  { %579 = vadd.xlane.f32.xlu1 %v578_v49  ;;  %582 = vadd.xlane.f32.xlu0 %v581_v50 }
 0x145   :  { %588 = vadd.xlane.f32.xlu1 %v587_v52  ;;  %585 = vadd.xlane.f32.xlu0 %v584_v53 }
 0x186   :  { %v4016_v54 = vpop.xlane.xlu1 %483  ;;  %v4018_v55 = vpop.xlane.xlu0 %470 }
 0x187   :  { %v635_v41 = vrot.slane %v4018_v55, %v4080_v7  ;;  %v661_v39 = vrot.slane %v4016_v54, %v4090_v34 }
 0x18a   :  { %v4020_v56 = vpop.xlane.xlu1 %486  ;;  %v4022_v57 = vpop.xlane.xlu0 %473 }
 0x18b   :  { %v640_v35 = vrot.slane %v4022_v57, %v4074_v29  ;;  %v667_v42 = vrot.slane %v4020_v56, %v4080_v7 }
 0x18d   :  { %v642_v51 = vsel %vm641_vm4, %v640_v35, %v635_v41 }
 0x18e   :  { %v4024_v58 = vpop.xlane.xlu1 %489  ;;  %v4026_v59 = vpop.xlane.xlu0 %476 }
 0x18f   :  { %v671_v36 = vrot.slane %v4024_v58, %v4074_v29  ;;  %v647_v38 = vrot.slane %v4026_v59, %v4077_v30 }
 0x191   :  { %v672_v52 = vsel %vm641_vm4, %v671_v36, %v667_v42  ;;  %v649_v18 = vsel %vm648_vm5, %v647_v38, %v642_v51 }
 0x192   :  { %v4028_v60 = vpop.xlane.xlu1 %492  ;;  %v4030_v61 = vpop.xlane.xlu0 %479 }
 0x193   :  { %v676_v37 = vrot.slane %v4028_v60, %v4077_v30  ;;  %v654_v43 = vrot.slane %v4030_v61, %v4083_v31 }
 0x195   :  { %v677_v23 = vsel %vm648_vm5, %v676_v37, %v672_v52  ;;  %v656_v25 = vsel %vm655_vm6, %v654_v43, %v649_v18 }
 0x196   :  { %v4032_v62 = vpop.xlane.xlu1 %504  ;;  %v4034_v1 = vpop.xlane.xlu0 %501  ;;  %v663_v51 = vsel %vm662_vm7, %v661_v39, %v656_v25 }
 0x197   :  { %v695_v47 = vrot.slane %v4032_v62, %v4074_v29  ;;  %v691_v48 = vrot.slane %v4034_v1, %v4080_v7 }
 0x199   :  { %v696_v37 = vsel %vm641_vm4, %v695_v47, %v691_v48 }
 0x19a   :  { %v4036_v20 = vpop.xlane.xlu1 %495  ;;  %v4038_v2 = vpop.xlane.xlu0 %507 }
 0x19b   :  { %v681_v44 = vrot.slane %v4036_v20, %v4083_v31  ;;  %v700_v53 = vrot.slane %v4038_v2, %v4077_v30 }
 0x19d   :  { %v682_v0 = vsel %vm655_vm6, %v681_v44, %v677_v23  ;;  %v701_v44 = vsel %vm648_vm5, %v700_v53, %v696_v37 }
 0x19e   :  { %v4040_v3 = vpop.xlane.xlu1 %510  ;;  %v4042_v5 = vpop.xlane.xlu0 %498 }
 0x19f   :  { %v686_v49 = vrot.slane %v4042_v5, %v4090_v34  ;;  %v705_v24 = vrot.slane %v4040_v3, %v4083_v31 }
 0x1a1   :  { %v687_v42 = vsel %vm662_vm7, %v686_v49, %v682_v0  ;;  %v706_v52 = vsel %vm655_vm6, %v705_v24, %v701_v44 }
 0x1a2   :  { %v4044_v6 = vpop.xlane.xlu1 %531  ;;  %v4046_v63 = vpop.xlane.xlu0 %534  ;;  %v833_v48 = vsel %vm832_vm8, %v687_v42, %v663_v51 }
 0x1a3   :  { %v743_v43 = vrot.slane %v4046_v63, %v4074_v29 }
 0x1a6   :  { %v4048_v8 = vpop.xlane.xlu1 %513  ;;  %v4050_v11 = vpop.xlane.xlu0 %519 }
 0x1a7   :  { %v719_v50 = vrot.slane %v4050_v11, %v4074_v29  ;;  %v710_v35 = vrot.slane %v4048_v8, %v4090_v34 }
 0x1a9   :  { %v711_v49 = vsel %vm662_vm7, %v710_v35, %v706_v52 }
 0x1aa   :  { %v4052_v12 = vpop.xlane.xlu1 %537  ;;  %v4054_v13 = vpop.xlane.xlu0 %522  ;;  %v835_v42 = vsel %vm834_vm9, %v711_v49, %v833_v48 }
 0x1ab   :  { %v724_v36 = vrot.slane %v4054_v13, %v4077_v30  ;;  %v748_v23 = vrot.slane %v4052_v12, %v4077_v30 }
 0x1ae   :  { %v4056_v14 = vpop.xlane.xlu1 %540  ;;  %v4058_v15 = vpop.xlane.xlu0 %525 }
 0x1af   :  { %5340 = vst [vmem:[#allocation4_spill] sm:$0xff] %v4056_v14  ;;  %v729_v47 = vrot.slane %v4058_v15, %v4083_v31 }
 0x1b2   :  { %v4060_v16 = vpop.xlane.xlu1 %543  ;;  %v4062_v17 = vpop.xlane.xlu0 %546 }
 0x1b3   :  { %5341 = vst [vmem:[#allocation5_spill] sm:$0xff] %v4060_v16  ;;  %v763_v24 = vrot.slane %v4062_v17, %v4080_v7  ;;  %v758_v49 = vrot.slane %v4060_v16, %v4090_v34 }
 0x1b6   :  { %v4065_v21 = vpop.xlane.xlu1 %516  ;;  %v4067_v22 = vpop.xlane.xlu0 %528 }
 0x1b7   :  { %v715_v40 = vrot.slane %v4065_v21, %v4080_v7  ;;  %v734_v25 = vrot.slane %v4067_v22, %v4090_v34 }
 0x1b9   :  { %v720_v26 = vsel %vm641_vm4, %v719_v50, %v715_v40  ;;  %v739_v40 = vrot.slane %v4044_v6, %v4080_v7 }
 0x1ba   :  { %v4069_v27 = vpop.xlane.xlu1 %549  ;;  %v4071_v28 = vpop.xlane.xlu0 %552  ;;  %v725_v50 = vsel %vm648_vm5, %v724_v36, %v720_v26 }
 0x1bb   :  { %v767_v0 = vrot.slane %v4069_v27, %v4074_v29  ;;  %v744_v39 = vsel %vm641_vm4, %v743_v43, %v739_v40  ;;  %v730_v26 = vsel %vm655_vm6, %v729_v47, %v725_v50  ;;  %v772_v35 = vrot.slane %v4071_v28, %v4077_v30 }
 0x1bc   :  { %v753_v50 = vrot.slane %v4056_v14, %v4083_v31  ;;  %v735_v51 = vsel %vm662_vm7, %v734_v25, %v730_v26  ;;  %v749_v25 = vsel %vm648_vm5, %v748_v23, %v744_v39 }
 0x1bd   :  { %v768_v40 = vsel %vm641_vm4, %v767_v0, %v763_v24  ;;  %v837_v16 = vsel %vm836_vm10, %v735_v51, %v835_v42 }
 0x1be   :  { %v4085_v32 = vpop.xlane.xlu1 %561  ;;  %v4087_v33 = vpop.xlane.xlu0 %564  ;;  %v773_v4 = vsel %vm648_vm5, %v772_v35, %v768_v40  ;;  %v754_v14 = vsel %vm655_vm6, %v753_v50, %v749_v25 }
 0x1bf   :  { %5344 = vst [vmem:[#allocation8_spill] sm:$0xff] %v4085_v32  ;;  %v787_v36 = vrot.slane %v4085_v32, %v4080_v7  ;;  %v791_v37 = vrot.slane %v4087_v33, %v4074_v29 }
 0x1c2   :  { %v4110_v45 = vpop.xlane.xlu1 %567  ;;  %v4112_v46 = vpop.xlane.xlu0 %555 }
 0x1c3   :  { %5345 = vst [vmem:[#allocation9_spill] sm:$0xff] %v4110_v45  ;;  %v796_v43 = vrot.slane %v4110_v45, %v4077_v30  ;;  %v777_v44 = vrot.slane %v4112_v46, %v4083_v31 }
 0x1c6   :  { %v4139_v41 = vpop.xlane.xlu1 %570  ;;  %v4141_v38 = vpop.xlane.xlu0 %558 }
 0x1c7   :  { %5346 = vst [vmem:[#allocation10_spill] sm:$0xff] %v4139_v41  ;;  %v801_v52 = vrot.slane %v4139_v41, %v4083_v31  ;;  %v782_v47 = vrot.slane %v4141_v38, %v4090_v34  ;;  %v792_v41 = vsel %vm641_vm4, %v791_v37, %v787_v36  ;;  %v759_v36 = vsel %vm662_vm7, %v758_v49, %v754_v14 }
 0x1c8   :  { %v797_v32 = vsel %vm648_vm5, %v796_v43, %v792_v41 }
 0x1ca   :  { %v4159_v18 = vpop.xlane.xlu1 %573  ;;  %v4161_v53 = vpop.xlane.xlu0 %576 }
 0x1cb   :  { %5347 = vst [vmem:[#allocation11_spill] sm:$0xff] %v4159_v18  ;;  %v806_v24 = vrot.slane %v4159_v18, %v4090_v34  ;;  %v811_v10 = vrot.slane %v4161_v53, %v4080_v7  ;;  %v778_v18 = vsel %vm655_vm6, %v777_v44, %v773_v4 }
 0x1cc   :  { %v783_v39 = vsel %vm662_vm7, %v782_v47, %v778_v18 }
 0x1ce   :  { %v4190_v48 = vpop.xlane.xlu1 %579  ;;  %v4192_v0 = vpop.xlane.xlu0 %582 }
 0x1cf   :  { %v815_v26 = vrot.slane %v4190_v48, %v4074_v29  ;;  %v820_v45 = vrot.slane %v4192_v0, %v4077_v30  ;;  %v802_v29 = vsel %vm655_vm6, %v801_v52, %v797_v32  ;;  %v839_v32 = vsel %vm838_vm11, %v759_v36, %v837_v16 }
 0x1d0   :  { %v841_v42 = vsel %vm840_vm12, %v783_v39, %v839_v32  ;;  %v4233_v16 = vsub.s32 1, %v3782_v9 }
 0x1d1   :  { %v816_v7 = vsel %vm641_vm4, %v815_v26, %v811_v10  ;;  %v807_v10 = vsel %vm662_vm7, %v806_v24, %v802_v29  ;;  %v3637_v29 = vmov 0  }
 0x1d2   :  { %v4214_v23 = vpop.xlane.xlu1 %588  ;;  %v4216_v35 = vpop.xlane.xlu0 %585  ;;  %v821_v37 = vsel %vm648_vm5, %v820_v45, %v816_v7  ;;  %v843_v40 = vsel %vm842_vm13, %v807_v10, %v841_v42  ;;  %3463 = vset.pattern.permute.xlu0 %v3637_v29  ;;  %3462 = vset.pattern.permute.xlu1 %v3637_v29  ;;  %v4236_v7 = vsub.s32 2, %v3782_v9  ;;  %v4239_v45 = vsub.s32 3, %v3782_v9 }
 0x1d3   :  { %v830_v41 = vrot.slane %v4214_v23, %v4090_v34  ;;  %v825_v4 = vrot.slane %v4216_v35, %v4083_v31 }
 0x1d5   :  { %v826_v18 = vsel %vm655_vm6, %v825_v4, %v821_v37 }
 0x1d6   :  { %v831_v14 = vsel %vm662_vm7, %v830_v41, %v826_v18 }
 0x1d7   :  { %v845_v43 = vsel %vm844_vm14, %v831_v14, %v843_v40 }
 0x1d8   :  { %v848_v44 = vsel %vm847_vm15, %v845_v43, -inf }
 0x1d9   :  { %849 = vmax.xlane.f32.xlu0 %v848_v44 }
 0x266   :  { %v4241_v50 = vpop.xlane.xlu0 %849 }
 0x267   :  { %v4245_v51 = vrot.slane %v4241_v50, %v3790_v19  ;;  %v4249_v52 = vrot.slane %v4241_v50, %v4233_v16  ;;  %v4253_v47 = vrot.slane %v4241_v50, %v4236_v7  ;;  %v4257_v49 = vrot.slane %v4241_v50, %v4239_v45 }
 0x269   :  { %v893_v24 = vsub.f32 %v4022_v57, %v4245_v51  ;;  %v892_v26 = vsub.f32 %v4018_v55, %v4245_v51  ;;  %v904_v25 = vsub.f32 %v4038_v2, %v4253_v47  ;;  %v897_v39 = vsub.f32 %v4020_v56, %v4249_v52 }
 0x26a   :  { %v908_v10 = vsub.f32 %v4050_v11, %v4257_v49  ;;  %v898_v57 = vsub.f32 %v4024_v58, %v4249_v52  ;;  %v5297_v55 = vsub.s32 4, %v3782_v9  ;;  %v901_v2 = vsub.f32 %v4042_v5, %v4249_v52 }
 0x26b   :  { %v934_v36 = vmul.f32 1.442695, %v893_v24  ;;  %v932_v41 = vmul.f32 1.442695, %v892_v26  ;;  %v956_v4 = vmul.f32 1.442695, %v904_v25  ;;  %v894_v18 = vsub.f32 %v4026_v59, %v4245_v51 }
 0x26c   :  { %v942_v37 = vmul.f32 1.442695, %v897_v39  ;;  %v964_v32 = vmul.f32 1.442695, %v908_v10  ;;  %v944_v56 = vmul.f32 1.442695, %v898_v57  ;;  %v4279_v11 = vrot.slane %v4241_v50, %v5297_v55 }
 0x26d   :  { %3482 = vpow2.f32 %v934_v36  ;;  %v950_v42 = vmul.f32 1.442695, %v901_v2  ;;  %v909_v58 = vsub.f32 %v4054_v13, %v4257_v49  ;;  %v936_v14 = vmul.f32 1.442695, %v894_v18 }
 0x26e   :  { %3484 = vpow2.f32 %v932_v41  ;;  %v899_v5 = vsub.f32 %v4028_v60, %v4249_v52  ;;  %v5298_v59 = vsub.s32 5, %v3782_v9  ;;  %v913_v13 = vsub.f32 %v4046_v63, %v4279_v11 }
 0x26f   :  { %3486 = vpow2.f32 %v956_v4  ;;  %v966_v44 = vmul.f32 1.442695, %v909_v58  ;;  %v902_v60 = vsub.f32 %v4034_v1, %v4253_v47  ;;  %v910_v39 = vsub.f32 %v4058_v15, %v4257_v49 }
 0x270   :  { %3488 = vpow2.f32 %v942_v37  ;;  %v946_v29 = vmul.f32 1.442695, %v899_v5  ;;  %v4304_v25 = vrot.slane %v4241_v50, %v5298_v59  ;;  %v974_v63 = vmul.f32 1.442695, %v913_v13 }
 0x271   :  { %3490 = vpow2.f32 %v964_v32  ;;  %v952_v1 = vmul.f32 1.442695, %v902_v60  ;;  %v903_v36 = vsub.f32 %v4032_v62, %v4253_v47  ;;  %v968_v10 = vmul.f32 1.442695, %v910_v39 }
 0x272   :  { %3492 = vpow2.f32 %v944_v56  ;;  %v917_v37 = vsub.f32 %v4062_v17, %v4304_v25  ;;  %v895_v57 = vsub.f32 %v4030_v61, %v4245_v51  ;;  %v5296_v2 = vsub.s32 6, %v3782_v9 }
 0x273   :  { %3494 = vpow2.f32 %v950_v42  ;;  %v954_v15 = vmul.f32 1.442695, %v903_v36  ;;  %v911_v17 = vsub.f32 %v4067_v22, %v4257_v49  ;;  %v900_v61 = vsub.f32 %v4036_v20, %v4249_v52 }
 0x274   :  { %3496 = vpow2.f32 %v936_v14  ;;  %v982_v56 = vmul.f32 1.442695, %v917_v37  ;;  %v938_v18 = vmul.f32 1.442695, %v895_v57  ;;  %v4340_v14 = vrot.slane %v4241_v50, %v5296_v2 }
 0x275   :  { %3498 = vpow2.f32 %v966_v44  ;;  %v970_v22 = vmul.f32 1.442695, %v911_v17  ;;  %v919_v5 = vsub.f32 %v4071_v28, %v4304_v25  ;;  %v948_v20 = vmul.f32 1.442695, %v900_v61 }
 0x276   :  { %3500 = vpow2.f32 %v946_v29  ;;  %v907_v52 = vsub.f32 %v4065_v21, %v4257_v49  ;;  %v5295_v29 = vsub.s32 7, %v3782_v9  ;;  %v923_v28 = vsub.f32 %v4087_v33, %v4340_v14 }
 0x277   :  { %v4285_v40 = vpop.eup %3482  ;;  %3502 = vpow2.f32 %v974_v63  ;;  %v986_v60 = vmul.f32 1.442695, %v919_v5  ;;  %v896_v21 = vsub.f32 %v4016_v54, %v4245_v51  ;;  %v920_v36 = vsub.f32 %v4112_v46, %v4304_v25 }
 0x278   :  { %v4287_v43 = vpop.eup %3484  ;;  %1056 = vperm.xlu0 %3463, %v4285_v40   ;;  %3504 = vpow2.f32 %v952_v1  ;;  %v962_v63 = vmul.f32 1.442695, %v907_v52  ;;  %v4366_v1 = vrot.slane %v4241_v50, %v5295_v29  ;;  %v994_v33 = vmul.f32 1.442695, %v923_v28 }
 0x279   :  { %1053 = vperm.xlu1 %3462, %v4287_v43   ;;  %v4296_v24 = vpop.eup %3486  ;;  %3506 = vpow2.f32 %v968_v10  ;;  %v940_v54 = vmul.f32 1.442695, %v896_v21  ;;  %v905_v51 = vsub.f32 %v4040_v3, %v4253_v47  ;;  %v988_v50 = vmul.f32 1.442695, %v920_v36 }
 0x27a   :  { %5348 = vst [vmem:[#allocation12_spill] sm:$0xff] %v4296_v24  ;;  %v4298_v26 = vpop.eup %3488  ;;  %3508 = vpow2.f32 %v954_v15  ;;  %v927_v15 = vsub.f32 %v4161_v53, %v4366_v1  ;;  %v912_v57 = vsub.f32 %v4044_v6, %v4279_v11  ;;  %v906_v61 = vsub.f32 %v4048_v8, %v4253_v47 }
 0x27b   :  { %v4311_v41 = vpop.eup %3490  ;;  %3510 = vpow2.f32 %v982_v56  ;;  %v958_v46 = vmul.f32 1.442695, %v905_v51  ;;  %v914_v52 = vsub.f32 %v4052_v12, %v4279_v11  ;;  %v930_v28 = vsub.f32 %v4216_v35, %v4366_v1 }
 0x27c   :  { %1089 = vperm.xlu0 %3463, %v4296_v24   ;;  %5349 = vst [vmem:[#allocation13_spill] sm:$0xff] %v4311_v41  ;;  %v4313_v4 = vpop.eup %3492  ;;  %3512 = vpow2.f32 %v938_v18  ;;  %v1002_v17 = vmul.f32 1.442695, %v927_v15  ;;  %v921_v18 = vsub.f32 %v4141_v38, %v4304_v25  ;;  %v972_v53 = vmul.f32 1.442695, %v912_v57 }
 0x27d   :  { %1068 = vperm.xlu1 %3462, %v4298_v26   ;;  %v4321_v32 = vpop.eup %3494  ;;  %3514 = vpow2.f32 %v970_v22  ;;  %v960_v38 = vmul.f32 1.442695, %v906_v61 }
 0x27e   :  { %5350 = vst [vmem:[#allocation14_spill] sm:$0xff] %v4321_v32  ;;  %v4323_v62 = vpop.eup %3496  ;;  %3516 = vpow2.f32 %v948_v20  ;;  %v990_v5 = vmul.f32 1.442695, %v921_v18  ;;  %v929_v20 = vsub.f32 %v4192_v0, %v4366_v1  ;;  %v976_v0 = vmul.f32 1.442695, %v914_v52  ;;  %v5367_v18 = vld [vmem:[#allocation5_spill] sm:$0xff] }
 0x27f   :  { %5351 = vst [vmem:[#allocation15_spill] sm:$0xff] %v4323_v62  ;;  %v4332_v42 = vpop.eup %3498  ;;  %3518 = vpow2.f32 %v986_v60 }
 0x280   :  { %1101 = vperm.xlu0 %3463, %v4311_v41   ;;  %v4334_v58 = vpop.eup %3500  ;;  %3520 = vpow2.f32 %v962_v63  ;;  %v1006_v47 = vmul.f32 1.442695, %v929_v20  ;;  %v918_v63 = vsub.f32 %v4069_v27, %v4304_v25  ;;  %v5365_v25 = vld [vmem:[#allocation8_spill] sm:$0xff] }
 0x281   :  { %1071 = vperm.xlu1 %3462, %v4313_v4   ;;  %5352 = vst [vmem:[#allocation16_spill] sm:$0xff] %v4334_v58  ;;  %v4347_v44 = vpop.eup %3502  ;;  %3522 = vpow2.f32 %v994_v33  ;;  %v1008_v33 = vmul.f32 1.442695, %v930_v28  ;;  %v922_v15 = vsub.f32 %v5365_v25, %v4340_v14  ;;  %v5376_v25 = vld [vmem:[#allocation11_spill] sm:$0xff] }
 0x282   :  { %5353 = vst [vmem:[#allocation17_spill] sm:$0xff] %v4347_v44  ;;  %v4349_v13 = vpop.eup %3504  ;;  %3524 = vpow2.f32 %v940_v54  ;;  %v984_v36 = vmul.f32 1.442695, %v918_v63  ;;  %v5362_v54 = vld [vmem:[#allocation4_spill] sm:$0xff] }
 0x283   :  { %v4358_v49 = vpop.eup %3506  ;;  %3526 = vpow2.f32 %v988_v50  ;;  %v915_v35 = vsub.f32 %v5362_v54, %v4279_v11 }
 0x284   :  { %1080 = vperm.xlu0 %3463, %v4321_v32   ;;  %v4360_v39 = vpop.eup %3508  ;;  %3528 = vpow2.f32 %v958_v46 }
 0x285   :  { %1059 = vperm.xlu1 %3462, %v4323_v62   ;;  %v4373_v10 = vpop.eup %3510  ;;  %3530 = vpow2.f32 %v1002_v17  ;;  %v978_v27 = vmul.f32 1.442695, %v915_v35  ;;  %v992_v17 = vmul.f32 1.442695, %v922_v15  ;;  %v926_v15 = vsub.f32 %v5376_v25, %v4340_v14 }
 0x286   :  { %5354 = vst [vmem:[#allocation18_spill] sm:$0xff] %v4373_v10  ;;  %v4375_v37 = vpop.eup %3512  ;;  %3532 = vpow2.f32 %v972_v53  ;;  %v916_v53 = vsub.f32 %v5367_v18, %v4279_v11  ;;  %v931_v18 = vsub.f32 %v4214_v23, %v4366_v1 }
 0x287   :  { %5355 = vst [vmem:[#allocation19_spill] sm:$0xff] %v4375_v37  ;;  %v4383_v56 = vpop.eup %3514  ;;  %3534 = vpow2.f32 %v990_v5 }
 0x288   :  { %1104 = vperm.xlu0 %3463, %v4332_v42   ;;  %5356 = vst [vmem:[#allocation20_spill] sm:$0xff] %v4383_v56  ;;  %v4385_v3 = vpop.eup %3516  ;;  %3536 = vpow2.f32 %v960_v38  ;;  %v980_v20 = vmul.f32 1.442695, %v916_v53  ;;  %v5370_v38 = vld [vmem:[#allocation9_spill] sm:$0xff] }
 0x289   :  { %1074 = vperm.xlu1 %3462, %v4334_v58   ;;  %5357 = vst [vmem:[#allocation21_spill] sm:$0xff] %v4385_v3  ;;  %v4393_v22 = vpop.eup %3518  ;;  %3538 = vpow2.f32 %v1006_v47  ;;  %v924_v52 = vsub.f32 %v5370_v38, %v4340_v14 }
 0x28a   :  { %v4395_v6 = vpop.eup %3520  ;;  %3540 = vpow2.f32 %v976_v0  ;;  %v928_v0 = vsub.f32 %v4190_v48, %v4366_v1  ;;  %v1000_v48 = vmul.f32 1.442695, %v926_v15 }
 0x28b   :  { %5358 = vst [vmem:[#allocation22_spill] sm:$0xff] %v4395_v6  ;;  %v4403_v60 = vpop.eup %3522  ;;  %3542 = vpow2.f32 %v1008_v33  ;;  %v996_v11 = vmul.f32 1.442695, %v924_v52 }
 0x28c   :  { %1116 = vperm.xlu0 %3463, %v4347_v44   ;;  %5359 = vst [vmem:[#allocation23_spill] sm:$0xff] %v4403_v60  ;;  %v4405_v8 = vpop.eup %3524  ;;  %3544 = vpow2.f32 %v984_v36  ;;  %v1004_v33 = vmul.f32 1.442695, %v928_v0  ;;  %v5374_v36 = vld [vmem:[#allocation10_spill] sm:$0xff] }
 0x28d   :  { %1083 = vperm.xlu1 %3462, %v4349_v13   ;;  %5360 = vst [vmem:[#allocation24_spill] sm:$0xff] %v4405_v8  ;;  %v4413_v21 = vpop.eup %3526  ;;  %3546 = vpow2.f32 %v978_v27  ;;  %v925_v54 = vsub.f32 %v5374_v36, %v4340_v14 }
 0x28e   :  { %v4415_v12 = vpop.eup %3528  ;;  %3548 = vpow2.f32 %v992_v17 }
 0x28f   :  { %5361 = vst [vmem:[#allocation25_spill] sm:$0xff] %v4415_v12  ;;  %v4421_v51 = vpop.eup %3530  ;;  %3550 = vpow2.f32 %v980_v20  ;;  %v998_v27 = vmul.f32 1.442695, %v925_v54  ;;  %v1010_v20 = vmul.f32 1.442695, %v931_v18 }
 0x290   :  { %1107 = vperm.xlu0 %3463, %v4358_v49   ;;  %5363 = vst [vmem:[#allocation4_spill] sm:$0xff] %v4421_v51  ;;  %v4423_v50 = vpop.eup %3532  ;;  %3552 = vpow2.f32 %v996_v11 }
 0x291   :  { %1086 = vperm.xlu1 %3462, %v4360_v39   ;;  %5364 = vst [vmem:[#allocation26_spill] sm:$0xff] %v4423_v50  ;;  %v4429_v46 = vpop.eup %3534  ;;  %3554 = vpow2.f32 %v1004_v33 }
 0x292   :  { %5366 = vst [vmem:[#allocation8_spill] sm:$0xff] %v4429_v46  ;;  %v4431_v57 = vpop.eup %3536  ;;  %3556 = vpow2.f32 %v998_v27 }
 0x293   :  { %v4437_v61 = vpop.eup %3538  ;;  %3558 = vpow2.f32 %v1000_v48 }
 0x294   :  { %1128 = vperm.xlu0 %3463, %v4373_v10   ;;  %5368 = vst [vmem:[#allocation5_spill] sm:$0xff] %v4437_v61  ;;  %v4439_v5 = vpop.eup %3540  ;;  %3560 = vpow2.f32 %v1010_v20  ;;  %v5383_v10 = vld [vmem:[#allocation6_spill] sm:$0xff] }
 0x295   :  { %1062 = vperm.xlu1 %3462, %v4375_v37   ;;  %5369 = vst [vmem:[#allocation27_spill] sm:$0xff] %v4439_v5  ;;  %v4445_v47 = vpop.eup %3542 }
 0x296   :  { %5371 = vst [vmem:[#allocation9_spill] sm:$0xff] %v4445_v47  ;;  %v4447_v28 = vpop.eup %3544 }
 0x297   :  { %5372 = vst [vmem:[#allocation28_spill] sm:$0xff] %v4447_v28  ;;  %v4453_v63 = vpop.eup %3546 }
 0x298   :  { %1110 = vperm.xlu0 %3463, %v4383_v56   ;;  %5373 = vst [vmem:[#allocation29_spill] sm:$0xff] %v4453_v63  ;;  %v4458_v35 = vpop.eup %3548 }
 0x299   :  { %1077 = vperm.xlu1 %3462, %v4385_v3   ;;  %5375 = vst [vmem:[#allocation10_spill] sm:$0xff] %v4458_v35  ;;  %v4463_v17 = vpop.eup %3550 }
 0x29a   :  { %5377 = vst [vmem:[#allocation11_spill] sm:$0xff] %v4463_v17  ;;  %v4468_v53 = vpop.eup %3552 }
 0x29b   :  { %5378 = vst [vmem:[#allocation30_spill] sm:$0xff] %v4468_v53  ;;  %v4471_v38 = vpop.eup %3554 }
 0x29c   :  { %1134 = vperm.xlu0 %3463, %v4393_v22   ;;  %5379 = vst [vmem:[#allocation31_spill] sm:$0xff] %v4471_v38  ;;  %v4474_v14 = vpop.eup %3556 }
 0x29d   :  { %1098 = vperm.xlu1 %3462, %v4395_v6   ;;  %5380 = vst [vmem:[#allocation32_spill] sm:$0xff] %v4474_v14  ;;  %v4477_v52 = vpop.eup %3558 }
 0x29e   :  { %5381 = vst [vmem:[#allocation33_spill] sm:$0xff] %v4477_v52  ;;  %v4480_v23 = vpop.eup %3560 }
 0x29f   :  { %5382 = vst [vmem:[#allocation34_spill] sm:$0xff] %v4480_v23 }
 0x2a0   :  { %1146 = vperm.xlu0 %3463, %v4403_v60  }
 0x2a1   :  { %1065 = vperm.xlu1 %3462, %v4405_v8  }
 0x2a4   :  { %1137 = vperm.xlu0 %3463, %v4413_v21  }
 0x2a5   :  { %1092 = vperm.xlu1 %3462, %v4415_v12  }
 0x2a8   :  { %1158 = vperm.xlu0 %3463, %v4421_v51  }
 0x2a9   :  { %1113 = vperm.xlu1 %3462, %v4423_v50   ;;  %v5384_v50 = vld [vmem:[#allocation7_spill] sm:$0xff] }
 0x2ac   :  { %1140 = vperm.xlu0 %3463, %v4429_v46  }
 0x2ad   :  { %1095 = vperm.xlu1 %3462, %v4431_v57  }
 0x2b0   :  { %1164 = vperm.xlu0 %3463, %v4437_v61  }
 0x2b1   :  { %1119 = vperm.xlu1 %3462, %v4439_v5  }
 0x2b4   :  { %1167 = vperm.xlu0 %3463, %v4445_v47  }
 0x2b5   :  { %1131 = vperm.xlu1 %3462, %v4447_v28  }
 0x2b9   :  { %1122 = vperm.xlu1 %3462, %v4453_v63  }
 0x2bd   :  { %1143 = vperm.xlu1 %3462, %v4458_v35  }
 0x2c1   :  { %1125 = vperm.xlu1 %3462, %v4463_v17  }
 0x2c5   :  { %1149 = vperm.xlu1 %3462, %v4468_v53  }
 0x2c9   :  { %1161 = vperm.xlu1 %3462, %v4471_v38  }
 0x2cd   :  { %1152 = vperm.xlu1 %3462, %v4474_v14  }
 0x2d1   :  { %1155 = vperm.xlu1 %3462, %v4477_v52  }
 0x2d5   :  { %1170 = vperm.xlu1 %3462, %v4480_v23  }
 0x2f7   :  { %v1057_v1 = vpop.permute.xlu0 %1056 }
 0x2f8   :  { %v1054_v11 = vpop.permute.xlu1 %1053  ;;  %v1179_v44 = vrot.slane %v1057_v1, %v5383_v10 }
 0x2f9   :  { %v1175_v12 = vrot.slane %v1054_v11, %v5384_v50 }
 0x2fb   :  { %v4483_v33 = vpop.permute.xlu0 %1089  ;;  %v1180_v1 = vsel %vm641_vm4, %v1179_v44, %v1175_v12 }
 0x2fc   :  { %v1069_v0 = vpop.permute.xlu1 %1068  ;;  %v1232_v11 = vrot.slane %v4483_v33, %v4077_v30 }
 0x2fd   :  { %v1199_v3 = vrot.slane %v1069_v0, %v5384_v50 }
 0x2ff   :  { %v1102_v54 = vpop.permute.xlu0 %1101 }
 0x300   :  { %v1072_v36 = vpop.permute.xlu1 %1071 }
 0x301   :  { %v1203_v52 = vrot.slane %v1072_v36, %v5383_v10 }
 0x303   :  { %v1081_v15 = vpop.permute.xlu0 %1080 }
 0x304   :  { %v1060_v27 = vpop.permute.xlu1 %1059 }
 0x305   :  { %v1184_v41 = vrot.slane %v1060_v27, %v4077_v30  ;;  %v1251_v27 = vrot.slane %v1102_v54, %v5383_v10 }
 0x307   :  { %v1105_v18 = vpop.permute.xlu0 %1104 }
 0x308   :  { %v1075_v25 = vpop.permute.xlu1 %1074  ;;  %v1256_v44 = vrot.slane %v1105_v18, %v4077_v30 }
 0x309   :  { %v1208_v6 = vrot.slane %v1075_v25, %v4077_v30  ;;  %v1204_v25 = vsel %vm641_vm4, %v1203_v52, %v1199_v3 }
 0x30b   :  { %v4485_v2 = vpop.permute.xlu0 %1116  ;;  %v1209_v12 = vsel %vm648_vm5, %v1208_v6, %v1204_v25 }
 0x30c   :  { %v1084_v48 = vpop.permute.xlu1 %1083 }
 0x30d   :  { %v1223_v37 = vrot.slane %v1084_v48, %v5384_v50 }
 0x30f   :  { %v4487_v59 = vpop.permute.xlu0 %1107 }
 0x310   :  { %v1087_v20 = vpop.permute.xlu1 %1086 }
 0x311   :  { %v1227_v17 = vrot.slane %v1087_v20, %v5383_v10  ;;  %v1218_v20 = vrot.slane %v1081_v15, %v4090_v34 }
 0x313   :  { %v1129_v47 = vpop.permute.xlu0 %1128 }
 0x314   :  { %v1063_v29 = vpop.permute.xlu1 %1062 }
 0x315   :  { %v1189_v0 = vrot.slane %v1063_v29, %v4083_v31  ;;  %v1275_v29 = vrot.slane %v4485_v2, %v5383_v10 }
 0x317   :  { %v4489_v14 = vpop.permute.xlu0 %1110 }
 0x318   :  { %v1078_v55 = vpop.permute.xlu1 %1077  ;;  %v1266_v2 = vrot.slane %v4489_v14, %v4090_v34 }
 0x319   :  { %v1213_v58 = vrot.slane %v1078_v55, %v4083_v31  ;;  %v1185_v55 = vsel %vm648_vm5, %v1184_v41, %v1180_v1  ;;  %v1261_v41 = vrot.slane %v4487_v59, %v4083_v31 }
 0x31b   :  { %v4493_v51 = vpop.permute.xlu0 %1134  ;;  %v1214_v33 = vsel %vm655_vm6, %v1213_v58, %v1209_v12  ;;  %v1190_v58 = vsel %vm655_vm6, %v1189_v0, %v1185_v55 }
 0x31c   :  { %v1099_v23 = vpop.permute.xlu1 %1098 }
 0x31d   :  { %v1247_v56 = vrot.slane %v1099_v23, %v5384_v50  ;;  %v1228_v23 = vsel %vm641_vm4, %v1227_v17, %v1223_v37  ;;  %v1295_v37 = vrot.slane %v1129_v47, %v5384_v50  ;;  %v1304_v47 = vrot.slane %v4493_v51, %v4077_v30 }
 0x31f   :  { %v4497_v8 = vpop.permute.xlu0 %1146  ;;  %v1252_v54 = vsel %vm641_vm4, %v1251_v27, %v1247_v56  ;;  %v1233_v56 = vsel %vm648_vm5, %v1232_v11, %v1228_v23 }
 0x320   :  { %v1066_v46 = vpop.permute.xlu1 %1065  ;;  %v1257_v59 = vsel %vm648_vm5, %v1256_v44, %v1252_v54  ;;  %v1323_v25 = vrot.slane %v4497_v8, %v5383_v10 }
 0x321   :  { %v1194_v3 = vrot.slane %v1066_v46, %v4090_v34  ;;  %v1262_v51 = vsel %vm655_vm6, %v1261_v41, %v1257_v59 }
 0x323   :  { %v4501_v63 = vpop.permute.xlu0 %1137  ;;  %v1195_v17 = vsel %vm662_vm7, %v1194_v3, %v1190_v58 }
 0x324   :  { %v1093_v61 = vpop.permute.xlu1 %1092 }
 0x325   :  { %v1237_v52 = vrot.slane %v1093_v61, %v4083_v31  ;;  %v1219_v61 = vsel %vm662_vm7, %v1218_v20, %v1214_v33 }
 0x326   :  { %v1364_v0 = vsel %vm832_vm8, %v1219_v61, %v1195_v17 }
 0x327   :  { %v4505_v28 = vpop.permute.xlu0 %1158 }
 0x328   :  { %v4491_v53 = vpop.permute.xlu1 %1113  ;;  %v1343_v55 = vrot.slane %v4505_v28, %v5384_v50 }
 0x329   :  { %v1271_v46 = vrot.slane %v4491_v53, %v5384_v50 }
 0x32b   :  { %v4526_v62 = vpop.permute.xlu0 %1140  ;;  %v1276_v20 = vsel %vm641_vm4, %v1275_v29, %v1271_v46  ;;  %v1267_v29 = vsel %vm662_vm7, %v1266_v2, %v1262_v51 }
 0x32c   :  { %v1096_v38 = vpop.permute.xlu1 %1095 }
 0x32d   :  { %v1242_v15 = vrot.slane %v1096_v38, %v4090_v34  ;;  %v1238_v38 = vsel %vm655_vm6, %v1237_v52, %v1233_v56 }
 0x32f   :  { %v1165_v18 = vpop.permute.xlu0 %1164  ;;  %v1243_v14 = vsel %vm662_vm7, %v1242_v15, %v1238_v38 }
 0x330   :  { %v4495_v32 = vpop.permute.xlu1 %1119  ;;  %v1365_v12 = vsel %vm834_vm9, %v1243_v14, %v1364_v0  ;;  %v1352_v3 = vrot.slane %v1165_v18, %v4077_v30 }
 0x333   :  { %v1168_v52 = vpop.permute.xlu0 %1167 }
 0x334   :  { %v1132_v60 = vpop.permute.xlu1 %1131  ;;  %v1357_v56 = vrot.slane %v1168_v52, %v4083_v31 }
 0x335   :  { %v1299_v6 = vrot.slane %v1132_v60, %v5383_v10  ;;  %v1280_v60 = vrot.slane %v4495_v32, %v4077_v30 }
 0x337   :  { %v1300_v1 = vsel %vm641_vm4, %v1299_v6, %v1295_v37  ;;  %v1366_v6 = vsel %vm836_vm10, %v1267_v29, %v1365_v12 }
 0x338   :  { %v4499_v35 = vpop.permute.xlu1 %1122  ;;  %v1305_v23 = vsel %vm648_vm5, %v1304_v47, %v1300_v1  ;;  %v5387_v1 = vmov 0.0  }
 0x339   :  { %v1285_v53 = vrot.slane %v4499_v35, %v4083_v31 }
 0x33c   :  { %v4503_v5 = vpop.permute.xlu1 %1143 }
 0x33d   :  { %v1319_v35 = vrot.slane %v4503_v5, %v5384_v50  ;;  %v1309_v5 = vrot.slane %v4501_v63, %v4083_v31 }
 0x33f   :  { %v1310_v15 = vsel %vm655_vm6, %v1309_v5, %v1305_v23 }
 0x340   :  { %v4509_v24 = vpop.permute.xlu1 %1125 }
 0x341   :  { %v1290_v11 = vrot.slane %v4509_v24, %v4090_v34  ;;  %v1281_v24 = vsel %vm648_vm5, %v1280_v60, %v1276_v20  ;;  %v5388_v20 = vsub.s32 5, %v3782_v9 }
 0x344   :  { %v1150_v36 = vpop.permute.xlu1 %1149 }
 0x345   :  { %v1328_v44 = vrot.slane %v1150_v36, %v4077_v30  ;;  %v1324_v36 = vsel %vm641_vm4, %v1323_v25, %v1319_v35 }
 0x347   :  { %v1329_v63 = vsel %vm648_vm5, %v1328_v44, %v1324_v36 }
 0x348   :  { %v1162_v48 = vpop.permute.xlu1 %1161 }
 0x349   :  { %v1347_v32 = vrot.slane %v1162_v48, %v5383_v10  ;;  %v1286_v10 = vsel %vm655_vm6, %v1285_v53, %v1281_v24  ;;  %v1314_v48 = vrot.slane %v4526_v62, %v4090_v34  ;;  %v5389_v24 = vsub.s32 4, %v3782_v9 }
 0x34a   :  { %v1291_v33 = vsel %vm662_vm7, %v1290_v11, %v1286_v10 }
 0x34b   :  { %v1348_v54 = vsel %vm641_vm4, %v1347_v32, %v1343_v55  ;;  %v1367_v37 = vsel %vm838_vm11, %v1291_v33, %v1366_v6  ;;  %v1315_v59 = vsel %vm662_vm7, %v1314_v48, %v1310_v15  ;;  %vm81_vm4 = vcmask 1041408  }
 0x34c   :  { %v1153_v27 = vpop.permute.xlu1 %1152  ;;  %v1353_v30 = vsel %vm648_vm5, %v1352_v3, %v1348_v54  ;;  %v1368_v47 = vsel %vm840_vm12, %v1315_v59, %v1367_v37  ;;  %vm77_vm5 = vcmask 31744   ;;  %v5392_v37 = vld [vmem:[#allocation19_spill] sm:$0xff] }
 0x34d   :  { %v1333_v8 = vrot.slane %v1153_v27, %v4083_v31  ;;  %v1358_v60 = vsel %vm655_vm6, %v1357_v56, %v1353_v30  ;;  %v69_v31 = vld [vmem:[%s5385_s0] sm:$0x3]  ;;  %v5393_v30 = vld [vmem:[#allocation20_spill] sm:$0xff]  ;;  %v5396_v59 = vld [vmem:[#allocation11_spill] sm:$0xff] }
 0x34e   :  { %v83_v53 = vsel %vm81_vm4, %v69_v31, 0  ;;  %v5394_v56 = vld [vmem:[#allocation16_spill] sm:$0xff] }
 0x34f   :  { %v1334_v58 = vsel %vm655_vm6, %v1333_v8, %v1329_v63  ;;  %3376 = vmatpush3.bf16.msra.mxu0 %v83_v53  ;;  %v5391_v63 = vld [vmem:[#allocation15_spill] sm:$0xff]  ;;  %v5399_v53 = vld [vmem:[#allocation33_spill] sm:$0xff]  ;;  %vm2251_vm6 = vcmask 130048  }
 0x350   :  { %v1156_v28 = vpop.permute.xlu1 %1155  ;;  %3389 = vmatprep.subr.bf16.mxu0 %v5387_v1 }
 0x351   :  { %v1338_v41 = vrot.slane %v1156_v28, %v4090_v34 }
 0x353   :  { %v1339_v46 = vsel %vm662_vm7, %v1338_v41, %v1334_v58 }
 0x354   :  { %v1171_v2 = vpop.permute.xlu1 %1170  ;;  %v1369_v17 = vsel %vm842_vm13, %v1339_v46, %v1368_v47 }
 0x355   :  { %v1362_v61 = vrot.slane %v1171_v2, %v4090_v34  ;;  %v67_v34 = vld [vmem:[%s5386_s24] sm:$0xff]  ;;  %v5395_v2 = vld [vmem:[#allocation21_spill] sm:$0xff]  ;;  %s3638_s24 = smov 32  }
 0x356   :  { %v68_v14 = vpack.c.bf16 %v67_v34, %v67_v34 }
 0x357   :  { %v1363_v62 = vsel %vm662_vm7, %v1362_v61, %v1358_v60 }
 0x358   :  { %v1370_v38 = vsel %vm844_vm14, %v1363_v62, %v1369_v17  ;;  %3378 = vmatmul.mubr.msk.bf16.vlgmr.msra.gmra.mrb[0].mxu0 %vm77_vm5, %v68_v14  ;;  %v5397_v17 = vld [vmem:[#allocation22_spill] sm:$0xff] }
 0x359   :  { %v1372_v18 = vsel %vm847_vm15, %v1370_v38, 0.0  ;;  %3399 = vmatprep.mubr.msk.bf16.mxu0 %vm3635_vm0, %v5387_v1 }
 0x35a   :  { %1373 = vadd.xlane.f32.xlu0 %v1372_v18  ;;  %v5398_v18 = vld [vmem:[#allocation13_spill] sm:$0xff] }
 0x3e7   :  { %v4615_v11 = vpop.xlane.xlu0 %1373 }
 0x3e8   :  { %v1379_v32 = vrot.slane %v4615_v11, %v3790_v19  ;;  %v1383_v27 = vrot.slane %v4615_v11, %v4233_v16  ;;  %v1391_v51 = vrot.slane %v4615_v11, %v4239_v45  ;;  %v1387_v25 = vrot.slane %v4615_v11, %v4236_v7 }
 0x3e9   :  { %v1399_v35 = vrot.slane %v4615_v11, %v5388_v20  ;;  %v1395_v44 = vrot.slane %v4615_v11, %v5389_v24 }
 0x3ea   :  { %3562 = vrcp.f32 %v1379_v32 }
 0x3eb   :  { %3564 = vrcp.f32 %v1383_v27  ;;  %v5400_v27 = vld [vmem:[#allocation12_spill] sm:$0xff] }
 0x3ec   :  { %3566 = vrcp.f32 %v1391_v51 }
 0x3ed   :  { %3568 = vrcp.f32 %v1387_v25  ;;  %v5401_v25 = vld [vmem:[#allocation25_spill] sm:$0xff] }
 0x3ee   :  { %3570 = vrcp.f32 %v1399_v35 }
 0x3ef   :  { %3572 = vrcp.f32 %v1395_v44  ;;  %v5402_v44 = vld [vmem:[#allocation26_spill] sm:$0xff] }
 0x3f4   :  { %v4628_v0 = vpop.eup %3562 }
 0x3f5   :  { %v4630_v55 = vpop.eup %3564  ;;  %v1417_v12 = vmul.f32 %v4628_v0, %v4287_v43  ;;  %v1418_v23 = vmul.f32 %v4628_v0, %v4285_v40  ;;  %v5390_v43 = vsub.s32 6, %v3782_v9  ;;  %v1419_v48 = vmul.f32 %v4628_v0, %v5391_v63 }
 0x3f6   :  { %v3567_v10 = vpop.eup %3566  ;;  %v1423_v5 = vmul.f32 %v4630_v55, %v4298_v26  ;;  %v1424_v33 = vmul.f32 %v4630_v55, %v4313_v4  ;;  %v1425_v46 = vmul.f32 %v4630_v55, %v5394_v56  ;;  %v5414_v56 = vld [vmem:[#allocation31_spill] sm:$0xff] }
 0x3f7   :  { %v1464_v8 = vpack.c.bf16 %v1418_v23, %v1417_v12  ;;  %v3569_v54 = vpop.eup %3568  ;;  %v1437_v28 = vmul.f32 %v3567_v10, %v4332_v42  ;;  %v1438_v3 = vmul.f32 %v3567_v10, %v4358_v49  ;;  %v1403_v36 = vrot.slane %v4615_v11, %v5390_v43  ;;  %v5403_v23 = vld [vmem:[#allocation17_spill] sm:$0xff] }
 0x3f8   :  { %v4645_v52 = vpop.eup %3570  ;;  %v1467_v29 = vpack.c.bf16 %v1424_v33, %v1423_v5  ;;  %v1429_v42 = vmul.f32 %v3569_v54, %v4349_v13  ;;  %v1430_v49 = vmul.f32 %v3569_v54, %v4360_v39  ;;  %v1433_v15 = vmul.f32 %v3569_v54, %v4431_v57  ;;  %v5404_v5 = vld [vmem:[#allocation18_spill] sm:$0xff] }
 0x3f9   :  { %1490 = vperm.xlu1 %3462, %v1464_v8   ;;  %v1474_v40 = vpack.c.bf16 %v1438_v3, %v1437_v28  ;;  %v1449_v26 = vmul.f32 %v4645_v52, %v4393_v22  ;;  %v1450_v4 = vmul.f32 %v4645_v52, %v4413_v21  ;;  %3574 = vrcp.f32 %v1403_v36  ;;  %v3573_v58 = vpop.eup %3572  ;;  %v5405_v28 = vld [vmem:[#allocation28_spill] sm:$0xff] }
 0x3fa   :  { %v1470_v6 = vpack.c.bf16 %v1430_v49, %v1429_v42  ;;  %v1420_v22 = vmul.f32 %v4628_v0, %v5392_v37  ;;  %v1472_v21 = vpack.c.bf16 %v1433_v15, %v1433_v15  ;;  %v1439_v13 = vmul.f32 %v3567_v10, %v5393_v30  ;;  %v5409_v49 = vld [vmem:[#allocation10_spill] sm:$0xff]  ;;  %v5410_v15 = vld [vmem:[#allocation23_spill] sm:$0xff] }
 0x3fb   :  { %1530 = vperm.xlu0 %3463, %v1474_v40   ;;  %v1480_v41 = vpack.c.bf16 %v1450_v4, %v1449_v26  ;;  %v1426_v57 = vmul.f32 %v4630_v55, %v5395_v2  ;;  %v1445_v60 = vmul.f32 %v3573_v58, %v5396_v59  ;;  %v1435_v38 = vmul.f32 %v3567_v10, %v5397_v17  ;;  %v5407_v40 = vld [vmem:[#allocation27_spill] sm:$0xff]  ;;  %v5408_v4 = vld [vmem:[#allocation29_spill] sm:$0xff]  ;;  %v5416_v59 = vld [vmem:[#allocation32_spill] sm:$0xff] }
 0x3fc   :  { %v1465_v39 = vpack.c.bf16 %v1420_v22, %v1419_v48  ;;  %v1475_v61 = vpack.c.bf16 %v1439_v13, %v1439_v13  ;;  %v1436_v31 = vmul.f32 %v3567_v10, %v5398_v18  ;;  %v1431_v51 = vmul.f32 %v3569_v54, %v5400_v27  ;;  %v5411_v48 = vld [vmem:[#allocation24_spill] sm:$0xff] }
 0x3fd   :  { %1502 = vperm.xlu1 %3462, %v1467_v29   ;;  %v1468_v62 = vpack.c.bf16 %v1426_v57, %v1425_v46  ;;  %v1478_v34 = vpack.c.bf16 %v1445_v60, %v1445_v60  ;;  %v1432_v20 = vmul.f32 %v3569_v54, %v5401_v25  ;;  %v1441_v12 = vmul.f32 %v3573_v58, %v5402_v44  ;;  %v5415_v57 = vld [vmem:[#allocation30_spill] sm:$0xff]  ;;  %v3468_v44 = vld [vmem:[%s5421_s1 + $0x8] sm:$0xff]  }
 0x3fe   :  { %v1473_v32 = vpack.c.bf16 %v1436_v31, %v1435_v38  ;;  %v1442_v8 = vmul.f32 %v3573_v58, %v5403_v23  ;;  %v1447_v33 = vmul.f32 %v4645_v52, %v5404_v5  ;;  %v1448_v3 = vmul.f32 %v4645_v52, %v5405_v28  ;;  %v5418_v38 = vld [vmem:[#allocation9_spill] sm:$0xff]  ;;  %v5419_v31 = vld [vmem:[#allocation8_spill] sm:$0xff]  ;;  %v3297_v25 = vld [vmem:[%s5422_s28] ss:$0 sm:$0xff] }
 0x3ff   :  { %1554 = vperm.xlu0 %3463, %v1480_v41   ;;  %v1471_v24 = vpack.c.bf16 %v1432_v20, %v1431_v51  ;;  %v5406_v54 = vsub.s32 7, %v3782_v9  ;;  %v1443_v26 = vmul.f32 %v3573_v58, %v5407_v40  ;;  %v1444_v29 = vmul.f32 %v3573_v58, %v5408_v4  ;;  %v5413_v58 = vld [vmem:[#allocation4_spill] sm:$0xff]  ;;  %v3466_v5 = vld [vmem:[%s5421_s1 + $0x20] ss:$0 sps:$4 sm:$0x33]  }
 0x400   :  { %v1476_v10 = vpack.c.bf16 %v1442_v8, %v1441_v12  ;;  %v1479_v36 = vpack.c.bf16 %v1448_v3, %v1447_v33  ;;  %v1421_v37 = vmul.f32 %v4628_v0, %v5411_v48  ;;  %v3470_v23 = vld [vmem:[%s5421_s1 + $0x10] sm:$0xff]   ;;  %v2367_v8 = vld [vmem:[%s5263_s4] sm:$0xff]  ;;  %v2203_v3 = vsel %vm81_vm4, %v3466_v5, 0 }
 0x401   :  { %1514 = vperm.xlu1 %3462, %v1470_v6   ;;  %v1407_v43 = vrot.slane %v4615_v11, %v5406_v54  ;;  %v1477_v42 = vpack.c.bf16 %v1444_v29, %v1443_v26  ;;  %v5412_v11 = vld [vmem:[#allocation14_spill] sm:$0xff]  ;;  %v3639_v40 = vmov 839922192   ;;  %v3640_v4 = vmov 1985246804  }
 0x402   :  { %v1466_v22 = vpack.c.bf16 %v1421_v37, %v1421_v37  ;;  %v3471_v28 = vld [vmem:[%s5262_s12] sm:$0xff]   ;;  %v1609_v26 = vunpack.c.l.s4 %v3639_v40  ;;  %v1616_v29 = vunpack.c.l.s4 %v3640_v4 }
 0x403   :  { %1522 = vperm.xlu0 %3463, %v1472_v21   ;;  %v3575_v47 = vpop.eup %3574  ;;  %3576 = vrcp.f32 %v1407_v43  ;;  %v1427_v21 = vmul.f32 %v4630_v55, %v5412_v11  ;;  %v3473_v43 = vld [vmem:[%s5262_s12 + $0x8] sm:$0xff]  }
 0x404   :  { %v1457_v14 = vmul.f32 %v3575_v47, %v5399_v53  ;;  %v1453_v41 = vmul.f32 %v3575_v47, %v5409_v49  ;;  %v1454_v6 = vmul.f32 %v3575_v47, %v5410_v15  ;;  %v1456_v60 = vmul.f32 %v3575_v47, %v5416_v59  ;;  %v3596_v59 = vld [vmem:[%s5339_s8 + $0x44] sm:$0xf] }
 0x405   :  { %1494 = vperm.xlu1 %3462, %v1465_v39   ;;  %v1469_v13 = vpack.c.bf16 %v1427_v21, %v1427_v21  ;;  %v1610_v49 = vunpack.c.0.s8 %v1609_v26 }
 0x406   :  { %v1484_v35 = vpack.c.bf16 %v1457_v14, %v1457_v14  ;;  %v1482_v63 = vpack.c.bf16 %v1454_v6, %v1453_v41  ;;  %v5420_v14 = vld [vmem:[#allocation34_spill] sm:$0xff]  ;;  %v1617_v41 = vunpack.c.0.s8 %v1616_v29 }
 0x407   :  { %1534 = vperm.xlu0 %3463, %v1475_v61   ;;  %v1455_v61 = vmul.f32 %v3575_v47, %v5415_v57  ;;  %v3467_v47 = vld [vmem:[%s5421_s1] sm:$0xff]   ;;  %v4745_v6 = vsub.s32 %v1610_v49, %v3782_v9 }
 0x408   :  { %3390 = vmatpush3.bf16.msra.mxu0 %v3467_v47 }
 0x409   :  { %1506 = vperm.xlu1 %3462, %v1468_v62   ;;  %v1483_v0 = vpack.c.bf16 %v1456_v60, %v1455_v61  ;;  %v5417_v62 = vld [vmem:[#allocation5_spill] sm:$0xff]  ;;  %3391 = vmatprep.subr.bf16.mxu0 %v5387_v1 }
 0x40b   :  { %1546 = vperm.xlu0 %3463, %v1478_v34   ;;  %v1451_v34 = vmul.f32 %v4645_v52, %v5419_v31  ;;  %v3469_v52 = vld [vmem:[%s5261_s10] sm:$0xff]  }
 0x40c   :  { %3404 = vmatpush3.bf16.msra.mxu1 %v3469_v52  ;;  %3392 = vmatpush3.bf16.msra.mxu0 %v3468_v44  ;;  %v3600_v52 = vld [vmem:[%s5339_s8 + $0x3c] sm:$0xf] }
 0x40d   :  { %1526 = vperm.xlu1 %3462, %v1473_v32   ;;  %v3577_v30 = vpop.eup %3576  ;;  %v1481_v53 = vpack.c.bf16 %v1451_v34, %v1451_v34  ;;  %3409 = vmatprep.subr.bf16.mxu1 %v5387_v1 }
 0x40e   :  { %v1459_v39 = vmul.f32 %v3577_v30, %v5413_v58  ;;  %v1460_v46 = vmul.f32 %v3577_v30, %v5414_v56  ;;  %v1461_v17 = vmul.f32 %v3577_v30, %v5417_v62  ;;  %v1462_v18 = vmul.f32 %v3577_v30, %v5418_v38  ;;  %3393 = vmatprep.subr.bf16.mxu0 %v5387_v1  ;;  %v3594_v58 = vld [vmem:[%s5339_s8] sm:$0xf] }
 0x40f   :  { %1570 = vperm.xlu0 %3463, %v1484_v35   ;;  %v1463_v32 = vmul.f32 %v3577_v30, %v5420_v14 }
 0x410   :  { %v1485_v2 = vpack.c.bf16 %v1460_v46, %v1459_v39  ;;  %v1486_v55 = vpack.c.bf16 %v1462_v18, %v1461_v17  ;;  %3394 = vmatpush3.bf16.msra.mxu0 %v3470_v23  ;;  %v3597_v17 = vld [vmem:[%s5339_s8 + $0x14] sm:$0xf]  ;;  %v3598_v18 = vld [vmem:[%s5339_s8 + $0x18] sm:$0xf] }
 0x411   :  { %1518 = vperm.xlu1 %3462, %v1471_v24   ;;  %v1487_v27 = vpack.c.bf16 %v1463_v32, %v1463_v32  ;;  %3395 = vmatprep.subr.bf16.mxu0 %v5387_v1 }
 0x415   :  { %1538 = vperm.xlu1 %3462, %v1476_v10   ;;  %v3472_v10 = vld [vmem:[%s5421_s1 + $0x18] sm:$0xff]   ;;  %s3641_s1 = smov 64  }
 0x416   :  { %3396 = vmatpush3.bf16.msra.mxu0 %v3472_v10 }
 0x417   :  { %3397 = vmatprep.subr.bf16.mxu0 %v5387_v1 }
 0x419   :  { %1550 = vperm.xlu1 %3462, %v1479_v36   ;;  %v5423_v36 = vld [vmem:[#allocation2_spill] sm:$0xff] }
 0x41a   :  { %3398 = vmatpush3.bf16.msra.mxu0 %v2203_v3 }
 0x41b   :  { %3417 = vmatprep.subr.bf16.mxu0 %v5387_v1 }
 0x41d   :  { %1542 = vperm.xlu1 %3462, %v1477_v42  }
 0x421   :  { %1562 = vperm.xlu1 %3462, %v1482_v63   ;;  %v4748_v63 = vsub.s32 %v1617_v41, %v3782_v9  ;;  %v3595_v9 = vld [vmem:[%s5339_s8 + $0x4] sm:$0xf] }
 0x425   :  { %1498 = vperm.xlu1 %3462, %v1466_v22  }
 0x429   :  { %1510 = vperm.xlu1 %3462, %v1469_v13  }
 0x42b   :  { %v119_v51 = vpop.f32.mrb[0].mxu0 }
 0x42c   :  { %v3379_v20 = vpop.f32.mrb[1].mxu0  ;;  %v120_v35 = vadd.f32 %v3297_v25, %v119_v51  ;;  %v3599_v51 = vld [vmem:[%s5339_s8 + $0x48] sm:$0xf] }
 0x42d   :  { %1574 = vperm.xlu1 %3462, %v1485_v2   ;;  %v122_v24 = vpop.f32.mrb[2].mxu0 }
 0x42e   :  { %v3380_v12 = vpop.f32.mrb[3].mxu0  ;;  %3578 = vtanh.f32 %v120_v35  ;;  %v3601_v24 = vld [vmem:[%s5339_s8 + $0x40] sm:$0xf] }
 0x431   :  { %1566 = vperm.xlu1 %3462, %v1483_v0  }
 0x435   :  { %1578 = vperm.xlu1 %3462, %v1486_v55  }
 0x438   :  { %v3579_v33 = vpop.eup %3578 }
 0x439   :  { %1558 = vperm.xlu1 %3462, %v1481_v53   ;;  %v2128_v54 = vpack.c.bf16 %v3579_v33, %v3579_v33 }
 0x43b   :  { %3406 = vmatmul.mubr.msk.bf16.vlgmr.msra.gmra.mrb[4].mxu1 %vm2251_vm6, %v2128_v54  ;;  %v3603_v54 = vld [vmem:[%s5339_s8 + $0x2c] sm:$0xf] }
 0x43c   :  { %3410 = vmatpush3.bf16.msra.mxu1 %v3471_v28  ;;  %3413 = vmatprep.mubr.msk.bf16.mxu1 %vm3635_vm0, %v5387_v1  ;;  %v3602_v28 = vld [vmem:[%s5339_s8 + $0x28] sm:$0xf] }
 0x43d   :  { %1582 = vperm.xlu1 %3462, %v1487_v27   ;;  %3411 = vmatprep.subr.bf16.mxu1 %v5387_v1 }
 0x440   :  { %3412 = vmatpush3.bf16.msra.mxu1 %v3473_v43 }
 0x441   :  { %2369 = vrot.lane.b32.xlu1 %v2367_v8, %s3638_s24  ;;  %3425 = vmatprep.subr.bf16.mxu1 %v5387_v1 }
 0x443   :  { %3414 = vmatmul.mubr.msk.bf16.vlgmr.msra.gmra.mrb[8].mxu1 %vm182_vm1, %v5423_v36 }
 0x444   :  { %3429 = vmatprep.mubr.msk.bf16.mxu1 %vm3635_vm0, %v5387_v1 }
 0x478   :  { %v1491_v42 = vpop.permute.xlu1 %1490 }
 0x479   :  { %v1614_v22 = vrot.slane %v1491_v42, %v4745_v6  ;;  %v1621_v11 = vrot.slane %v1491_v42, %v4748_v63 }
 0x47a   :  { %v1531_v48 = vpop.permute.xlu0 %1530 }
 0x47b   :  { %v1733_v13 = vrot.slane %v1531_v48, %v4745_v6  ;;  %v1928_v39 = vmul.bf16 %v3594_v58, %v1614_v22  ;;  %v1929_v56 = vmul.bf16 %v3595_v9, %v1621_v11  ;;  %v1740_v61 = vrot.slane %v1531_v48, %v4748_v63  ;;  %v3606_v11 = vld [vmem:[%s5339_s8 + $0x70] sm:$0xf] }
 0x47c   :  { %v1503_v15 = vpop.permute.xlu1 %1502 }
 0x47d   :  { %v1649_v46 = vrot.slane %v1503_v15, %v4745_v6  ;;  %v1656_v2 = vrot.slane %v1503_v15, %v4748_v63  ;;  %v1945_v60 = vmul.bf16 %v3596_v59, %v1733_v13  ;;  %v1968_v0 = vunpack.c.l.bf16 %v1928_v39  ;;  %v3604_v15 = vld [vmem:[%s5339_s8 + $0x30] sm:$0xf] }
 0x47e   :  { %v1555_v30 = vpop.permute.xlu0 %1554  ;;  %v1969_v62 = vunpack.c.l.bf16 %v1929_v56  ;;  %v1946_v47 = vmul.bf16 %v3599_v51, %v1740_v61 }
 0x47f   :  { %v1933_v38 = vmul.bf16 %v3597_v17, %v1649_v46  ;;  %v1934_v55 = vmul.bf16 %v3598_v18, %v1656_v2  ;;  %v1985_v25 = vunpack.c.l.bf16 %v1945_v60  ;;  %v2008_v20 = vsel %vm468_vm3, %v1968_v0, 0.0 }
 0x480   :  { %v1515_v37 = vpop.permute.xlu1 %1514  ;;  %v2009_v12 = vsel %vm468_vm3, %v1969_v62, 0.0  ;;  %v1803_v23 = vrot.slane %v1555_v30, %v4745_v6  ;;  %v1810_v8 = vrot.slane %v1555_v30, %v4748_v63  ;;  %v1986_v40 = vunpack.c.l.bf16 %v1946_v47  ;;  %v3607_v62 = vld [vmem:[%s5339_s8 + $0x38] sm:$0x3] }
 0x481   :  { %v1684_v53 = vrot.slane %v1515_v37, %v4745_v6  ;;  %v1691_v14 = vrot.slane %v1515_v37, %v4748_v63  ;;  %v1973_v10 = vunpack.c.l.bf16 %v1933_v38  ;;  %v1974_v33 = vunpack.c.l.bf16 %v1934_v55  ;;  %v3605_v37 = vld [vmem:[%s5339_s8 + $0x6c] sm:$0xf] }
 0x482   :  { %v1523_v31 = vpop.permute.xlu0 %1522  ;;  %v2056_v42 = vsel %vm468_vm3, %v1985_v25, 0.0  ;;  %v4800_v49 = vadd.f32 %v2009_v12, %v2008_v20  ;;  %v1955_v22 = vmul.bf16 %v3605_v37, %v1803_v23  ;;  %v4812_v30 = vmul.bf16 %v3606_v11, %v1810_v8  ;;  %v3609_v20 = vld [vmem:[%s5339_s8 + $0x34] sm:$0xf] }
 0x483   :  { %v1938_v3 = vmul.bf16 %v3602_v28, %v1684_v53  ;;  %v1939_v43 = vmul.bf16 %v3603_v54, %v1691_v14  ;;  %v1712_v41 = vrot.slane %v1523_v31, %v4745_v6  ;;  %v2023_v13 = vsel %vm468_vm3, %v1973_v10, 0.0  ;;  %v3608_v53 = vld [vmem:[%s5339_s8 + $0x8] sm:$0xf]  ;;  %v3611_v23 = vld [vmem:[%s5339_s8 + $0x54] sm:$0xf] }
 0x484   :  { %v4752_v21 = vpop.permute.xlu1 %1494  ;;  %v2024_v9 = vsel %vm468_vm3, %v1974_v33, 0.0  ;;  %v2058_v31 = vsel %vm468_vm3, %v1986_v40, 0.0  ;;  %v3613_v28 = vld [vmem:[%s5339_s8 + $0xc] sm:$0xf] }
 0x485   :  { %v1628_v58 = vrot.slane %v4752_v21, %v4745_v6  ;;  %v1978_v56 = vunpack.c.l.bf16 %v1938_v3  ;;  %v1979_v46 = vunpack.c.l.bf16 %v1939_v43  ;;  %v1942_v17 = vmul.bf16 %v3607_v62, %v1712_v41 }
 0x486   :  { %v1535_v26 = vpop.permute.xlu0 %1534  ;;  %v1635_v18 = vrot.slane %v4752_v21, %v4748_v63 }
 0x487   :  { %v1747_v38 = vrot.slane %v1535_v26, %v4745_v6  ;;  %v1930_v14 = vmul.bf16 %v3608_v53, %v1628_v58  ;;  %v2038_v47 = vsel %vm468_vm3, %v1978_v56, 0.0  ;;  %v2039_v25 = vsel %vm468_vm3, %v1979_v46, 0.0  ;;  %v3614_v26 = vld [vmem:[%s5339_s8 + $0x1c] sm:$0xf]  ;;  %v3615_v46 = vld [vmem:[%s5339_s8 + $0x58] sm:$0xf] }
 0x488   :  { %v4763_v57 = vpop.permute.xlu1 %1506  ;;  %v1982_v10 = vunpack.c.l.bf16 %v1942_v17  ;;  %v1931_v3 = vmul.bf16 %v3613_v28, %v1635_v18  ;;  %v2040_v43 = vadd.f32 %v2039_v25, %v2038_v47 }
 0x489   :  { %v1670_v40 = vrot.slane %v4763_v57, %v4748_v63 }
 0x48c   :  { %v1527_v34 = vpop.permute.xlu1 %1526 }
 0x48d   :  { %v1719_v32 = vrot.slane %v1527_v34, %v4745_v6  ;;  %v1726_v27 = vrot.slane %v1527_v34, %v4748_v63  ;;  %v1995_v34 = vunpack.c.l.bf16 %v1955_v22 }
 0x48f   :  { %v1943_v35 = vmul.bf16 %v3600_v52, %v1719_v32  ;;  %v1944_v44 = vmul.bf16 %v3601_v24, %v1726_v27  ;;  %v1547_v32 = vpop.permute.xlu0 %1546  ;;  %v1663_v27 = vrot.slane %v4763_v57, %v4745_v6  ;;  %v4843_v24 = vadd.f32 %v2024_v9, %v2023_v13 }
 0x490   :  { %v1519_v5 = vpop.permute.xlu1 %1518  ;;  %v4864_v41 = vsel %vm468_vm3, %v1995_v34, 0.0  ;;  %v1971_v9 = vunpack.c.l.bf16 %v1931_v3  ;;  %v1782_v56 = vrot.slane %v1547_v32, %v4745_v6  ;;  %v3617_v32 = vld [vmem:[%s5339_s8 + $0x5c] sm:$0xf] }
 0x491   :  { %v1698_v36 = vrot.slane %v1519_v5, %v4745_v6  ;;  %v1983_v4 = vunpack.c.l.bf16 %v1943_v35  ;;  %v1984_v29 = vunpack.c.l.bf16 %v1944_v44  ;;  %v1705_v2 = vrot.slane %v1519_v5, %v4748_v63  ;;  %v3610_v44 = vld [vmem:[%s5339_s8 + $0x50] sm:$0xf]  ;;  %v3612_v5 = vld [vmem:[%s5339_s8 + $0x4c] sm:$0x3] }
 0x492   :  { %v1996_v35 = vunpack.c.l.bf16 %v4812_v30  ;;  %v1947_v33 = vmul.bf16 %v3612_v5, %v1747_v38 }
 0x493   :  { %v1940_v48 = vmul.bf16 %v3604_v15, %v1698_v36  ;;  %v2053_v61 = vsel %vm468_vm3, %v1983_v4, 0.0  ;;  %v2054_v59 = vsel %vm468_vm3, %v1984_v29, 0.0  ;;  %v1941_v52 = vmul.bf16 %v3609_v20, %v1705_v2  ;;  %v1571_v22 = vpop.permute.xlu0 %1570 }
 0x494   :  { %v1539_v39 = vpop.permute.xlu1 %1538  ;;  %v2055_v21 = vadd.f32 %v2054_v59, %v2053_v61  ;;  %v1970_v36 = vunpack.c.l.bf16 %v1930_v14  ;;  %v1935_v4 = vmul.bf16 %v3614_v26, %v1663_v27  ;;  %v1987_v57 = vunpack.c.l.bf16 %v1947_v33  ;;  %v3616_v59 = vld [vmem:[%s5339_s8 + $0x20] sm:$0xf] }
 0x495   :  { %v1754_v60 = vrot.slane %v1539_v39, %v4745_v6  ;;  %v1761_v0 = vrot.slane %v1539_v39, %v4748_v63  ;;  %v1980_v55 = vunpack.c.l.bf16 %v1940_v48  ;;  %v1981_v48 = vunpack.c.l.bf16 %v1941_v52 }
 0x496   :  { %v2057_v15 = vadd.f32 %v2056_v42, %v2055_v21  ;;  %v2045_v42 = vsel %vm481_vm2, %v1982_v10, 0.0  ;;  %v2011_v61 = vsel %vm468_vm3, %v1970_v36, 0.0  ;;  %v1852_v17 = vrot.slane %v1571_v22, %v4745_v6  ;;  %v3621_v22 = vld [vmem:[%s5339_s8 + $0x64] sm:$0xf] }
 0x497   :  { %v1948_v12 = vmul.bf16 %v3610_v44, %v1754_v60  ;;  %v1949_v8 = vmul.bf16 %v3611_v23, %v1761_v0  ;;  %v2041_v54 = vsel %vm468_vm3, %v1980_v55, 0.0  ;;  %v1936_v60 = vmul.bf16 %v3616_v59, %v1670_v40 }
 0x498   :  { %v4835_v51 = vpop.permute.xlu1 %1550  ;;  %v2042_v11 = vadd.f32 %v2041_v54, %v2040_v43  ;;  %v1975_v0 = vunpack.c.l.bf16 %v1935_v4  ;;  %v2059_v38 = vadd.f32 %v2058_v31, %v2057_v15  ;;  %v2043_v18 = vsel %vm468_vm3, %v1981_v48, 0.0  ;;  %v3618_v31 = vld [vmem:[%s5339_s8 + $0x60] sm:$0x3] }
 0x499   :  { %v1988_v13 = vunpack.c.l.bf16 %v1948_v12  ;;  %v1989_v58 = vunpack.c.l.bf16 %v1949_v8  ;;  %v2060_v47 = vsel %vm481_vm2, %v1987_v57, 0.0  ;;  %v2012_v25 = vadd.f32 %v2011_v61, %v4800_v49  ;;  %v3619_v49 = vld [vmem:[%s5339_s8 + $0x88] sm:$0x3] }
 0x49a   :  { %v2044_v34 = vadd.f32 %v2043_v18, %v2042_v11  ;;  %v2013_v21 = vsel %vm468_vm3, %v1971_v9, 0.0  ;;  %v1952_v20 = vmul.bf16 %v3618_v31, %v1782_v56  ;;  %v1976_v52 = vunpack.c.l.bf16 %v1936_v60  ;;  %v3624_v60 = vld [vmem:[%s5339_s8 + $0x7c] sm:$0xf] }
 0x49b   :  { %v2068_v53 = vsel %vm468_vm3, %v1988_v13, 0.0  ;;  %v2069_v14 = vsel %vm468_vm3, %v1989_v58, 0.0  ;;  %v2026_v44 = vsel %vm468_vm3, %v1975_v0, 0.0  ;;  %v1789_v12 = vrot.slane %v4835_v51, %v4745_v6 }
 0x49c   :  { %v1543_v29 = vpop.permute.xlu1 %1542  ;;  %v1962_v10 = vmul.bf16 %v3619_v49, %v1852_v17  ;;  %v2070_v5 = vadd.f32 %v2069_v14, %v2068_v53  ;;  %v1796_v33 = vrot.slane %v4835_v51, %v4748_v63  ;;  %v2061_v3 = vadd.f32 %v2060_v47, %v2059_v38  ;;  %v3625_v17 = vld [vmem:[%s5339_s8 + $0x24] sm:$0x3] }
 0x49d   :  { %v1768_v37 = vrot.slane %v1543_v29, %v4745_v6  ;;  %v1775_v39 = vrot.slane %v1543_v29, %v4748_v63  ;;  %v2046_v54 = vadd.f32 %v2045_v42, %v2044_v34  ;;  %v2014_v40 = vadd.f32 %v2013_v21, %v2012_v25  ;;  %v3620_v29 = vld [vmem:[%s5339_s8 + $0x10] sm:$0x3]  ;;  %v3623_v42 = vld [vmem:[%s5339_s8 + $0x78] sm:$0xf] }
 0x49e   :  { %v1992_v48 = vunpack.c.l.bf16 %v1952_v20  ;;  %v2028_v51 = vsel %vm468_vm3, %v1976_v52, 0.0  ;;  %v1953_v11 = vmul.bf16 %v3621_v22, %v1789_v12  ;;  %v2002_v58 = vunpack.c.l.bf16 %v1962_v10  ;;  %v3628_v22 = vld [vmem:[%s5339_s8 + $0x80] sm:$0xf] }
 0x49f   :  { %v1950_v2 = vmul.bf16 %v3615_v46, %v1768_v37  ;;  %v1951_v27 = vmul.bf16 %v3617_v32, %v1775_v39  ;;  %v2027_v37 = vadd.f32 %v2026_v44, %v4843_v24  ;;  %v3622_v39 = vld [vmem:[%s5339_s8 + $0x68] sm:$0xf]  ;;  %v2062_v46 = vrot.slane %v2061_v3, 4 }
 0x4a0   :  { %v1563_v62 = vpop.permute.xlu1 %1562  ;;  %v1954_v57 = vmul.bf16 %v3622_v39, %v1796_v33  ;;  %v2075_v18 = vsel %vm481_vm2, %v1992_v48, 0.0  ;;  %v1993_v34 = vunpack.c.l.bf16 %v1953_v11  ;;  %v4929_v21 = vsel %vm481_vm2, %v2002_v58, 0.0 }
 0x4a1   :  { %v1990_v55 = vunpack.c.l.bf16 %v1950_v2  ;;  %v1991_v43 = vunpack.c.l.bf16 %v1951_v27  ;;  %v1824_v36 = vrot.slane %v1563_v62, %v4745_v6  ;;  %v1831_v4 = vrot.slane %v1563_v62, %v4748_v63 }
 0x4a2   :  { %v2047_v2 = vrot.slane %v2046_v54, 4  ;;  %v1994_v32 = vunpack.c.l.bf16 %v1954_v57  ;;  %v2063_v44 = vadd.f32 %v2062_v46, %v2061_v3 }
 0x4a3   :  { %v2071_v23 = vsel %vm468_vm3, %v1990_v55, 0.0  ;;  %v2073_v24 = vsel %vm468_vm3, %v1991_v43, 0.0  ;;  %v1958_v61 = vmul.bf16 %v3623_v42, %v1824_v36  ;;  %v1959_v0 = vmul.bf16 %v3624_v60, %v1831_v4 }
 0x4a4   :  { %v1499_v8 = vpop.permute.xlu1 %1498  ;;  %v2072_v26 = vadd.f32 %v2071_v23, %v2070_v5  ;;  %v2029_v55 = vadd.f32 %v2028_v51, %v2027_v37  ;;  %v2048_v31 = vadd.f32 %v2047_v2, %v2046_v54  ;;  %v3626_v5 = vld [vmem:[%s5339_s8 + $0x8c] sm:$0xf]  ;;  %v2083_v36 = vsel %vm468_vm3, %v1993_v34, 0.0 }
 0x4a5   :  { %v1642_v28 = vrot.slane %v1499_v8, %v4745_v6  ;;  %v1998_v20 = vunpack.c.l.bf16 %v1958_v61  ;;  %v1999_v23 = vunpack.c.l.bf16 %v1959_v0  ;;  %v2084_v3 = vsel %vm468_vm3, %v1994_v32, 0.0 }
 0x4a6   :  { %v2074_v59 = vadd.f32 %v2073_v24, %v2072_v26  ;;  %v2049_v4 = vrot.slane %v2048_v31, 2  ;;  %v2064_v39 = vrot.slane %v2063_v44, 2 }
 0x4a7   :  { %v1932_v15 = vmul.bf16 %v3620_v29, %v1642_v28  ;;  %v3627_v28 = vld [vmem:[%s5339_s8 + $0x90] sm:$0xf]  ;;  %v2098_v29 = vsel %vm468_vm3, %v1998_v20, 0.0  ;;  %v2099_v51 = vsel %vm468_vm3, %v1999_v23, 0.0 }
 0x4a8   :  { %v1511_v13 = vpop.permute.xlu1 %1510  ;;  %v2076_v12 = vadd.f32 %v2075_v18, %v2074_v59  ;;  %v2085_v59 = vadd.f32 %v2084_v3, %v2083_v36  ;;  %v2100_v60 = vadd.f32 %v2099_v51, %v2098_v29 }
 0x4a9   :  { %v1972_v9 = vunpack.c.l.bf16 %v1932_v15  ;;  %v1677_v56 = vrot.slane %v1511_v13, %v4745_v6  ;;  %v3629_v13 = vld [vmem:[%s5339_s8 + $0x84] sm:$0xf] }
 0x4aa   :  { %v2077_v37 = vrot.slane %v2076_v12, 4 }
 0x4ab   :  { %v2015_v62 = vsel %vm481_vm2, %v1972_v9, 0.0  ;;  %v1937_v38 = vmul.bf16 %v3625_v17, %v1677_v56  ;;  %v2050_v17 = vadd.f32 %v2049_v4, %v2048_v31 }
 0x4ac   :  { %v2016_v53 = vadd.f32 %v2015_v62, %v2014_v40  ;;  %v1575_v14 = vpop.permute.xlu1 %1574 }
 0x4ad   :  { %v1977_v27 = vunpack.c.l.bf16 %v1937_v38  ;;  %v1859_v47 = vrot.slane %v1575_v14, %v4745_v6  ;;  %v1866_v25 = vrot.slane %v1575_v14, %v4748_v63  ;;  %v2078_v38 = vadd.f32 %v2077_v37, %v2076_v12 }
 0x4ae   :  { %v2017_v52 = vrot.slane %v2016_v53, 4  ;;  %v2087_v12 = vadd.f32 %v4864_v41, %v2085_v59 }
 0x4af   :  { %v2030_v8 = vsel %vm481_vm2, %v1977_v27, 0.0  ;;  %v1963_v33 = vmul.bf16 %v3626_v5, %v1859_v47  ;;  %v1964_v43 = vmul.bf16 %v3627_v28, %v1866_v25  ;;  %v3631_v25 = vld [vmem:[%s5339_s8 + $0x98] sm:$0xf]  ;;  %v2079_v5 = vrot.slane %v2078_v38, 2  ;;  %v3632_v28 = vld [vmem:[%s5339_s8 + $0x74] sm:$0x3] }
 0x4b0   :  { %v2018_v49 = vadd.f32 %v2017_v52, %v2016_v53  ;;  %v2031_v10 = vadd.f32 %v2030_v8, %v2029_v55  ;;  %v1567_v54 = vpop.permute.xlu1 %1566  ;;  %v3630_v55 = vld [vmem:[%s5339_s8 + $0x94] sm:$0xf] }
 0x4b1   :  { %v1838_v40 = vrot.slane %v1567_v54, %v4745_v6  ;;  %v1845_v26 = vrot.slane %v1567_v54, %v4748_v63  ;;  %v2003_v9 = vunpack.c.l.bf16 %v1963_v33  ;;  %v2004_v56 = vunpack.c.l.bf16 %v1964_v43 }
 0x4b2   :  { %v2019_v15 = vrot.slane %v2018_v49, 2  ;;  %v2032_v48 = vrot.slane %v2031_v10, 4  ;;  %v2088_v54 = vsel %vm468_vm3, %v1996_v35, 0.0  ;;  %v3633_v35 = vld [vmem:[%s5339_s8 + $0x9c] sm:$0x3] }
 0x4b3   :  { %v1960_v11 = vmul.bf16 %v3628_v22, %v1838_v40  ;;  %v1961_v58 = vmul.bf16 %v3629_v13, %v1845_v26  ;;  %v2113_v14 = vsel %vm468_vm3, %v2003_v9, 0.0  ;;  %v2114_v32 = vsel %vm468_vm3, %v2004_v56, 0.0 }
 0x4b4   :  { %v2033_v57 = vadd.f32 %v2032_v48, %v2031_v10  ;;  %v1579_v46 = vpop.permute.xlu1 %1578  ;;  %v2020_v0 = vadd.f32 %v2019_v15, %v2018_v49  ;;  %v2065_v10 = vadd.f32 %v2064_v39, %v2063_v44  ;;  %v2115_v3 = vadd.f32 %v2114_v32, %v2113_v14 }
 0x4b5   :  { %v2000_v2 = vunpack.c.l.bf16 %v1960_v11  ;;  %v2001_v24 = vunpack.c.l.bf16 %v1961_v58  ;;  %v1873_v42 = vrot.slane %v1579_v46, %v4745_v6  ;;  %v1880_v61 = vrot.slane %v1579_v46, %v4748_v63 }
 0x4b6   :  { %v2034_v62 = vrot.slane %v2033_v57, 2  ;;  %v2021_v23 = vrot.slane %v2020_v0, 1  ;;  %v2051_v26 = vrot.slane %v2050_v17, 1  ;;  %v2089_v51 = vadd.f32 %v2088_v54, %v2087_v12 }
 0x4b7   :  { %v2101_v18 = vsel %vm468_vm3, %v2000_v2, 0.0  ;;  %v1965_v34 = vmul.bf16 %v3630_v55, %v1873_v42  ;;  %v2103_v47 = vsel %vm468_vm3, %v2001_v24, 0.0  ;;  %v1966_v31 = vmul.bf16 %v3631_v25, %v1880_v61 }
 0x4b8   :  { %v2035_v53 = vadd.f32 %v2034_v62, %v2033_v57  ;;  %v2102_v27 = vadd.f32 %v2101_v18, %v2100_v60  ;;  %v1559_v63 = vpop.permute.xlu1 %1558  ;;  %v2022_v15 = vadd.f32 %v2021_v23, %v2020_v0  ;;  %v2066_v22 = vrot.slane %v2065_v10, 1 }
 0x4b9   :  { %v2005_v20 = vunpack.c.l.bf16 %v1965_v34  ;;  %v1817_v52 = vrot.slane %v1559_v63, %v4745_v6  ;;  %v2006_v4 = vunpack.c.l.bf16 %v1966_v31  ;;  %v2080_v11 = vadd.f32 %v2079_v5, %v2078_v38 }
 0x4ba   :  { %v2036_v8 = vrot.slane %v2035_v53, 1  ;;  %v2104_v49 = vadd.f32 %v2103_v47, %v2102_v27  ;;  %v2052_v57 = vadd.f32 %v2051_v26, %v2050_v17  ;;  %v2131_v56 = vpack.c.bf16 %v2022_v15, %v2022_v15 }
 0x4bb   :  { %v2116_v33 = vsel %vm468_vm3, %v2005_v20, 0.0  ;;  %v1957_v43 = vmul.bf16 %v3632_v28, %v1817_v52  ;;  %v2118_v9 = vsel %vm468_vm3, %v2006_v4, 0.0  ;;  %v2067_v42 = vadd.f32 %v2066_v22, %v2065_v10 }
 0x4bc   :  { %v2037_v36 = vadd.f32 %v2036_v8, %v2035_v53  ;;  %v2106_v41 = vadd.f32 %v4929_v21, %v2104_v49  ;;  %v1583_v40 = vpop.permute.xlu1 %1582  ;;  %v2117_v37 = vadd.f32 %v2116_v33, %v2115_v3  ;;  %v2081_v61 = vrot.slane %v2080_v11, 1 }
 0x4bd   :  { %v1997_v44 = vunpack.c.l.bf16 %v1957_v43  ;;  %v1887_v29 = vrot.slane %v1583_v40, %v4745_v6  ;;  %v2133_v18 = vpack.c.bf16 %v2052_v57, %v2052_v57  ;;  %v2156_v55 = vunpack.c.l.b16 %v2131_v56 }
 0x4be   :  { %v2107_v48 = vrot.slane %v2106_v41, 4  ;;  %v2132_v21 = vpack.c.bf16 %v2037_v36, %v2037_v36  ;;  %v2119_v2 = vadd.f32 %v2118_v9, %v2117_v37  ;;  %v2082_v17 = vadd.f32 %v2081_v61, %v2080_v11  ;;  %v3325_v9 = vld [vmem:[%s5264_s13] ss:$0 sm:$0xff] }
 0x4bf   :  { %v2090_v30 = vsel %vm481_vm2, %v1997_v44, 0.0  ;;  %v1967_v13 = vmul.bf16 %v3633_v35, %v1887_v29  ;;  %v2134_v32 = vpack.c.bf16 %v2067_v42, %v2067_v42  ;;  %v2158_v25 = vunpack.c.l.b16 %v2133_v18 }
 0x4c0   :  { %v2108_v58 = vadd.f32 %v2107_v48, %v2106_v41  ;;  %v2091_v39 = vadd.f32 %v2090_v30, %v2089_v51  ;;  %v2157_v60 = vunpack.c.l.b16 %v2132_v21  ;;  %v2135_v52 = vpack.c.bf16 %v2082_v17, %v2082_v17  ;;  %v3475_v17 = vld [vmem:[%s5266_s16] sm:$0xff]  }
 0x4c1   :  { %v2007_v6 = vunpack.c.l.bf16 %v1967_v13  ;;  %v2159_v8 = vunpack.c.l.b16 %v2134_v32  ;;  %3426 = vmatpush3.bf16.msra.mxu1 %v3475_v17  ;;  %v3477_v32 = vld [vmem:[%s5266_s16 + $0x8] sm:$0xff]  }
 0x4c2   :  { %v2109_v46 = vrot.slane %v2108_v58, 2  ;;  %v2092_v24 = vrot.slane %v2091_v39, 4  ;;  %v2164_v27 = vsel %vm832_vm8, %v2157_v60, %v2156_v55  ;;  %v2160_v43 = vunpack.c.l.b16 %v2135_v52  ;;  %3427 = vmatprep.subr.bf16.mxu1 %v5387_v1 }
 0x4c3   :  { %v2120_v59 = vsel %vm481_vm2, %v2007_v6, 0.0  ;;  %v2165_v12 = vsel %vm834_vm9, %v2158_v25, %v2164_v27  ;;  %vm2681_vm2 = vcmask 64512  }
 0x4c4   :  { %v2110_v0 = vadd.f32 %v2109_v46, %v2108_v58  ;;  %v2093_v62 = vadd.f32 %v2092_v24, %v2091_v39  ;;  %v2121_v38 = vadd.f32 %v2120_v59, %v2119_v2  ;;  %v2166_v28 = vsel %vm836_vm10, %v2159_v8, %v2165_v12  ;;  %v5424_v8 = vld [vmem:[#allocation3_spill] sm:$0xff] }
 0x4c5   :  { %v2167_v41 = vsel %vm838_vm11, %v2160_v43, %v2166_v28  ;;  %3428 = vmatpush3.bf16.msra.mxu1 %v3477_v32 }
 0x4c6   :  { %v2094_v34 = vrot.slane %v2093_v62, 2  ;;  %v2122_v53 = vrot.slane %v2121_v38, 4  ;;  %v2111_v14 = vrot.slane %v2110_v0, 1  ;;  %3433 = vmatprep.subr.bf16.mxu1 %v5387_v1 }
 0x4c8   :  { %v2095_v63 = vadd.f32 %v2094_v34, %v2093_v62  ;;  %v2123_v47 = vadd.f32 %v2122_v53, %v2121_v38  ;;  %v2112_v23 = vadd.f32 %v2111_v14, %v2110_v0  ;;  %v2370_v38 = vpop.permute.xlu1 %2369  ;;  %v3474_v53 = vld [vmem:[%s5265_s14] sm:$0xff]   ;;  %v3476_v14 = vld [vmem:[%s5265_s14 + $0x8] sm:$0xff]  }
 0x4ca   :  { %v2096_v31 = vrot.slane %v2095_v63, 1  ;;  %v2124_v20 = vrot.slane %v2123_v47, 2  ;;  %v2137_v54 = vpack.c.bf16 %v2112_v23, %v2112_v23 }
 0x4cc   :  { %v2097_v49 = vadd.f32 %v2096_v31, %v2095_v63  ;;  %v2125_v10 = vadd.f32 %v2124_v20, %v2123_v47  ;;  %v2162_v4 = vunpack.c.l.b16 %v2137_v54 }
 0x4ce   :  { %v2136_v5 = vpack.c.bf16 %v2097_v49, %v2097_v49  ;;  %v2126_v33 = vrot.slane %v2125_v10, 1 }
 0x4d0   :  { %v2161_v36 = vunpack.c.l.b16 %v2136_v5  ;;  %v2127_v3 = vadd.f32 %v2126_v33, %v2125_v10 }
 0x4d2   :  { %v2138_v40 = vpack.c.bf16 %v2127_v3, %v2127_v3  ;;  %v2168_v26 = vsel %vm840_vm12, %v2161_v36, %v2167_v41 }
 0x4d3   :  { %v2169_v29 = vsel %vm842_vm13, %v2162_v4, %v2168_v26 }
 0x4d4   :  { %v2163_v44 = vunpack.c.l.b16 %v2138_v40 }
 0x4d6   :  { %v2170_v15 = vsel %vm844_vm14, %v2163_v44, %v2169_v29 }
 0x4d7   :  { %v2171_v48 = vpack.c.b16 %v2170_v15, %v2170_v15 }
 0x4d9   :  { %3400 = vmatmul.mubr.msk.bf16.vlgmr.msra.gmra.mrb[4].mxu0 %vm468_vm3, %v2171_v48 }
 0x4da   :  { %3421 = vmatprep.mubr.msk.bf16.mxu0 %vm3635_vm0, %v5387_v1  ;;  %3418 = vmatpush3.bf16.msra.mxu0 %v3474_v53 }
 0x4db   :  { %3419 = vmatprep.subr.bf16.mxu0 %v5387_v1 }
 0x4de   :  { %3420 = vmatpush3.bf16.msra.mxu0 %v3476_v14 }
 0x4df   :  { %3441 = vmatprep.subr.bf16.mxu0 %v5387_v1 }
 0x50e   :  { %v2289_v37 = vpop.f32.mrb[4].mxu1 }
 0x50f   :  { %v3407_v51 = vpop.f32.mrb[5].mxu1 }
 0x510   :  { %v2292_v22 = vpop.f32.mrb[6].mxu1 }
 0x511   :  { %v3408_v11 = vpop.f32.mrb[7].mxu1  ;;  %v5030_v22 = vld [vmem:[%s5267_s5] sm:$0xf] }
 0x516   :  { %v2345_v30 = vpop.f32.mrb[8].mxu1 }
 0x517   :  { %v3415_v35 = vpop.f32.mrb[9].mxu1 }
 0x518   :  { %v2348_v13 = vpop.f32.mrb[10].mxu1 }
 0x519   :  { %v3416_v21 = vpop.f32.mrb[11].mxu1 }
 0x5ac   :  { %v2239_v58 = vpop.f32.mrb[4].mxu0 }
 0x5ad   :  { %v2290_v39 = vadd.f32 %v2289_v37, %v2239_v58  ;;  %v3401_v57 = vpop.f32.mrb[5].mxu0 }
 0x5ae   :  { %v2242_v6 = vpop.f32.mrb[6].mxu0 }
 0x5af   :  { %v2351_v56 = vadd.f32 %v2345_v30, %v2290_v39  ;;  %v3402_v46 = vpop.f32.mrb[7].mxu0 }
 0x5b1   :  { %v2359_v2 = vadd.f32 %v3325_v9, %v2351_v56 }
 0x5b3   :  { %3580 = vtanh.f32 %v2359_v2  ;;  %v3326_v42 = vmul.f32 -1.442695, %v2359_v2 }
 0x5b5   :  { %3582 = vpow2.f32 %v3326_v42 }
 0x5bd   :  { %v3581_v24 = vpop.eup %3580 }
 0x5be   :  { %2374 = vrot.lane.b32.xlu0 %v3581_v24, %s3641_s1  ;;  %v5043_v24 = vld [vmem:[%s5267_s5 + $0x4] sm:$0xf] }
 0x5bf   :  { %v3583_v61 = vpop.eup %3582 }
 0x5c0   :  { %v2363_v59 = vadd.f32 1.0, %v3583_v61  ;;  %v5048_v61 = vld [vmem:[%s5267_s5 + $0x8] sm:$0xf] }
 0x5c2   :  { %3584 = vrcp.f32 %v2363_v59 }
 0x5cc   :  { %v3585_v60 = vpop.eup %3584 }
 0x5cd   :  { %v2372_v18 = vmul.f32 %v3585_v60, %v2370_v38 }
 0x630   :  { %v2375_v0 = vpop.permute.xlu0 %2374 }
 0x631   :  { %v2377_v62 = vmul.f32 %v3585_v60, %v2375_v0 }
 0x633   :  { %2379 = vrot.lane.b32.xlu0 %v2377_v62, %s3638_s24  ;;  %v5055_v62 = vld [vmem:[%s5267_s5 + $0xc] sm:$0xf] }
 0x6a5   :  { %v2380_v55 = vpop.permute.xlu0 %2379 }
 0x6a6   :  { %v4993_v34 = vadd.f32 %v2380_v55, %v2372_v18  ;;  %v5061_v18 = vld [vmem:[%s5267_s5 + $0x14] sm:$0xf] }
 0x6a8   :  { %3586 = vtanh.f32 %v4993_v34 }
 0x6b2   :  { %v3587_v27 = vpop.eup %3586 }
 0x6b3   :  { %2385 = vrot.lane.b32.xlu1 %v3587_v27, %s3641_s1 }
 0x725   :  { %v2386_v63 = vpop.permute.xlu1 %2385 }
 0x726   :  { %v5012_v47 = vmul.f32 %v3585_v60, %v2386_v63 }
 0x728   :  { %v2389_v25 = vpack.c.bf16 %v5012_v47, %v5012_v47 }
 0x72a   :  { %2403 = vrot.lane.b32.xlu0 %v2389_v25, %s3638_s24 }
 0x79c   :  { %v2404_v31 = vpop.permute.xlu0 %2403 }
 0x79d   :  { %3422 = vmatmul.mubr.msk.bf16.vlgmr.msra.gmra.mrb[8].mxu0 %vm182_vm1, %v2404_v31  ;;  %3430 = vmatmul.mubr.msk.bf16.vlgmr.msra.gmra.mrb[12].mxu1 %vm182_vm1, %v2404_v31 }
 0x79e   :  { %3437 = vmatprep.mubr.msk.bf16.mxu1 %vm3635_vm0, %v5387_v1  ;;  %3445 = vmatprep.mubr.msk.bf16.mxu0 %vm3635_vm0, %v5387_v1 }
 0x870   :  { %v2454_v20 = vpop.f32.mrb[8].mxu0 }
 0x871   :  { %v2460_v52 = vpack.c.bf16 %v2454_v20, %v2454_v20  ;;  %v3423_v12 = vpop.f32.mrb[9].mxu0 }
 0x872   :  { %v2457_v23 = vpop.f32.mrb[10].mxu0  ;;  %v5074_v12 = vld [vmem:[%s5267_s5 + $0x10] sm:$0xf] }
 0x873   :  { %v2468_v49 = vrot.slane %v2460_v52, %v5424_v8  ;;  %v3424_v10 = vpop.f32.mrb[11].mxu0 }
 0x874   :  { %v5080_v10 = vld [vmem:[%s5267_s5 + $0x1c] sm:$0xf] }
 0x875   :  { %v2469_v5 = vcombine.high %v2468_v49, %v2468_v49  ;;  %v2476_v33 = vrot.slane %v2468_v49, %v5424_v8 }
 0x877   :  { %v2483_v28 = vrot.slane %v2469_v5, %v5424_v8  ;;  %v2484_v43 = vcombine.high %v2476_v33, %v2476_v33  ;;  %v2487_v54 = vunpack.i.h.s16 %v2476_v33  ;;  %v3330_v36 = vpack.i.b16 %v2476_v33, %v2476_v33 }
 0x879   :  { %v2485_v3 = vcombine.high %v2483_v28, %v2483_v28  ;;  %v2489_v41 = vunpack.i.h.s16 %v2483_v28  ;;  %v2491_v40 = vunpack.i.h.s16 %v2484_v43  ;;  %v2505_v26 = vrot.slane %v3330_v36, %v3790_v19 }
 0x87a   :  { %v2495_v4 = vpack.i.b16 %v2487_v54, %v2487_v54  ;;  %v3331_v44 = vpack.i.b16 %v2483_v28, %v2483_v28  ;;  %v3332_v29 = vpack.i.b16 %v2484_v43, %v2484_v43 }
 0x87b   :  { %v2535_v15 = vpack.i.b16 %v2505_v26, %v2505_v26  ;;  %v2497_v48 = vpack.i.b16 %v2489_v41, %v2489_v41  ;;  %v2499_v37 = vpack.i.b16 %v2491_v40, %v2491_v40  ;;  %v2493_v51 = vunpack.i.h.s16 %v2485_v3  ;;  %v5090_v40 = vld [vmem:[%s5267_s5 + $0x18] sm:$0xf] }
 0x87c   :  { %v2509_v11 = vrot.slane %v2495_v4, %v3790_v19  ;;  %v2513_v30 = vrot.slane %v3331_v44, %v3790_v19  ;;  %v2521_v35 = vrot.slane %v3332_v29, %v3790_v19  ;;  %v3333_v13 = vpack.i.b16 %v2485_v3, %v2485_v3 }
 0x87d   :  { %v2540_v21 = vrot.slane %v2535_v15, %v3790_v19  ;;  %v2517_v58 = vrot.slane %v2497_v48, %v3790_v19  ;;  %v2525_v39 = vrot.slane %v2499_v37, %v3790_v19  ;;  %v2501_v57 = vpack.i.b16 %v2493_v51, %v2493_v51 }
 0x87e   :  { %v2542_v9 = vpack.i.b16 %v2509_v11, %v2509_v11  ;;  %v2549_v6 = vpack.i.b16 %v2513_v30, %v2513_v30  ;;  %v2563_v56 = vpack.i.b16 %v2521_v35, %v2521_v35  ;;  %v2529_v46 = vrot.slane %v3333_v13, %v3790_v19 }
 0x87f   :  { %v2590_v2 = vmul.bf16 %v2540_v21, %v5030_v22  ;;  %v2556_v42 = vpack.i.b16 %v2517_v58, %v2517_v58  ;;  %v2570_v59 = vpack.i.b16 %v2525_v39, %v2525_v39  ;;  %v2533_v60 = vrot.slane %v2501_v57, %v3790_v19 }
 0x880   :  { %v2547_v0 = vrot.slane %v2542_v9, %v3790_v19  ;;  %v2554_v38 = vrot.slane %v2549_v6, %v3790_v19  ;;  %v2568_v63 = vrot.slane %v2563_v56, %v3790_v19  ;;  %v2577_v25 = vpack.i.b16 %v2529_v46, %v2529_v46 }
 0x881   :  { %v2598_v55 = vunpack.c.l.bf16 %v2590_v2  ;;  %v2561_v53 = vrot.slane %v2556_v42, %v3790_v19  ;;  %v2575_v17 = vrot.slane %v2570_v59, %v3790_v19  ;;  %v2584_v14 = vpack.i.b16 %v2533_v60, %v2533_v60 }
 0x882   :  { %v2591_v32 = vmul.bf16 %v2547_v0, %v5043_v24  ;;  %v2592_v27 = vmul.bf16 %v2554_v38, %v5048_v61  ;;  %v2594_v43 = vmul.bf16 %v2568_v63, %v5074_v12  ;;  %v2582_v54 = vrot.slane %v2577_v25, %v3790_v19  ;;  %v2630_v38 = vld [vmem:[%s5268_s6] sm:$0xff] }
 0x883   :  { %v2606_v31 = vsel %vm182_vm1, %v2598_v55, 0.0  ;;  %v2593_v20 = vmul.bf16 %v2561_v53, %v5055_v62  ;;  %v2595_v52 = vmul.bf16 %v2575_v17, %v5061_v18  ;;  %v2589_v23 = vrot.slane %v2584_v14, %v3790_v19 }
 0x884   :  { %2607 = vadd.xlane.f32.xlu1 %v2606_v31  ;;  %v2599_v49 = vunpack.c.l.bf16 %v2591_v32  ;;  %v2600_v28 = vunpack.c.l.bf16 %v2592_v27  ;;  %v2602_v4 = vunpack.c.l.bf16 %v2594_v43  ;;  %v2596_v44 = vmul.bf16 %v2582_v54, %v5090_v40 }
 0x885   :  { %v2601_v5 = vunpack.c.l.bf16 %v2593_v20  ;;  %v2603_v3 = vunpack.c.l.bf16 %v2595_v52  ;;  %v2597_v41 = vmul.bf16 %v2589_v23, %v5080_v10  ;;  %vm2631_vm0 = vcmp.gt.f32.partialorder %v2630_v38, 0.5 }
 0x886   :  { %v2609_v33 = vsel %vm182_vm1, %v2599_v49, 0.0  ;;  %v2612_v26 = vsel %vm182_vm1, %v2600_v28, 0.0  ;;  %v2618_v48 = vsel %vm182_vm1, %v2602_v4, 0.0  ;;  %v2604_v37 = vunpack.c.l.bf16 %v2596_v44 }
 0x887   :  { %2610 = vadd.xlane.f32.xlu0 %v2609_v33  ;;  %v2615_v36 = vsel %vm182_vm1, %v2601_v5, 0.0  ;;  %v2621_v29 = vsel %vm182_vm1, %v2603_v3, 0.0  ;;  %v2605_v15 = vunpack.c.l.bf16 %v2597_v41 }
 0x888   :  { %2616 = vadd.xlane.f32.xlu1 %v2615_v36  ;;  %v2624_v11 = vsel %vm182_vm1, %v2604_v37, 0.0 }
 0x889   :  { %v2627_v51 = vsel %vm182_vm1, %v2605_v15, 0.0 }
 0x88b   :  { %2613 = vadd.xlane.f32.xlu0 %v2612_v26 }
 0x88c   :  { %2622 = vadd.xlane.f32.xlu1 %v2621_v29 }
 0x88f   :  { %2619 = vadd.xlane.f32.xlu0 %v2618_v48 }
 0x890   :  { %2628 = vadd.xlane.f32.xlu1 %v2627_v51 }
 0x893   :  { %2625 = vadd.xlane.f32.xlu0 %v2624_v11 }
 0x911   :  { %v2608_v30 = vpop.xlane.xlu1 %2607 }
 0x912   :  { %v2643_v58 = vrot.slane %v2608_v30, %v5384_v50  ;;  %v3478_v30 = vld [vmem:[%s5270_s15] sm:$0xff]  }
 0x913   :  { %3434 = vmatpush3.bf16.msra.mxu1 %v3478_v30 }
 0x914   :  { %v2611_v35 = vpop.xlane.xlu0 %2610  ;;  %3435 = vmatprep.subr.bf16.mxu1 %v5387_v1 }
 0x915   :  { %v2617_v13 = vpop.xlane.xlu1 %2616  ;;  %v2647_v21 = vrot.slane %v2611_v35, %v5384_v50 }
 0x916   :  { %v2655_v46 = vrot.slane %v2617_v13, %v5384_v50 }
 0x917   :  { %v2672_v6 = vsel %vm832_vm8, %v2647_v21, %v2643_v58 }
 0x918   :  { %v2614_v39 = vpop.xlane.xlu0 %2613 }
 0x919   :  { %v2651_v57 = vrot.slane %v2614_v39, %v5384_v50  ;;  %v2623_v9 = vpop.xlane.xlu1 %2622 }
 0x91a   :  { %v2663_v55 = vrot.slane %v2623_v9, %v5384_v50 }
 0x91b   :  { %v2673_v56 = vsel %vm834_vm9, %v2651_v57, %v2672_v6 }
 0x91c   :  { %v2620_v2 = vpop.xlane.xlu0 %2619  ;;  %v2674_v59 = vsel %vm836_vm10, %v2655_v46, %v2673_v56 }
 0x91d   :  { %v2659_v42 = vrot.slane %v2620_v2, %v5384_v50  ;;  %v2629_v0 = vpop.xlane.xlu1 %2628 }
 0x91e   :  { %v2671_v14 = vrot.slane %v2629_v0, %v5384_v50 }
 0x91f   :  { %v2675_v60 = vsel %vm838_vm11, %v2659_v42, %v2674_v59 }
 0x920   :  { %v2626_v53 = vpop.xlane.xlu0 %2625  ;;  %v2676_v32 = vsel %vm840_vm12, %v2663_v55, %v2675_v60 }
 0x921   :  { %v2667_v17 = vrot.slane %v2626_v53, %v5384_v50 }
 0x923   :  { %v2677_v27 = vsel %vm842_vm13, %v2667_v17, %v2676_v32 }
 0x924   :  { %v2678_v63 = vsel %vm844_vm14, %v2671_v14, %v2677_v27 }
 0x925   :  { %v2680_v25 = vsel %vm2631_vm0, -1e+30, %v2678_v63 }
 0x926   :  { %v2682_v31 = vsel %vm2681_vm2, %v2680_v25, -inf }
 0x927   :  { %2683 = vmax.xlane.f32.xlu0 %v2682_v31 }
 0x9b4   :  { %v2684_v20 = vpop.xlane.xlu0 %2683 }
 0x9b5   :  { %v2685_v52 = vsub.f32 %v2680_v25, %v2684_v20 }
 0x9b7   :  { %v2686_v23 = vmul.f32 1.442695, %v2685_v52 }
 0x9b9   :  { %3588 = vpow2.f32 %v2686_v23 }
 0x9c3   :  { %v3589_v49 = vpop.eup %3588 }
 0x9c4   :  { %v2688_v5 = vsel %vm2681_vm2, %v3589_v49, 0.0 }
 0x9c5   :  { %2689 = vadd.xlane.f32.xlu1 %v2688_v5 }
 0xa52   :  { %v2690_v33 = vpop.xlane.xlu1 %2689 }
 0xa53   :  { %3590 = vrcp.f32 %v2690_v33 }
 0xa5d   :  { %v3591_v28 = vpop.eup %3590 }
 0xa5e   :  { %v2692_v43 = vmul.f32 %v3591_v28, %v3589_v49 }
 0xa60   :  { %v2693_v54 = vpack.c.bf16 %v2692_v43, %v2692_v43  ;;  %v3225_v36 = vsel %vm2681_vm2, %v2692_v43, 0.0 }
 0xa61   :  { %3226 = vst [vmem:[%s5269_s20] sm:$0xff] %v3225_v36 }
 0xa62   :  { %v2695_v3 = vpack.i.b16 %v2693_v54, %v2693_v54  ;;  %v2704_v41 = vshrl.u32 %v2693_v54, 16 }
 0xa64   :  { %v2717_v26 = vrot.slane %v2695_v3, %v4233_v16  ;;  %v2700_v4 = vrot.slane %v2695_v3, %v3790_v19  ;;  %v2705_v44 = vpack.i.b16 %v2704_v41, %v2704_v41  ;;  %v2731_v48 = vrot.slane %v2695_v3, %v4236_v7 }
 0xa65   :  { %v2745_v51 = vrot.slane %v2695_v3, %v4239_v45 }
 0xa66   :  { %2719 = vbcast.lane.c.b16.xlu1 %v2717_v26, 256  ;;  %2702 = vbcast.lane.c.b16.xlu0 %v2700_v4, 256  ;;  %v2710_v29 = vrot.slane %v2705_v44, %v3790_v19  ;;  %v2724_v15 = vrot.slane %v2705_v44, %v4233_v16  ;;  %v2738_v37 = vrot.slane %v2705_v44, %v4236_v7  ;;  %v3479_v16 = vld [vmem:[%s5270_s15 + $0x8] sm:$0xff]  }
 0xa67   :  { %v2752_v11 = vrot.slane %v2705_v44, %v4239_v45  ;;  %3436 = vmatpush3.bf16.msra.mxu1 %v3479_v16 }
 0xa6a   :  { %2712 = vbcast.lane.c.b16.xlu1 %v2710_v29, 256  ;;  %2726 = vbcast.lane.c.b16.xlu0 %v2724_v15, 256 }
 0xa6e   :  { %2733 = vbcast.lane.c.b16.xlu1 %v2731_v48, 256  ;;  %2740 = vbcast.lane.c.b16.xlu0 %v2738_v37, 256 }
 0xa72   :  { %2747 = vbcast.lane.c.b16.xlu1 %v2745_v51, 256  ;;  %2754 = vbcast.lane.c.b16.xlu0 %v2752_v11, 256 }
 0xad8   :  { %v2720_v7 = vpop.permute.xlu1 %2719  ;;  %v2703_v35 = vpop.permute.xlu0 %2702 }
 0xad9   :  { %v2758_v13 = vmul.bf16 %v2720_v7, %v5048_v61  ;;  %v2756_v45 = vmul.bf16 %v2703_v35, %v5030_v22 }
 0xadb   :  { %v2766_v21 = vunpack.c.l.bf16 %v2758_v13  ;;  %v2764_v58 = vunpack.c.l.bf16 %v2756_v45 }
 0xadc   :  { %v2713_v39 = vpop.permute.xlu1 %2712  ;;  %v2727_v57 = vpop.permute.xlu0 %2726 }
 0xadd   :  { %v2786_v9 = vsel %vm182_vm1, %v2766_v21, 0.0  ;;  %v2772_v6 = vsel %vm182_vm1, %v2764_v58, 0.0  ;;  %v2757_v56 = vmul.bf16 %v2713_v39, %v5043_v24  ;;  %v2759_v46 = vmul.bf16 %v2727_v57, %v5055_v62 }
 0xade   :  { %v2787_v2 = vrot.slane %v2786_v9, 4  ;;  %v2773_v42 = vrot.slane %v2772_v6, 4 }
 0xadf   :  { %v2765_v59 = vunpack.c.l.bf16 %v2757_v56  ;;  %v2767_v60 = vunpack.c.l.bf16 %v2759_v46 }
 0xae0   :  { %v2788_v0 = vadd.f32 %v2787_v2, %v2786_v9  ;;  %v2774_v61 = vadd.f32 %v2773_v42, %v2772_v6  ;;  %v2734_v38 = vpop.permute.xlu1 %2733  ;;  %v2741_v22 = vpop.permute.xlu0 %2740 }
 0xae1   :  { %v2779_v55 = vsel %vm182_vm1, %v2765_v59, 0.0  ;;  %v2793_v53 = vsel %vm182_vm1, %v2767_v60, 0.0  ;;  %v2760_v17 = vmul.bf16 %v2734_v38, %v5074_v12  ;;  %v2761_v14 = vmul.bf16 %v2741_v22, %v5061_v18 }
 0xae2   :  { %v2789_v32 = vrot.slane %v2788_v0, 2  ;;  %v2775_v24 = vrot.slane %v2774_v61, 2  ;;  %v2780_v27 = vrot.slane %v2779_v55, 4  ;;  %v2794_v62 = vrot.slane %v2793_v53, 4 }
 0xae3   :  { %v2768_v63 = vunpack.c.l.bf16 %v2760_v17  ;;  %v2769_v25 = vunpack.c.l.bf16 %v2761_v14 }
 0xae4   :  { %v2790_v31 = vadd.f32 %v2789_v32, %v2788_v0  ;;  %v2776_v20 = vadd.f32 %v2775_v24, %v2774_v61  ;;  %v2781_v52 = vadd.f32 %v2780_v27, %v2779_v55  ;;  %v2795_v23 = vadd.f32 %v2794_v62, %v2793_v53  ;;  %v2748_v49 = vpop.permute.xlu1 %2747  ;;  %v2755_v5 = vpop.permute.xlu0 %2754 }
 0xae5   :  { %v2800_v33 = vsel %vm182_vm1, %v2768_v63, 0.0  ;;  %v2807_v28 = vsel %vm182_vm1, %v2769_v25, 0.0  ;;  %v2762_v12 = vmul.bf16 %v2748_v49, %v5090_v40  ;;  %v2763_v18 = vmul.bf16 %v2755_v5, %v5080_v10 }
 0xae6   :  { %v2791_v43 = vrot.slane %v2790_v31, 1  ;;  %v2777_v54 = vrot.slane %v2776_v20, 1  ;;  %v2782_v36 = vrot.slane %v2781_v52, 2  ;;  %v2796_v3 = vrot.slane %v2795_v23, 2 }
 0xae7   :  { %v2801_v41 = vrot.slane %v2800_v33, 4  ;;  %v2808_v26 = vrot.slane %v2807_v28, 4  ;;  %v2770_v4 = vunpack.c.l.bf16 %v2762_v12  ;;  %v2771_v44 = vunpack.c.l.bf16 %v2763_v18 }
 0xae8   :  { %v2792_v29 = vadd.f32 %v2791_v43, %v2790_v31  ;;  %v2778_v15 = vadd.f32 %v2777_v54, %v2776_v20  ;;  %v2783_v48 = vadd.f32 %v2782_v36, %v2781_v52  ;;  %v2797_v37 = vadd.f32 %v2796_v3, %v2795_v23 }
 0xae9   :  { %v2802_v51 = vadd.f32 %v2801_v41, %v2800_v33  ;;  %v2809_v11 = vadd.f32 %v2808_v26, %v2807_v28  ;;  %v2814_v30 = vsel %vm182_vm1, %v2770_v4, 0.0  ;;  %v2821_v40 = vsel %vm182_vm1, %v2771_v44, 0.0  ;;  %v3480_v4 = vld [vmem:[%s5271_s17] sm:$0xff]   ;;  %v3481_v44 = vld [vmem:[%s5271_s17 + $0x8] sm:$0xff]  }
 0xaea   :  { %v2784_v16 = vrot.slane %v2783_v48, 1  ;;  %v2798_v10 = vrot.slane %v2797_v37, 1  ;;  %v2815_v13 = vrot.slane %v2814_v30, 4  ;;  %v2822_v45 = vrot.slane %v2821_v40, 4  ;;  %3442 = vmatpush3.bf16.msra.mxu0 %v3480_v4 }
 0xaeb   :  { %v2803_v7 = vrot.slane %v2802_v51, 2  ;;  %v2810_v35 = vrot.slane %v2809_v11, 2  ;;  %v2830_v21 = vpack.c.bf16 %v2792_v29, %v2792_v29  ;;  %v2828_v58 = vpack.c.bf16 %v2778_v15, %v2778_v15  ;;  %3443 = vmatprep.subr.bf16.mxu0 %v5387_v1 }
 0xaec   :  { %v2785_v39 = vadd.f32 %v2784_v16, %v2783_v48  ;;  %v2799_v57 = vadd.f32 %v2798_v10, %v2797_v37  ;;  %v2816_v56 = vadd.f32 %v2815_v13, %v2814_v30  ;;  %v2823_v46 = vadd.f32 %v2822_v45, %v2821_v40 }
 0xaed   :  { %v2804_v9 = vadd.f32 %v2803_v7, %v2802_v51  ;;  %v2811_v6 = vadd.f32 %v2810_v35, %v2809_v11  ;;  %v2906_v38 = vunpack.c.l.b16 %v2830_v21  ;;  %v2904_v22 = vunpack.c.l.b16 %v2828_v58 }
 0xaee   :  { %v2829_v2 = vpack.c.bf16 %v2785_v39, %v2785_v39  ;;  %v2831_v42 = vpack.c.bf16 %v2799_v57, %v2799_v57  ;;  %v2817_v0 = vrot.slane %v2816_v56, 2  ;;  %v2824_v61 = vrot.slane %v2823_v46, 2  ;;  %3444 = vmatpush3.bf16.msra.mxu0 %v3481_v44 }
 0xaef   :  { %v2805_v59 = vrot.slane %v2804_v9, 1  ;;  %v2812_v60 = vrot.slane %v2811_v6, 1 }
 0xaf0   :  { %v2905_v55 = vunpack.c.l.b16 %v2829_v2  ;;  %v2818_v14 = vadd.f32 %v2817_v0, %v2816_v56  ;;  %v2825_v32 = vadd.f32 %v2824_v61, %v2823_v46  ;;  %v2907_v27 = vunpack.c.l.b16 %v2831_v42 }
 0xaf1   :  { %v2806_v53 = vadd.f32 %v2805_v59, %v2804_v9  ;;  %v2813_v17 = vadd.f32 %v2812_v60, %v2811_v6 }
 0xaf2   :  { %v2912_v24 = vsel %vm832_vm8, %v2905_v55, %v2904_v22  ;;  %v2819_v31 = vrot.slane %v2818_v14, 1  ;;  %v2826_v52 = vrot.slane %v2825_v32, 1 }
 0xaf3   :  { %v2913_v62 = vsel %vm834_vm9, %v2906_v38, %v2912_v24  ;;  %v2832_v63 = vpack.c.bf16 %v2806_v53, %v2806_v53  ;;  %v2833_v25 = vpack.c.bf16 %v2813_v17, %v2813_v17  ;;  %v2976_v53 = vld [vmem:[%s5273_s2] sm:$0xf] }
 0xaf4   :  { %v2914_v20 = vsel %vm836_vm10, %v2907_v27, %v2913_v62  ;;  %v2820_v49 = vadd.f32 %v2819_v31, %v2818_v14  ;;  %v2827_v33 = vadd.f32 %v2826_v52, %v2825_v32  ;;  %v2977_v62 = vld [vmem:[%s5273_s2 + $0x4] sm:$0xf] }
 0xaf5   :  { %v2908_v23 = vunpack.c.l.b16 %v2832_v63  ;;  %v2909_v5 = vunpack.c.l.b16 %v2833_v25 }
 0xaf6   :  { %v2834_v12 = vpack.c.bf16 %v2820_v49, %v2820_v49  ;;  %v2835_v18 = vpack.c.bf16 %v2827_v33, %v2827_v33 }
 0xaf7   :  { %v2915_v28 = vsel %vm838_vm11, %v2908_v23, %v2914_v20  ;;  %v2978_v23 = vld [vmem:[%s5273_s2 + $0x8] sm:$0xf] }
 0xaf8   :  { %v2910_v43 = vunpack.c.l.b16 %v2834_v12  ;;  %v2916_v54 = vsel %vm840_vm12, %v2909_v5, %v2915_v28  ;;  %v2911_v36 = vunpack.c.l.b16 %v2835_v18  ;;  %v2979_v28 = vld [vmem:[%s5273_s2 + $0xc] sm:$0xf] }
 0xafa   :  { %v2917_v3 = vsel %vm842_vm13, %v2910_v43, %v2916_v54 }
 0xafb   :  { %v2918_v41 = vsel %vm844_vm14, %v2911_v36, %v2917_v3  ;;  %v2981_v3 = vld [vmem:[%s5273_s2 + $0x14] sm:$0xf] }
 0xafc   :  { %v2919_v26 = vpack.c.b16 %v2918_v41, %v2918_v41 }
 0xafe   :  { %3438 = vmatmul.mubr.msk.bf16.vlgmr.msra.gmra.mrb[12].mxu1 %vm182_vm1, %v2919_v26  ;;  %v2980_v26 = vld [vmem:[%s5273_s2 + $0x10] sm:$0xf] }
 0xbd1   :  { %v2969_v29 = vpop.f32.mrb[12].mxu1 }
 0xbd2   :  { %3592 = vtanh.f32 %v2969_v29  ;;  %v3439_v15 = vpop.f32.mrb[13].mxu1 }
 0xbd3   :  { %v2972_v48 = vpop.f32.mrb[14].mxu1 }
 0xbd4   :  { %v3440_v37 = vpop.f32.mrb[15].mxu1 }
 0xbdc   :  { %v3593_v51 = vpop.eup %3592 }
 0xbdd   :  { %v2984_v11 = vpack.c.bf16 %v3593_v51, %v3593_v51  ;;  %3224 = vst.msk [vmem:[%s5272_s22] sm:$0xff] %vm182_vm1, %v3593_v51 }
 0xbdf   :  { %3446 = vmatmul.mubr.msk.bf16.vlgmr.msra.gmra.mrb[12].mxu0 %vm182_vm1, %v2984_v11 }
 0xcb2   :  { %v3038_v30 = vpop.f32.mrb[12].mxu0 }
 0xcb3   :  { %v3044_v40 = vpack.c.bf16 %v3038_v30, %v3038_v30  ;;  %v3447_v16 = vpop.f32.mrb[13].mxu0 }
 0xcb4   :  { %v3041_v10 = vpop.f32.mrb[14].mxu0 }
 0xcb5   :  { %v3052_v1 = vrot.slane %v3044_v40, %v5424_v8  ;;  %v3448_v7 = vpop.f32.mrb[15].mxu0 }
 0xcb7   :  { %v3053_v35 = vcombine.high %v3052_v1, %v3052_v1  ;;  %v3060_v13 = vrot.slane %v3052_v1, %v5424_v8  ;;  %v2983_v1 = vld [vmem:[%s5273_s2 + $0x1c] sm:$0xf] }
 0xcb9   :  { %v3067_v45 = vrot.slane %v3053_v35, %v5424_v8  ;;  %v3068_v21 = vcombine.high %v3060_v13, %v3060_v13  ;;  %v3071_v58 = vunpack.i.h.s16 %v3060_v13  ;;  %v3343_v39 = vpack.i.b16 %v3060_v13, %v3060_v13  ;;  %v2982_v35 = vld [vmem:[%s5273_s2 + $0x18] sm:$0xf]  ;;  %s3642_s2 = smov 96  }
 0xcbb   :  { %v3069_v57 = vcombine.high %v3067_v45, %v3067_v45  ;;  %v3073_v9 = vunpack.i.h.s16 %v3067_v45  ;;  %v3075_v6 = vunpack.i.h.s16 %v3068_v21  ;;  %v3079_v56 = vpack.i.b16 %v3071_v58, %v3071_v58 }
 0xcbc   :  { %v3089_v46 = vrot.slane %v3343_v39, %v3790_v19  ;;  %v3344_v2 = vpack.i.b16 %v3067_v45, %v3067_v45  ;;  %v3345_v42 = vpack.i.b16 %v3068_v21, %v3068_v21 }
 0xcbd   :  { %v3093_v59 = vrot.slane %v3079_v56, %v3790_v19  ;;  %v3081_v60 = vpack.i.b16 %v3073_v9, %v3073_v9  ;;  %v3083_v0 = vpack.i.b16 %v3075_v6, %v3075_v6  ;;  %v3077_v61 = vunpack.i.h.s16 %v3069_v57 }
 0xcbe   :  { %v3119_v38 = vpack.i.b16 %v3089_v46, %v3089_v46  ;;  %v3097_v22 = vrot.slane %v3344_v2, %v3790_v19  ;;  %v3105_v8 = vrot.slane %v3345_v42, %v3790_v19  ;;  %v3346_v55 = vpack.i.b16 %v3069_v57, %v3069_v57 }
 0xcbf   :  { %v3126_v17 = vpack.i.b16 %v3093_v59, %v3093_v59  ;;  %v3101_v14 = vrot.slane %v3081_v60, %v3790_v19  ;;  %v3109_v32 = vrot.slane %v3083_v0, %v3790_v19  ;;  %v3085_v24 = vpack.i.b16 %v3077_v61, %v3077_v61 }
 0xcc0   :  { %v3124_v27 = vrot.slane %v3119_v38, %v3790_v19  ;;  %v3133_v63 = vpack.i.b16 %v3097_v22, %v3097_v22  ;;  %v3147_v25 = vpack.i.b16 %v3105_v8, %v3105_v8  ;;  %v3113_v31 = vrot.slane %v3346_v55, %v3790_v19 }
 0xcc1   :  { %v3131_v20 = vrot.slane %v3126_v17, %v3790_v19  ;;  %v3140_v52 = vpack.i.b16 %v3101_v14, %v3101_v14  ;;  %v3154_v49 = vpack.i.b16 %v3109_v32, %v3109_v32  ;;  %v3117_v5 = vrot.slane %v3085_v24, %v3790_v19 }
 0xcc2   :  { %v3174_v33 = vmul.bf16 %v3124_v27, %v2976_v53  ;;  %v3138_v12 = vrot.slane %v3133_v63, %v3790_v19  ;;  %v3152_v18 = vrot.slane %v3147_v25, %v3790_v19  ;;  %v3161_v43 = vpack.i.b16 %v3113_v31, %v3113_v31 }
 0xcc3   :  { %v3175_v54 = vmul.bf16 %v3131_v20, %v2977_v62  ;;  %v3145_v36 = vrot.slane %v3140_v52, %v3790_v19  ;;  %v3159_v41 = vrot.slane %v3154_v49, %v3790_v19  ;;  %v3168_v4 = vpack.i.b16 %v3117_v5, %v3117_v5 }
 0xcc4   :  { %v3182_v44 = vunpack.c.l.bf16 %v3174_v33  ;;  %v3176_v29 = vmul.bf16 %v3138_v12, %v2978_v23  ;;  %v3178_v11 = vmul.bf16 %v3152_v18, %v2980_v26  ;;  %v3166_v7 = vrot.slane %v3161_v43, %v3790_v19 }
 0xcc5   :  { %v3183_v15 = vunpack.c.l.bf16 %v3175_v54  ;;  %v3177_v48 = vmul.bf16 %v3145_v36, %v2979_v28  ;;  %v3179_v51 = vmul.bf16 %v3159_v41, %v2981_v3  ;;  %v3173_v30 = vrot.slane %v3168_v4, %v3790_v19 }
 0xcc6   :  { %v3190_v37 = vsel %vm468_vm3, %v3182_v44, 0.0  ;;  %v3184_v10 = vunpack.c.l.bf16 %v3176_v29  ;;  %v3186_v39 = vunpack.c.l.bf16 %v3178_v11  ;;  %v3180_v57 = vmul.bf16 %v3166_v7, %v2982_v35 }
 0xcc7   :  { %3191 = vadd.xlane.f32.xlu1 %v3190_v37  ;;  %v3193_v40 = vsel %vm468_vm3, %v3183_v15, 0.0  ;;  %v3185_v16 = vunpack.c.l.bf16 %v3177_v48  ;;  %v3187_v45 = vunpack.c.l.bf16 %v3179_v51  ;;  %v3181_v21 = vmul.bf16 %v3173_v30, %v2983_v1 }
 0xcc8   :  { %3194 = vadd.xlane.f32.xlu0 %v3193_v40  ;;  %v3196_v58 = vsel %vm468_vm3, %v3184_v10, 0.0  ;;  %v3202_v19 = vsel %vm468_vm3, %v3186_v39, 0.0  ;;  %v3188_v56 = vunpack.c.l.bf16 %v3180_v57 }
 0xcc9   :  { %v3199_v13 = vsel %vm468_vm3, %v3185_v16, 0.0  ;;  %v3205_v9 = vsel %vm468_vm3, %v3187_v45, 0.0  ;;  %v3189_v6 = vunpack.c.l.bf16 %v3181_v21 }
 0xcca   :  { %v3208_v2 = vsel %vm468_vm3, %v3188_v56, 0.0 }
 0xccb   :  { %3200 = vadd.xlane.f32.xlu1 %v3199_v13  ;;  %v3211_v46 = vsel %vm468_vm3, %v3189_v6, 0.0 }
 0xccc   :  { %3197 = vadd.xlane.f32.xlu0 %v3196_v58 }
 0xccf   :  { %3206 = vadd.xlane.f32.xlu1 %v3205_v9 }
 0xcd0   :  { %3203 = vadd.xlane.f32.xlu0 %v3202_v19 }
 0xcd3   :  { %3212 = vadd.xlane.f32.xlu1 %v3211_v46 }
 0xcd4   :  { %3209 = vadd.xlane.f32.xlu0 %v3208_v2 }
 0xce4   :  { %3220 = vrot.lane.b32.xlu1 %v4993_v34, %s3642_s2 }
 0xcea   :  { %3215 = vrot.lane.b32.xlu0 %v5012_v47, %s3638_s24 }
 0xd54   :  { %v3192_v42 = vpop.xlane.xlu1 %3191 }
 0xd55   :  { %v3195_v59 = vpop.xlane.xlu0 %3194  ;;  %v3238_v61 = vrot.slane %v3192_v42, %v5384_v50 }
 0xd56   :  { %v3242_v60 = vrot.slane %v3195_v59, %v5384_v50 }
 0xd58   :  { %v3201_v0 = vpop.xlane.xlu1 %3200  ;;  %v3267_v8 = vsel %vm832_vm8, %v3242_v60, %v3238_v61 }
 0xd59   :  { %v3198_v38 = vpop.xlane.xlu0 %3197  ;;  %v3250_v34 = vrot.slane %v3201_v0, %v5384_v50 }
 0xd5a   :  { %v3246_v22 = vrot.slane %v3198_v38, %v5384_v50 }
 0xd5c   :  { %v3268_v55 = vsel %vm834_vm9, %v3246_v22, %v3267_v8  ;;  %v3207_v53 = vpop.xlane.xlu1 %3206 }
 0xd5d   :  { %v3204_v17 = vpop.xlane.xlu0 %3203  ;;  %v3269_v14 = vsel %vm836_vm10, %v3250_v34, %v3268_v55  ;;  %v3258_v27 = vrot.slane %v3207_v53, %v5384_v50 }
 0xd5e   :  { %v3254_v47 = vrot.slane %v3204_v17, %v5384_v50 }
 0xd60   :  { %v3270_v32 = vsel %vm838_vm11, %v3254_v47, %v3269_v14  ;;  %v3213_v24 = vpop.xlane.xlu1 %3212 }
 0xd61   :  { %v3210_v62 = vpop.xlane.xlu0 %3209  ;;  %v3266_v25 = vrot.slane %v3213_v24, %v5384_v50  ;;  %v3271_v31 = vsel %vm840_vm12, %v3258_v27, %v3270_v32 }
 0xd62   :  { %v3262_v63 = vrot.slane %v3210_v62, %v5384_v50 }
 0xd64   :  { %v3272_v20 = vsel %vm842_vm13, %v3262_v63, %v3271_v31  ;;  %v3221_v52 = vpop.permute.xlu1 %3220 }
 0xd65   :  { %v3273_v23 = vsel %vm844_vm14, %v3266_v25, %v3272_v20  ;;  %3223 = vst.msk [vmem:[%s5274_s19] sm:$0xff] %vm182_vm1, %v3221_v52  ;;  %v3216_v49 = vpop.permute.xlu0 %3215 }
 0xd66   :  { %v3275_v5 = vsel %vm2681_vm2, %v3273_v23, 0.0  ;;  %3218 = vst.msk [vmem:[%s5275_s18] sm:$0xff] %vm182_vm1, %v3216_v49 }
 0xd67   :  { %3276 = vst [vmem:[%s5276_s21] sm:$0xff] %v3275_v5 }

</bundles_post_ra>
